<compile_context>
chip_gen: v6e
topology: v6e:2x2x1
jax: 0.10.0
libtpu: 0.0.40
codegen_flags: <defaults>
</compile_context>

<pallas_src>
import functools

import jax
import jax.numpy as jnp
from jax.experimental import pallas as pl
from jax.experimental.pallas import tpu as pltpu

OUT_SCALE = 0.001


def _siamfc_kernel(z_ref, x_ref, o_ref, *, hz, wz, Ho, Wo, out_scale):
    """One grid step: B search images against their per-image exemplars.

    z_ref: (B, hz, wz, c)   exemplar of each image in the block, channels-last
    x_ref: (B, hx, wx, c)   search features, channels-last (c on the 128-lane axis)
    o_ref: (B, Ho, Wo)      response maps
    """
    B = x_ref.shape[0]

    # Single whole-block reads; no per-shift dtype/relayout copies of x.
    zv = z_ref[...]
    xv = x_ref[...]

    # Carried accumulator is only (B, Ho, Wo): the channel contraction happens per
    # shift (XLU lane reduce), so no multi-MiB value is round-tripped through VMEM.
    acc = jnp.zeros((B, Ho, Wo), jnp.float32)

    # Static hz*wz unroll is fine now: the per-iteration working set (w, t, acc) fits
    # comfortably in vregs, so live ranges stay small.
    for dh in range(hz):
        # dh shift is a slice along a leading (non-vreg) dim -> no relayout copy.
        xs = xv[:, dh:dh + Ho, :, :]                          # (B, Ho, wx, c)
        for dw in range(wz):
            w = zv[:, dh, dw, :][:, None, None, :]            # (B, 1, 1, c)
            # Contract channels over the *unshifted* width (no misaligned sublane slice
            # of the big x slab); the dw shift is applied afterwards to the tiny reduced
            # map t instead. Multiply in input dtype, accumulate in f32.
            t = jnp.sum(xs * w, axis=-1, dtype=jnp.float32)   # (B, Ho, wx)
            acc = acc + t[:, :, dw:dw + Wo]                   # (B, Ho, Wo)

    o_ref[...] = (acc * jnp.float32(out_scale)).astype(o_ref.dtype)


def siamfc_forward(z, x, out_scale=OUT_SCALE, hbm_dtype=None):
    """Pallas implementation of SiamFC.forward(z, x). z: (nz,c,hz,wz), x: (nx,c,hx,wx)."""
    nz, cz, hz, wz = z.shape
    nx, c, hx, wx = x.shape
    assert c == cz, "z and x must have the same channel count"
    assert nx % nz == 0, "x batch must be a multiple of z batch"
    assert hz <= hx and wz <= wx, "exemplar must not be larger than the search feature"
    Ho, Wo = hx - hz + 1, wx - wz + 1

    if hbm_dtype is not None:  # e.g. jnp.bfloat16 on v5e: halves HBM/DMA bytes
        z = z.astype(hbm_dtype)
        x = x.astype(hbm_dtype)

    # Channels-last so c fills the 128-wide lane axis inside the kernel.
    # TODO(synk): this wrapper transpose is an extra HBM round trip of x; ideally the
    # producing conv emits NHWC directly (or the relayout is folded into the kernel via
    # per-channel-chunk BlockSpecs + in-kernel einshape) so the kernel reads x once.
    z_nhwc = jnp.transpose(z, (0, 2, 3, 1))                   # (nz, hz, wz, c)
    x_nhwc = jnp.transpose(x, (0, 2, 3, 1))                   # (nx, hx, wx, c)

    # Per-image exemplar table: the template of image b is z[b % nz]. z is tiny, so the
    # nx-fold expansion costs ~nothing and lets the batch tile B be any divisor of nx.
    z_exp = jnp.take(z_nhwc, jnp.arange(nx) % nz, axis=0)     # (nx, hz, wz, c)

    # Batch tile B: prefer >= 4 grid steps (double-buffering hides the x DMA and both
    # v7x TensorCores get >= 2 steps each under "parallel"), fall back to >= 2, and cap
    # the per-step x block at ~8 MiB so 2x-buffered inputs + f32 temporaries stay well
    # inside even v7x's 64 MiB physical VMEM.
    per_img_bytes = hx * wx * c * x_nhwc.dtype.itemsize
    budget_bytes = 8 * 1024 * 1024
    divisors = [b for b in range(1, nx + 1) if nx % b == 0]
    cands = [b for b in divisors if b * per_img_bytes <= budget_bytes] or [1]
    B = max([b for b in cands if nx // b >= 4]
            or [b for b in cands if nx // b >= 2]
            or cands)

    # Generation-aware scoped-VMEM limit: ~3/4 of physical -> ~48 MiB on v7x (64 MiB
    # physical), 96 MiB on v5e/v6e (128 MiB physical).
    try:
        phys_vmem = pltpu.get_tpu_info().vmem_capacity_bytes
    except Exception:
        phys_vmem = 64 * 1024 * 1024
    vmem_limit = int(max(32 * 1024 * 1024,
                         min(96 * 1024 * 1024, (phys_vmem * 3) // 4)))

    kernel = functools.partial(
        _siamfc_kernel, hz=hz, wz=wz, Ho=Ho, Wo=Wo, out_scale=out_scale
    )

    out = pl.pallas_call(
        kernel,
        out_shape=jax.ShapeDtypeStruct((nx, Ho, Wo), x.dtype),
        grid=(nx // B,),
        in_specs=[
            pl.BlockSpec((B, hz, wz, c), lambda m: (m, 0, 0, 0)),   # exemplars (tiny)
            pl.BlockSpec((B, hx, wx, c), lambda m: (m, 0, 0, 0)),   # search images
        ],
        out_specs=pl.BlockSpec((B, Ho, Wo), lambda m: (m, 0, 0)),
        compiler_params=pltpu.CompilerParams(
            dimension_semantics=("parallel",),    # independent batch blocks (megacore)
            vmem_limit_bytes=vmem_limit,
        ),
    )(z_exp, x_nhwc)

    return out.reshape(nx, 1, Ho, Wo)


def siamfc_reference(z, x, out_scale=OUT_SCALE):
    """Pure-JAX mirror of the torch grouped-conv implementation."""
    nz = z.shape[0]
    nx, c, h, w = x.shape
    xv = x.reshape(-1, nz * c, h, w)
    out = jax.lax.conv_general_dilated(
        xv, z,
        window_strides=(1, 1),
        padding="VALID",
        dimension_numbers=("NCHW", "OIHW", "NCHW"),
        feature_group_count=nz,
    )
    out = out.reshape(nx, -1, out.shape[-2], out.shape[-1])
    return out * out_scale


if __name__ == "__main__":
    key = jax.random.PRNGKey(0)
    kz, kx = jax.random.split(key)

    # Small shapes consistent with the forward: nz divides nx, same channel count,
    # exemplar spatially smaller than the search feature map.
    nz, c, hz, wz = 2, 4, 4, 4
    nx, hx, wx = 4, 16, 16

    z = jax.random.normal(kz, (nz, c, hz, wz), dtype=jnp.float32)
    x = jax.random.normal(kx, (nx, c, hx, wx), dtype=jnp.float32)

    out = siamfc_forward(z, x)
    out = jax.block_until_ready(out)

    ref = siamfc_reference(z, x)
    assert out.shape == (nx, 1, hx - hz + 1, wx - wz + 1), out.shape
    assert jnp.allclose(out, ref, atol=1e-5, rtol=1e-5), "mismatch vs reference"

    print("KERNEL_OK")
</pallas_src>

<mosaic_0001>
module attributes {stable_mosaic.version = 11 : i64} {
  func.func @_siamfc_kernel(%arg0: i32, %arg1: memref<1x4x4x4xf32, #tpu.memory_space<vmem>>, %arg2: memref<1x16x16x4xf32, #tpu.memory_space<vmem>>, %arg3: memref<1x13x13xf32, #tpu.memory_space<vmem>>) attributes {dimension_semantics = [#tpu.dimension_semantics<parallel>], iteration_bounds = array<i64: 4>, scalar_prefetch = 0 : i64, scratch_operands = 0 : i64, tpu.core_type = #tpu.core_type<tc>, window_params = [{transform_indices = @transform_0, window_bounds = array<i64: 1, 4, 4, 4>}, {transform_indices = @transform_1, window_bounds = array<i64: 1, 16, 16, 4>}, {transform_indices = @transform_2, window_bounds = array<i64: 1, 13, 13>}]} {
    %c0 = arith.constant 0 : index
    %c0_0 = arith.constant 0 : index
    %c0_1 = arith.constant 0 : index
    %c0_2 = arith.constant 0 : index
    %0 = vector.load %arg1[%c0, %c0_0, %c0_1, %c0_2] : memref<1x4x4x4xf32, #tpu.memory_space<vmem>>, vector<1x4x4x4xf32>
    %c0_3 = arith.constant 0 : index
    %c0_4 = arith.constant 0 : index
    %c0_5 = arith.constant 0 : index
    %c0_6 = arith.constant 0 : index
    %1 = vector.load %arg2[%c0_3, %c0_4, %c0_5, %c0_6] : memref<1x16x16x4xf32, #tpu.memory_space<vmem>>, vector<1x16x16x4xf32>
    %cst = arith.constant 0.000000e+00 : f32
    %2 = vector.broadcast %cst : f32 to vector<1x13x13xf32>
    %3 = vector.extract_strided_slice %1 {offsets = [0, 0, 0, 0], sizes = [1, 13, 16, 4], strides = [1, 1, 1, 1]} : vector<1x16x16x4xf32> to vector<1x13x16x4xf32>
    %4 = vector.extract_strided_slice %0 {offsets = [0, 0, 0, 0], sizes = [1, 1, 1, 4], strides = [1, 1, 1, 1]} : vector<1x4x4x4xf32> to vector<1x1x1x4xf32>
    %5 = vector.shape_cast %4 : vector<1x1x1x4xf32> to vector<1x4xf32>
    %6 = vector.shape_cast %5 : vector<1x4xf32> to vector<1x1x1x4xf32>
    %7 = vector.broadcast %6 : vector<1x1x1x4xf32> to vector<1x13x16x4xf32>
    %8 = arith.mulf %3, %7 : vector<1x13x16x4xf32>
    %cst_7 = arith.constant dense<0.000000e+00> : vector<1x13x16xf32>
    %9 = vector.multi_reduction <add>, %8, %cst_7 [3] : vector<1x13x16x4xf32> to vector<1x13x16xf32>
    %10 = vector.extract_strided_slice %9 {offsets = [0, 0, 0], sizes = [1, 13, 13], strides = [1, 1, 1]} : vector<1x13x16xf32> to vector<1x13x13xf32>
    %11 = arith.addf %2, %10 : vector<1x13x13xf32>
    %12 = vector.extract_strided_slice %0 {offsets = [0, 0, 1, 0], sizes = [1, 1, 1, 4], strides = [1, 1, 1, 1]} : vector<1x4x4x4xf32> to vector<1x1x1x4xf32>
    %13 = vector.shape_cast %12 : vector<1x1x1x4xf32> to vector<1x4xf32>
    %14 = vector.shape_cast %13 : vector<1x4xf32> to vector<1x1x1x4xf32>
    %15 = vector.broadcast %14 : vector<1x1x1x4xf32> to vector<1x13x16x4xf32>
    %16 = arith.mulf %3, %15 : vector<1x13x16x4xf32>
    %cst_8 = arith.constant dense<0.000000e+00> : vector<1x13x16xf32>
    %17 = vector.multi_reduction <add>, %16, %cst_8 [3] : vector<1x13x16x4xf32> to vector<1x13x16xf32>
    %18 = vector.extract_strided_slice %17 {offsets = [0, 0, 1], sizes = [1, 13, 13], strides = [1, 1, 1]} : vector<1x13x16xf32> to vector<1x13x13xf32>
    %19 = arith.addf %11, %18 : vector<1x13x13xf32>
    %20 = vector.extract_strided_slice %0 {offsets = [0, 0, 2, 0], sizes = [1, 1, 1, 4], strides = [1, 1, 1, 1]} : vector<1x4x4x4xf32> to vector<1x1x1x4xf32>
    %21 = vector.shape_cast %20 : vector<1x1x1x4xf32> to vector<1x4xf32>
    %22 = vector.shape_cast %21 : vector<1x4xf32> to vector<1x1x1x4xf32>
    %23 = vector.broadcast %22 : vector<1x1x1x4xf32> to vector<1x13x16x4xf32>
    %24 = arith.mulf %3, %23 : vector<1x13x16x4xf32>
    %cst_9 = arith.constant dense<0.000000e+00> : vector<1x13x16xf32>
    %25 = vector.multi_reduction <add>, %24, %cst_9 [3] : vector<1x13x16x4xf32> to vector<1x13x16xf32>
    %26 = vector.extract_strided_slice %25 {offsets = [0, 0, 2], sizes = [1, 13, 13], strides = [1, 1, 1]} : vector<1x13x16xf32> to vector<1x13x13xf32>
    %27 = arith.addf %19, %26 : vector<1x13x13xf32>
    %28 = vector.extract_strided_slice %0 {offsets = [0, 0, 3, 0], sizes = [1, 1, 1, 4], strides = [1, 1, 1, 1]} : vector<1x4x4x4xf32> to vector<1x1x1x4xf32>
    %29 = vector.shape_cast %28 : vector<1x1x1x4xf32> to vector<1x4xf32>
    %30 = vector.shape_cast %29 : vector<1x4xf32> to vector<1x1x1x4xf32>
    %31 = vector.broadcast %30 : vector<1x1x1x4xf32> to vector<1x13x16x4xf32>
    %32 = arith.mulf %3, %31 : vector<1x13x16x4xf32>
    %cst_10 = arith.constant dense<0.000000e+00> : vector<1x13x16xf32>
    %33 = vector.multi_reduction <add>, %32, %cst_10 [3] : vector<1x13x16x4xf32> to vector<1x13x16xf32>
    %34 = vector.extract_strided_slice %33 {offsets = [0, 0, 3], sizes = [1, 13, 13], strides = [1, 1, 1]} : vector<1x13x16xf32> to vector<1x13x13xf32>
    %35 = arith.addf %27, %34 : vector<1x13x13xf32>
    %36 = vector.extract_strided_slice %1 {offsets = [0, 1, 0, 0], sizes = [1, 13, 16, 4], strides = [1, 1, 1, 1]} : vector<1x16x16x4xf32> to vector<1x13x16x4xf32>
    %37 = vector.extract_strided_slice %0 {offsets = [0, 1, 0, 0], sizes = [1, 1, 1, 4], strides = [1, 1, 1, 1]} : vector<1x4x4x4xf32> to vector<1x1x1x4xf32>
    %38 = vector.shape_cast %37 : vector<1x1x1x4xf32> to vector<1x4xf32>
    %39 = vector.shape_cast %38 : vector<1x4xf32> to vector<1x1x1x4xf32>
    %40 = vector.broadcast %39 : vector<1x1x1x4xf32> to vector<1x13x16x4xf32>
    %41 = arith.mulf %36, %40 : vector<1x13x16x4xf32>
    %cst_11 = arith.constant dense<0.000000e+00> : vector<1x13x16xf32>
    %42 = vector.multi_reduction <add>, %41, %cst_11 [3] : vector<1x13x16x4xf32> to vector<1x13x16xf32>
    %43 = vector.extract_strided_slice %42 {offsets = [0, 0, 0], sizes = [1, 13, 13], strides = [1, 1, 1]} : vector<1x13x16xf32> to vector<1x13x13xf32>
    %44 = arith.addf %35, %43 : vector<1x13x13xf32>
    %45 = vector.extract_strided_slice %0 {offsets = [0, 1, 1, 0], sizes = [1, 1, 1, 4], strides = [1, 1, 1, 1]} : vector<1x4x4x4xf32> to vector<1x1x1x4xf32>
    %46 = vector.shape_cast %45 : vector<1x1x1x4xf32> to vector<1x4xf32>
    %47 = vector.shape_cast %46 : vector<1x4xf32> to vector<1x1x1x4xf32>
    %48 = vector.broadcast %47 : vector<1x1x1x4xf32> to vector<1x13x16x4xf32>
    %49 = arith.mulf %36, %48 : vector<1x13x16x4xf32>
    %cst_12 = arith.constant dense<0.000000e+00> : vector<1x13x16xf32>
    %50 = vector.multi_reduction <add>, %49, %cst_12 [3] : vector<1x13x16x4xf32> to vector<1x13x16xf32>
    %51 = vector.extract_strided_slice %50 {offsets = [0, 0, 1], sizes = [1, 13, 13], strides = [1, 1, 1]} : vector<1x13x16xf32> to vector<1x13x13xf32>
    %52 = arith.addf %44, %51 : vector<1x13x13xf32>
    %53 = vector.extract_strided_slice %0 {offsets = [0, 1, 2, 0], sizes = [1, 1, 1, 4], strides = [1, 1, 1, 1]} : vector<1x4x4x4xf32> to vector<1x1x1x4xf32>
    %54 = vector.shape_cast %53 : vector<1x1x1x4xf32> to vector<1x4xf32>
    %55 = vector.shape_cast %54 : vector<1x4xf32> to vector<1x1x1x4xf32>
    %56 = vector.broadcast %55 : vector<1x1x1x4xf32> to vector<1x13x16x4xf32>
    %57 = arith.mulf %36, %56 : vector<1x13x16x4xf32>
    %cst_13 = arith.constant dense<0.000000e+00> : vector<1x13x16xf32>
    %58 = vector.multi_reduction <add>, %57, %cst_13 [3] : vector<1x13x16x4xf32> to vector<1x13x16xf32>
    %59 = vector.extract_strided_slice %58 {offsets = [0, 0, 2], sizes = [1, 13, 13], strides = [1, 1, 1]} : vector<1x13x16xf32> to vector<1x13x13xf32>
    %60 = arith.addf %52, %59 : vector<1x13x13xf32>
    %61 = vector.extract_strided_slice %0 {offsets = [0, 1, 3, 0], sizes = [1, 1, 1, 4], strides = [1, 1, 1, 1]} : vector<1x4x4x4xf32> to vector<1x1x1x4xf32>
    %62 = vector.shape_cast %61 : vector<1x1x1x4xf32> to vector<1x4xf32>
    %63 = vector.shape_cast %62 : vector<1x4xf32> to vector<1x1x1x4xf32>
    %64 = vector.broadcast %63 : vector<1x1x1x4xf32> to vector<1x13x16x4xf32>
    %65 = arith.mulf %36, %64 : vector<1x13x16x4xf32>
    %cst_14 = arith.constant dense<0.000000e+00> : vector<1x13x16xf32>
    %66 = vector.multi_reduction <add>, %65, %cst_14 [3] : vector<1x13x16x4xf32> to vector<1x13x16xf32>
    %67 = vector.extract_strided_slice %66 {offsets = [0, 0, 3], sizes = [1, 13, 13], strides = [1, 1, 1]} : vector<1x13x16xf32> to vector<1x13x13xf32>
    %68 = arith.addf %60, %67 : vector<1x13x13xf32>
    %69 = vector.extract_strided_slice %1 {offsets = [0, 2, 0, 0], sizes = [1, 13, 16, 4], strides = [1, 1, 1, 1]} : vector<1x16x16x4xf32> to vector<1x13x16x4xf32>
    %70 = vector.extract_strided_slice %0 {offsets = [0, 2, 0, 0], sizes = [1, 1, 1, 4], strides = [1, 1, 1, 1]} : vector<1x4x4x4xf32> to vector<1x1x1x4xf32>
    %71 = vector.shape_cast %70 : vector<1x1x1x4xf32> to vector<1x4xf32>
    %72 = vector.shape_cast %71 : vector<1x4xf32> to vector<1x1x1x4xf32>
    %73 = vector.broadcast %72 : vector<1x1x1x4xf32> to vector<1x13x16x4xf32>
    %74 = arith.mulf %69, %73 : vector<1x13x16x4xf32>
    %cst_15 = arith.constant dense<0.000000e+00> : vector<1x13x16xf32>
    %75 = vector.multi_reduction <add>, %74, %cst_15 [3] : vector<1x13x16x4xf32> to vector<1x13x16xf32>
    %76 = vector.extract_strided_slice %75 {offsets = [0, 0, 0], sizes = [1, 13, 13], strides = [1, 1, 1]} : vector<1x13x16xf32> to vector<1x13x13xf32>
    %77 = arith.addf %68, %76 : vector<1x13x13xf32>
    %78 = vector.extract_strided_slice %0 {offsets = [0, 2, 1, 0], sizes = [1, 1, 1, 4], strides = [1, 1, 1, 1]} : vector<1x4x4x4xf32> to vector<1x1x1x4xf32>
    %79 = vector.shape_cast %78 : vector<1x1x1x4xf32> to vector<1x4xf32>
    %80 = vector.shape_cast %79 : vector<1x4xf32> to vector<1x1x1x4xf32>
    %81 = vector.broadcast %80 : vector<1x1x1x4xf32> to vector<1x13x16x4xf32>
    %82 = arith.mulf %69, %81 : vector<1x13x16x4xf32>
    %cst_16 = arith.constant dense<0.000000e+00> : vector<1x13x16xf32>
    %83 = vector.multi_reduction <add>, %82, %cst_16 [3] : vector<1x13x16x4xf32> to vector<1x13x16xf32>
    %84 = vector.extract_strided_slice %83 {offsets = [0, 0, 1], sizes = [1, 13, 13], strides = [1, 1, 1]} : vector<1x13x16xf32> to vector<1x13x13xf32>
    %85 = arith.addf %77, %84 : vector<1x13x13xf32>
    %86 = vector.extract_strided_slice %0 {offsets = [0, 2, 2, 0], sizes = [1, 1, 1, 4], strides = [1, 1, 1, 1]} : vector<1x4x4x4xf32> to vector<1x1x1x4xf32>
    %87 = vector.shape_cast %86 : vector<1x1x1x4xf32> to vector<1x4xf32>
    %88 = vector.shape_cast %87 : vector<1x4xf32> to vector<1x1x1x4xf32>
    %89 = vector.broadcast %88 : vector<1x1x1x4xf32> to vector<1x13x16x4xf32>
    %90 = arith.mulf %69, %89 : vector<1x13x16x4xf32>
    %cst_17 = arith.constant dense<0.000000e+00> : vector<1x13x16xf32>
    %91 = vector.multi_reduction <add>, %90, %cst_17 [3] : vector<1x13x16x4xf32> to vector<1x13x16xf32>
    %92 = vector.extract_strided_slice %91 {offsets = [0, 0, 2], sizes = [1, 13, 13], strides = [1, 1, 1]} : vector<1x13x16xf32> to vector<1x13x13xf32>
    %93 = arith.addf %85, %92 : vector<1x13x13xf32>
    %94 = vector.extract_strided_slice %0 {offsets = [0, 2, 3, 0], sizes = [1, 1, 1, 4], strides = [1, 1, 1, 1]} : vector<1x4x4x4xf32> to vector<1x1x1x4xf32>
    %95 = vector.shape_cast %94 : vector<1x1x1x4xf32> to vector<1x4xf32>
    %96 = vector.shape_cast %95 : vector<1x4xf32> to vector<1x1x1x4xf32>
    %97 = vector.broadcast %96 : vector<1x1x1x4xf32> to vector<1x13x16x4xf32>
    %98 = arith.mulf %69, %97 : vector<1x13x16x4xf32>
    %cst_18 = arith.constant dense<0.000000e+00> : vector<1x13x16xf32>
    %99 = vector.multi_reduction <add>, %98, %cst_18 [3] : vector<1x13x16x4xf32> to vector<1x13x16xf32>
    %100 = vector.extract_strided_slice %99 {offsets = [0, 0, 3], sizes = [1, 13, 13], strides = [1, 1, 1]} : vector<1x13x16xf32> to vector<1x13x13xf32>
    %101 = arith.addf %93, %100 : vector<1x13x13xf32>
    %102 = vector.extract_strided_slice %1 {offsets = [0, 3, 0, 0], sizes = [1, 13, 16, 4], strides = [1, 1, 1, 1]} : vector<1x16x16x4xf32> to vector<1x13x16x4xf32>
    %103 = vector.extract_strided_slice %0 {offsets = [0, 3, 0, 0], sizes = [1, 1, 1, 4], strides = [1, 1, 1, 1]} : vector<1x4x4x4xf32> to vector<1x1x1x4xf32>
    %104 = vector.shape_cast %103 : vector<1x1x1x4xf32> to vector<1x4xf32>
    %105 = vector.shape_cast %104 : vector<1x4xf32> to vector<1x1x1x4xf32>
    %106 = vector.broadcast %105 : vector<1x1x1x4xf32> to vector<1x13x16x4xf32>
    %107 = arith.mulf %102, %106 : vector<1x13x16x4xf32>
    %cst_19 = arith.constant dense<0.000000e+00> : vector<1x13x16xf32>
    %108 = vector.multi_reduction <add>, %107, %cst_19 [3] : vector<1x13x16x4xf32> to vector<1x13x16xf32>
    %109 = vector.extract_strided_slice %108 {offsets = [0, 0, 0], sizes = [1, 13, 13], strides = [1, 1, 1]} : vector<1x13x16xf32> to vector<1x13x13xf32>
    %110 = arith.addf %101, %109 : vector<1x13x13xf32>
    %111 = vector.extract_strided_slice %0 {offsets = [0, 3, 1, 0], sizes = [1, 1, 1, 4], strides = [1, 1, 1, 1]} : vector<1x4x4x4xf32> to vector<1x1x1x4xf32>
    %112 = vector.shape_cast %111 : vector<1x1x1x4xf32> to vector<1x4xf32>
    %113 = vector.shape_cast %112 : vector<1x4xf32> to vector<1x1x1x4xf32>
    %114 = vector.broadcast %113 : vector<1x1x1x4xf32> to vector<1x13x16x4xf32>
    %115 = arith.mulf %102, %114 : vector<1x13x16x4xf32>
    %cst_20 = arith.constant dense<0.000000e+00> : vector<1x13x16xf32>
    %116 = vector.multi_reduction <add>, %115, %cst_20 [3] : vector<1x13x16x4xf32> to vector<1x13x16xf32>
    %117 = vector.extract_strided_slice %116 {offsets = [0, 0, 1], sizes = [1, 13, 13], strides = [1, 1, 1]} : vector<1x13x16xf32> to vector<1x13x13xf32>
    %118 = arith.addf %110, %117 : vector<1x13x13xf32>
    %119 = vector.extract_strided_slice %0 {offsets = [0, 3, 2, 0], sizes = [1, 1, 1, 4], strides = [1, 1, 1, 1]} : vector<1x4x4x4xf32> to vector<1x1x1x4xf32>
    %120 = vector.shape_cast %119 : vector<1x1x1x4xf32> to vector<1x4xf32>
    %121 = vector.shape_cast %120 : vector<1x4xf32> to vector<1x1x1x4xf32>
    %122 = vector.broadcast %121 : vector<1x1x1x4xf32> to vector<1x13x16x4xf32>
    %123 = arith.mulf %102, %122 : vector<1x13x16x4xf32>
    %cst_21 = arith.constant dense<0.000000e+00> : vector<1x13x16xf32>
    %124 = vector.multi_reduction <add>, %123, %cst_21 [3] : vector<1x13x16x4xf32> to vector<1x13x16xf32>
    %125 = vector.extract_strided_slice %124 {offsets = [0, 0, 2], sizes = [1, 13, 13], strides = [1, 1, 1]} : vector<1x13x16xf32> to vector<1x13x13xf32>
    %126 = arith.addf %118, %125 : vector<1x13x13xf32>
    %127 = vector.extract_strided_slice %0 {offsets = [0, 3, 3, 0], sizes = [1, 1, 1, 4], strides = [1, 1, 1, 1]} : vector<1x4x4x4xf32> to vector<1x1x1x4xf32>
    %128 = vector.shape_cast %127 : vector<1x1x1x4xf32> to vector<1x4xf32>
    %129 = vector.shape_cast %128 : vector<1x4xf32> to vector<1x1x1x4xf32>
    %130 = vector.broadcast %129 : vector<1x1x1x4xf32> to vector<1x13x16x4xf32>
    %131 = arith.mulf %102, %130 : vector<1x13x16x4xf32>
    %cst_22 = arith.constant dense<0.000000e+00> : vector<1x13x16xf32>
    %132 = vector.multi_reduction <add>, %131, %cst_22 [3] : vector<1x13x16x4xf32> to vector<1x13x16xf32>
    %133 = vector.extract_strided_slice %132 {offsets = [0, 0, 3], sizes = [1, 13, 13], strides = [1, 1, 1]} : vector<1x13x16xf32> to vector<1x13x13xf32>
    %134 = arith.addf %126, %133 : vector<1x13x13xf32>
    %cst_23 = arith.constant 1.000000e-03 : f32
    %135 = vector.broadcast %cst_23 : f32 to vector<1x13x13xf32>
    %136 = arith.mulf %134, %135 : vector<1x13x13xf32>
    %c0_24 = arith.constant 0 : index
    %c0_25 = arith.constant 0 : index
    %c0_26 = arith.constant 0 : index
    %137 = vector.load %arg3[%c0_24, %c0_25, %c0_26] : memref<1x13x13xf32, #tpu.memory_space<vmem>>, vector<1x13x13xf32>
    tpu.vector_store %arg3[%c0_24, %c0_25, %c0_26], %136 {strides = array<i32>} : memref<1x13x13xf32, #tpu.memory_space<vmem>>, vector<1x13x13xf32>,
    return
  }
  func.func @transform_0(%arg0: i32) -> (i32, i32, i32, i32) {
    %c0_i32 = arith.constant 0 : i32
    %c0_i32_0 = arith.constant 0 : i32
    %c0_i32_1 = arith.constant 0 : i32
    %c0_i32_2 = arith.constant 0 : i32
    return %arg0, %c0_i32, %c0_i32_0, %c0_i32_1 : i32, i32, i32, i32
  }
  func.func @transform_1(%arg0: i32) -> (i32, i32, i32, i32) {
    %c0_i32 = arith.constant 0 : i32
    %c0_i32_0 = arith.constant 0 : i32
    %c0_i32_1 = arith.constant 0 : i32
    %c0_i32_2 = arith.constant 0 : i32
    return %arg0, %c0_i32, %c0_i32_0, %c0_i32_1 : i32, i32, i32, i32
  }
  func.func @transform_2(%arg0: i32) -> (i32, i32, i32) {
    %c0_i32 = arith.constant 0 : i32
    %c0_i32_0 = arith.constant 0 : i32
    %c0_i32_1 = arith.constant 0 : i32
    return %arg0, %c0_i32, %c0_i32_0 : i32, i32, i32
  }
}

</mosaic_0001>

<bundles_post_ra>
// kernel: tpu_custom_call.1
= control target key start
LH: loop header
LB: loop body
LE: loop exit
PB: predicated region body
PF: predicated region fallthrough
CT: control target
= control target key end

     0   :  { %s3905_s9 = smov 0   ;;  %s6987_s0 = inlined_call_operand.vmem [shape: f32[4,4,4,4], index: 0, kind: input, shape index: {}]   ;;  %s6988_s1 = inlined_call_operand.vmem [shape: f32[4,16,16,4], index: 1, kind: input, shape index: {}]   ;;  %s6989_s2 = inlined_call_operand.vmem [shape: f32[4,13,13], index: 2, kind: output, shape index: {}]  }
   0x1 LB: > { %s3782_s10 = sadd.s32 4294967295, %s3887_s9   ;;  %p3786_p0 = scmp.ge.s32.totalorder %s3887_s9, 1  ;;  %s3887_s9 = sphi %s3905_s9, %s12_s9  }
   0x2   : > { %p122_p1 = scmp.lt.s32.totalorder %s3887_s9, 5 }
   0x4   : > { %p123_p2 = pnand %p3786_p0, %p122_p1 }
   0x6   : > { %126 = sbr.rel (%p123_p2) target bundleno = 1138 (0x472), region = 28 }
   0xb   : > { %p149_p3 = scmp.lt.s32.totalorder %s3782_s10, 3  ;;  %v6990_v0 = vlaneseq  ;;  %vm230_vm0 = vcmask 31744   ;;  %vm469_vm1 = vcmask 1046528   ;;  %vm695_vm2 = vcmask 1045504  }
   0xc   : > { %vm921_vm3 = vcmask 1044480   ;;  %vm3581_vm4 = vcmask 130112   ;;  %vm3691_vm5 = vcmask 1041409   ;;  %vm3693_vm6 = vcmask 1042434  }
   0xd   : > { %s7158_s10 = smov (!%p149_p3, %s3782_s10), 3  ;;  %v3916_v1 = vshrl.u32 %v6990_v0, 7  ;;  %vm3695_vm7 = vcmask 1043459   ;;  %vm3697_vm8 = vcmask 1044484   ;;  %vm3699_vm9 = vcmask 1045509  }
   0xe   : > { %s3795_s11 = sshll.u32 %s7158_s10, 4  ;;  %s3796_s12 = sshll.u32 %s7158_s10, 8  ;;  %vm3701_vm10 = vcmask 1046534   ;;  %vm3703_vm11 = vcmask 1047559   ;;  %vm3711_vm12 = vcmask 105472   ;;  %vm3713_vm13 = vcmask 102400  }
   0xf   : > { %7046 = vst [vmem:[#allocation2_spill] sm:$0xff] %v3916_v1  ;;  %v202_v2 = vsub.s32 0, %v3916_v1  ;;  %s153_s15 = scalar_lea.vmem %s6987_s0, %s3795_s11  ;;  %s3929_s18 = scalar_lea.vmem %s6988_s1, %s3796_s12  ;;  %v3932_v3 = vsub.s32 1, %v3916_v1  ;;  %v3935_v4 = vsub.s32 2, %v3916_v1  ;;  %v3938_v5 = vsub.s32 3, %v3916_v1 }
  0x10   : > { %v3940_v6 = vld [vmem:[%s153_s15] sm:$0xf]  ;;  %v165_v7 = vld [vmem:[%s153_s15 + $0x4] sm:$0xf]  ;;  %v166_v8 = vld [vmem:[%s153_s15 + $0x8] sm:$0xf]  ;;  %s163_s21 = scalar_lea.vmem %s6989_s2, %s3795_s11 }
  0x11   : > { %v167_v9 = vld [vmem:[%s153_s15 + $0xc] sm:$0xf]  ;;  %v3943_v10 = vld [vmem:[%s3929_s18 + $0x10] sm:$0xff]  ;;  %v3946_v11 = vrot.slane %v3940_v6, %v202_v2  ;;  %v3948_v12 = vrot.slane %v165_v7, %v202_v2  ;;  %v3951_v13 = vrot.slane %v165_v7, %v3932_v3  ;;  %v3954_v14 = vrot.slane %v165_v7, %v3935_v4  ;;  %v3960_v16 = vld [vmem:[%s3929_s18] sm:$0xff] }
  0x12   : > { %v3957_v15 = vrot.slane %v165_v7, %v3938_v5  ;;  %v3963_v17 = vld [vmem:[%s3929_s18 + $0x18] sm:$0xff]  ;;  %v3967_v19 = vrot.slane %v166_v8, %v202_v2  ;;  %v3970_v20 = vrot.slane %v166_v8, %v3932_v3  ;;  %v3973_v21 = vrot.slane %v166_v8, %v3935_v4  ;;  %v3976_v22 = vld [vmem:[%s3929_s18 + $0x8] sm:$0xff]  ;;  %v4003_v33 = vld [vmem:[%s3929_s18 + $0x20] sm:$0xff] }
  0x13   : > { %7047 = vst [vmem:[#allocation3_spill] sm:$0xff] %v3951_v13  ;;  %7048 = vst [vmem:[#allocation4_spill] sm:$0xff] %v3954_v14  ;;  %v206_v18 = vmul.f32 %v3946_v11, %v3943_v10  ;;  %v3979_v23 = vrot.slane %v166_v8, %v3938_v5  ;;  %v3981_v24 = vrot.slane %v167_v9, %v202_v2  ;;  %v3990_v27 = vld [vmem:[%s3929_s18 + $0x28] sm:$0xff]  ;;  %v4010_v37 = vld [vmem:[%s3929_s18 + $0x38] sm:$0xff] }
  0x14   : > { %7049 = vst [vmem:[#allocation5_spill] sm:$0xff] %v3957_v15  ;;  %7050 = vst [vmem:[#allocation6_spill] sm:$0xff] %v3967_v19  ;;  %v3984_v25 = vrot.slane %v167_v9, %v3932_v3  ;;  %v3987_v26 = vrot.slane %v167_v9, %v3935_v4  ;;  %v3994_v29 = vrot.slane %v167_v9, %v3938_v5  ;;  %v4016_v40 = vld [vmem:[%s3929_s18 + $0x30] sm:$0xff]  ;;  %v4022_v43 = vld [vmem:[%s3929_s18 + $0x48] sm:$0xff] }
  0x15   : > { %7051 = vst [vmem:[#allocation7_spill] sm:$0xff] %v3970_v20  ;;  %7052 = vst [vmem:[#allocation8_spill] sm:$0xff] %v3973_v21  ;;  %v237_v28 = vsel %vm230_vm0, %v206_v18, 0.0  ;;  %v204_v30 = vmul.f32 %v3946_v11, %v3960_v16  ;;  %v207_v31 = vmul.f32 %v3946_v11, %v3963_v17  ;;  %v205_v32 = vmul.f32 %v3946_v11, %v3976_v22  ;;  %v4028_v46 = vld [vmem:[%s3929_s18 + $0x40] sm:$0xff]  ;;  %v4034_v49 = vld [vmem:[%s3929_s18 + $0x58] sm:$0xff] }
  0x16   : > { %7053 = vst [vmem:[#allocation9_spill] sm:$0xff] %v3979_v23  ;;  %7054 = vst [vmem:[#allocation10_spill] sm:$0xff] %v3981_v24  ;;  %238 = vadd.xlane.f32.xlu1 %v237_v28  ;;  %v209_v36 = vmul.f32 %v3946_v11, %v3990_v27  ;;  %v208_v39 = vmul.f32 %v3946_v11, %v4003_v33  ;;  %v211_v42 = vmul.f32 %v3946_v11, %v4010_v37  ;;  %v4040_v52 = vld [vmem:[%s3929_s18 + $0x50] sm:$0xff]  ;;  %v4046_v55 = vld [vmem:[%s3929_s18 + $0x68] sm:$0xff] }
  0x17   : > { %7055 = vst [vmem:[#allocation11_spill] sm:$0xff] %v3984_v25  ;;  %7056 = vst [vmem:[#allocation12_spill] sm:$0xff] %v3987_v26  ;;  %v231_v34 = vsel %vm230_vm0, %v204_v30, 0.0  ;;  %v240_v35 = vsel %vm230_vm0, %v207_v31, 0.0  ;;  %v234_v38 = vsel %vm230_vm0, %v205_v32, 0.0  ;;  %v210_v45 = vmul.f32 %v3946_v11, %v4016_v40  ;;  %v4052_v58 = vld [vmem:[%s3929_s18 + $0x60] sm:$0xff] }
  0x18   : > { %7057 = vst [vmem:[#allocation13_spill] sm:$0xff] %v3994_v29  ;;  %232 = vadd.xlane.f32.xlu0 %v231_v34  ;;  %v246_v41 = vsel %vm230_vm0, %v209_v36, 0.0  ;;  %v243_v44 = vsel %vm230_vm0, %v208_v39, 0.0  ;;  %v252_v47 = vsel %vm230_vm0, %v211_v42, 0.0  ;;  %v213_v48 = vmul.f32 %v3946_v11, %v4022_v43  ;;  %v4058_v61 = vld [vmem:[%s3929_s18 + $0x78] sm:$0xff]  ;;  %v4068_v7 = vld [vmem:[%s3929_s18 + $0x70] sm:$0xff] }
  0x19   : > { %v249_v50 = vsel %vm230_vm0, %v210_v45, 0.0  ;;  %v212_v51 = vmul.f32 %v3946_v11, %v4028_v46  ;;  %v215_v54 = vmul.f32 %v3946_v11, %v4034_v49  ;;  %v214_v57 = vmul.f32 %v3946_v11, %v4040_v52  ;;  %v4074_v18 = vld [vmem:[%s3929_s18 + $0x88] sm:$0xff]  ;;  %v4094_v36 = vld [vmem:[%s3929_s18 + $0x98] sm:$0xff] }
  0x1a   : > { %241 = vadd.xlane.f32.xlu1 %v240_v35  ;;  %v258_v53 = vsel %vm230_vm0, %v213_v48, 0.0  ;;  %v217_v60 = vmul.f32 %v3946_v11, %v4046_v55  ;;  %v216_v63 = vmul.f32 %v3946_v11, %v4052_v58  ;;  %v4065_v2 = vrot.slane %v3940_v6, %v3935_v4  ;;  %v4080_v4 = vld [vmem:[%s3929_s18 + $0x80] sm:$0xff]  ;;  %v4106_v45 = vld [vmem:[%s3929_s18 + $0xa8] sm:$0xff] }
  0x1b   : > { %v255_v56 = vsel %vm230_vm0, %v212_v51, 0.0  ;;  %v264_v59 = vsel %vm230_vm0, %v215_v54, 0.0  ;;  %v261_v62 = vsel %vm230_vm0, %v214_v57, 0.0  ;;  %v219_v9 = vmul.f32 %v3946_v11, %v4058_v61  ;;  %v4116_v51 = vld [vmem:[%s3929_s18 + $0xa0] sm:$0xff] }
  0x1c   : > { %235 = vadd.xlane.f32.xlu0 %v234_v38  ;;  %v270_v8 = vsel %vm230_vm0, %v217_v60, 0.0  ;;  %v267_v28 = vsel %vm230_vm0, %v216_v63, 0.0  ;;  %v218_v30 = vmul.f32 %v3946_v11, %v4068_v7  ;;  %v4084_v31 = vmul.f32 %v4065_v2, %v3976_v22  ;;  %7058 = vst [vmem:[#allocation14_spill] sm:$0xff] %v4116_v51 }
  0x1d   : > { %v4088_v32 = vmul.f32 %v4065_v2, %v3960_v16  ;;  %v276_v34 = vsel %vm230_vm0, %v219_v9, 0.0  ;;  %v221_v35 = vmul.f32 %v3946_v11, %v4074_v18  ;;  %v220_v39 = vmul.f32 %v3946_v11, %v4080_v4  ;;  %v4142_v9 = vld [vmem:[%s3929_s18 + $0xc8] sm:$0xff] }
  0x1e   : > { %247 = vadd.xlane.f32.xlu1 %v246_v41  ;;  %v273_v38 = vsel %vm230_vm0, %v218_v30, 0.0  ;;  %v4100_v41 = vld [vmem:[%s3929_s18 + $0x90] sm:$0xff]  ;;  %v225_v54 = vmul.f32 %v3946_v11, %v4106_v45 }
  0x1f   : > { %v282_v42 = vsel %vm230_vm0, %v221_v35, 0.0  ;;  %v222_v48 = vmul.f32 %v3946_v11, %v4100_v41  ;;  %v4152_v35 = vrot.slane %v3940_v6, %v3932_v3 }
  0x20   : > { %244 = vadd.xlane.f32.xlu0 %v243_v44  ;;  %v223_v44 = vmul.f32 %v3946_v11, %v4094_v36 }
  0x21   : > { %v285_v57 = vsel %vm230_vm0, %v222_v48, 0.0  ;;  %v340_v48 = vmul.f32 %v4152_v35, %v3976_v22 }
  0x22   : > { %253 = vadd.xlane.f32.xlu1 %v252_v47  ;;  %v279_v47 = vsel %vm230_vm0, %v220_v39, 0.0  ;;  %v229_v39 = vmul.f32 %v3946_v11, %v4142_v9 }
  0x24   : > { %250 = vadd.xlane.f32.xlu0 %v249_v50  ;;  %v4113_v50 = vrot.slane %v3940_v6, %v3938_v5  ;;  %v4128_v5 = vld [vmem:[%s3929_s18 + $0xb0] sm:$0xff]  ;;  %v339_v6 = vmul.f32 %v4152_v35, %v3960_v16 }
  0x25   : > { %v226_v30 = vmul.f32 %v3946_v11, %v4128_v5 }
  0x26   : > { %259 = vadd.xlane.f32.xlu1 %v258_v53  ;;  %v288_v53 = vsel %vm230_vm0, %v223_v44, 0.0  ;;  %v4132_v60 = vmul.f32 %v4113_v50, %v3976_v22  ;;  %v802_v0 = vmul.f32 %v4113_v50, %v4034_v49  ;;  %v801_v1 = vmul.f32 %v4113_v50, %v4040_v52 }
  0x27   : > { %v804_v29 = vmul.f32 %v4113_v50, %v4046_v55  ;;  %v803_v26 = vmul.f32 %v4113_v50, %v4052_v58  ;;  %v806_v25 = vmul.f32 %v4113_v50, %v4058_v61  ;;  %v805_v24 = vmul.f32 %v4113_v50, %v4068_v7 }
  0x28   : > { %256 = vadd.xlane.f32.xlu0 %v255_v56  ;;  %v4122_v56 = vld [vmem:[%s3929_s18 + $0xb8] sm:$0xff]  ;;  %v808_v23 = vmul.f32 %v4113_v50, %v4074_v18  ;;  %v807_v21 = vmul.f32 %v4113_v50, %v4080_v4  ;;  %v810_v20 = vmul.f32 %v4113_v50, %v4094_v36  ;;  %v809_v19 = vmul.f32 %v4113_v50, %v4100_v41 }
  0x29   : > { %v227_v63 = vmul.f32 %v3946_v11, %v4122_v56  ;;  %v811_v13 = vmul.f32 %v4113_v50, %v4116_v51 }
  0x2a   : > { %265 = vadd.xlane.f32.xlu1 %v264_v59  ;;  %v224_v59 = vmul.f32 %v3946_v11, %v4116_v51  ;;  %v874_v15 = vsel %vm230_vm0, %v810_v20, 0.0 }
  0x2c   : > { %262 = vadd.xlane.f32.xlu0 %v261_v62  ;;  %v294_v62 = vsel %vm230_vm0, %v225_v54, 0.0  ;;  %v342_v54 = vmul.f32 %v4152_v35, %v3963_v17 }
  0x2e   : > { %271 = vadd.xlane.f32.xlu1 %v270_v8  ;;  %v4139_v8 = vmul.f32 %v4113_v50, %v3960_v16  ;;  %v374_v22 = vsel %vm230_vm0, %v342_v54, 0.0 }
  0x30   : > { %268 = vadd.xlane.f32.xlu0 %v267_v28  ;;  %v291_v28 = vsel %vm230_vm0, %v224_v59, 0.0  ;;  %v344_v59 = vmul.f32 %v4152_v35, %v3990_v27 }
  0x32   : > { %277 = vadd.xlane.f32.xlu1 %v276_v34  ;;  %v4148_v34 = vld [vmem:[%s3929_s18 + $0xc0] sm:$0xff] }
  0x33   : > { %v228_v44 = vmul.f32 %v3946_v11, %v4148_v34  ;;  %v365_v11 = vsel %vm230_vm0, %v339_v6, 0.0 }
  0x34   : > { %274 = vadd.xlane.f32.xlu0 %v273_v38  ;;  %v300_v38 = vsel %vm230_vm0, %v227_v63, 0.0  ;;  %v380_v63 = vsel %vm230_vm0, %v344_v59, 0.0 }
  0x35   : > { %v303_v3 = vsel %vm230_vm0, %v228_v44, 0.0 }
  0x36   : > { %283 = vadd.xlane.f32.xlu1 %v282_v42  ;;  %v297_v42 = vsel %vm230_vm0, %v226_v30, 0.0 }
  0x38   : > { %280 = vadd.xlane.f32.xlu0 %v279_v47  ;;  %v306_v47 = vsel %vm230_vm0, %v229_v39, 0.0 }
  0x3a   : > { %289 = vadd.xlane.f32.xlu1 %v288_v53  ;;  %v368_v53 = vsel %vm230_vm0, %v340_v48, 0.0 }
  0x3c   : > { %286 = vadd.xlane.f32.xlu0 %v285_v57  ;;  %v341_v57 = vmul.f32 %v4152_v35, %v3943_v10 }
  0x3e   : > { %295 = vadd.xlane.f32.xlu1 %v294_v62  ;;  %v371_v16 = vsel %vm230_vm0, %v341_v57, 0.0  ;;  %v343_v62 = vmul.f32 %v4152_v35, %v4003_v33 }
  0x40   : > { %292 = vadd.xlane.f32.xlu0 %v291_v28  ;;  %v346_v28 = vmul.f32 %v4152_v35, %v4010_v37  ;;  %v377_v30 = vsel %vm230_vm0, %v343_v62, 0.0 }
  0x42   : > { %301 = vadd.xlane.f32.xlu1 %v300_v38  ;;  %v345_v38 = vmul.f32 %v4152_v35, %v4016_v40  ;;  %v386_v39 = vsel %vm230_vm0, %v346_v28, 0.0 }
  0x44   : > { %298 = vadd.xlane.f32.xlu0 %v297_v42  ;;  %v348_v42 = vmul.f32 %v4152_v35, %v4022_v43  ;;  %v383_v44 = vsel %vm230_vm0, %v345_v38, 0.0 }
  0x46   : > { %307 = vadd.xlane.f32.xlu1 %v306_v47  ;;  %v347_v47 = vmul.f32 %v4152_v35, %v4028_v46  ;;  %v392_v48 = vsel %vm230_vm0, %v348_v42, 0.0 }
  0x48   : > { %304 = vadd.xlane.f32.xlu0 %v303_v3  ;;  %v350_v3 = vmul.f32 %v4152_v35, %v4034_v49  ;;  %v389_v6 = vsel %vm230_vm0, %v347_v47, 0.0 }
  0x4a   : > { %369 = vadd.xlane.f32.xlu1 %v368_v53  ;;  %v349_v53 = vmul.f32 %v4152_v35, %v4040_v52  ;;  %v398_v54 = vsel %vm230_vm0, %v350_v3, 0.0 }
  0x4c   : > { %366 = vadd.xlane.f32.xlu0 %v365_v11  ;;  %v352_v11 = vmul.f32 %v4152_v35, %v4046_v55  ;;  %v395_v57 = vsel %vm230_vm0, %v349_v53, 0.0 }
  0x4e   : > { %375 = vadd.xlane.f32.xlu1 %v374_v22  ;;  %v351_v22 = vmul.f32 %v4152_v35, %v4052_v58  ;;  %v404_v59 = vsel %vm230_vm0, %v352_v11, 0.0 }
  0x50   : > { %372 = vadd.xlane.f32.xlu0 %v371_v16  ;;  %v354_v16 = vmul.f32 %v4152_v35, %v4058_v61  ;;  %v401_v62 = vsel %vm230_vm0, %v351_v22, 0.0 }
  0x52   : > { %381 = vadd.xlane.f32.xlu1 %v380_v63  ;;  %v353_v63 = vmul.f32 %v4152_v35, %v4068_v7  ;;  %v410_v28 = vsel %vm230_vm0, %v354_v16, 0.0 }
  0x54   : > { %378 = vadd.xlane.f32.xlu0 %v377_v30  ;;  %v356_v30 = vmul.f32 %v4152_v35, %v4074_v18  ;;  %v407_v38 = vsel %vm230_vm0, %v353_v63, 0.0 }
  0x56   : > { %387 = vadd.xlane.f32.xlu1 %v386_v39  ;;  %v355_v39 = vmul.f32 %v4152_v35, %v4080_v4  ;;  %v416_v42 = vsel %vm230_vm0, %v356_v30, 0.0 }
  0x58   : > { %384 = vadd.xlane.f32.xlu0 %v383_v44  ;;  %v358_v44 = vmul.f32 %v4152_v35, %v4094_v36  ;;  %v413_v47 = vsel %vm230_vm0, %v355_v39, 0.0  ;;  %v594_v39 = vsel %vm230_vm0, %v4084_v31, 0.0  ;;  %v569_v31 = vmul.f32 %v4065_v2, %v4003_v33 }
  0x5a   : > { %393 = vadd.xlane.f32.xlu1 %v392_v48  ;;  %v357_v48 = vmul.f32 %v4152_v35, %v4100_v41  ;;  %v422_v3 = vsel %vm230_vm0, %v358_v44, 0.0  ;;  %v591_v44 = vsel %vm230_vm0, %v4088_v32, 0.0  ;;  %v572_v32 = vmul.f32 %v4065_v2, %v4010_v37 }
  0x5c   : > { %390 = vadd.xlane.f32.xlu0 %v389_v6  ;;  %v360_v6 = vmul.f32 %v4152_v35, %v4106_v45  ;;  %v419_v53 = vsel %vm230_vm0, %v357_v48, 0.0  ;;  %v570_v48 = vmul.f32 %v4065_v2, %v3990_v27 }
  0x5e   : > { %399 = vadd.xlane.f32.xlu1 %v398_v54  ;;  %v359_v54 = vmul.f32 %v4152_v35, %v4116_v51  ;;  %v428_v11 = vsel %vm230_vm0, %v360_v6, 0.0  ;;  %v606_v6 = vsel %vm230_vm0, %v570_v48, 0.0  ;;  %v579_v48 = vmul.f32 %v4065_v2, %v4068_v7 }
  0x60   : > { %396 = vadd.xlane.f32.xlu0 %v395_v57  ;;  %v362_v57 = vmul.f32 %v4152_v35, %v4122_v56  ;;  %v425_v22 = vsel %vm230_vm0, %v359_v54, 0.0  ;;  %v571_v54 = vmul.f32 %v4065_v2, %v4016_v40 }
  0x62   : > { %405 = vadd.xlane.f32.xlu1 %v404_v59  ;;  %v361_v59 = vmul.f32 %v4152_v35, %v4128_v5  ;;  %v434_v16 = vsel %vm230_vm0, %v362_v57, 0.0  ;;  %v574_v57 = vmul.f32 %v4065_v2, %v4022_v43 }
  0x64   : > { %402 = vadd.xlane.f32.xlu0 %v401_v62  ;;  %v364_v62 = vmul.f32 %v4152_v35, %v4142_v9  ;;  %v431_v63 = vsel %vm230_vm0, %v361_v59, 0.0  ;;  %v573_v59 = vmul.f32 %v4065_v2, %v4028_v46 }
  0x66   : > { %411 = vadd.xlane.f32.xlu1 %v410_v28  ;;  %v363_v28 = vmul.f32 %v4152_v35, %v4148_v34  ;;  %v440_v30 = vsel %vm230_vm0, %v364_v62, 0.0  ;;  %v567_v35 = vmul.f32 %v4065_v2, %v3943_v10  ;;  %v576_v62 = vmul.f32 %v4065_v2, %v4034_v49 }
  0x68   : > { %408 = vadd.xlane.f32.xlu0 %v407_v38  ;;  %v437_v38 = vsel %vm230_vm0, %v363_v28, 0.0  ;;  %v575_v28 = vmul.f32 %v4065_v2, %v4040_v52 }
  0x6a   : > { %417 = vadd.xlane.f32.xlu1 %v416_v42  ;;  %v568_v42 = vmul.f32 %v4065_v2, %v3963_v17 }
  0x6c   : > { %414 = vadd.xlane.f32.xlu0 %v413_v47  ;;  %v600_v47 = vsel %vm230_vm0, %v568_v42, 0.0  ;;  %v577_v42 = vmul.f32 %v4065_v2, %v4052_v58 }
  0x6e   : > { %423 = vadd.xlane.f32.xlu1 %v422_v3  ;;  %v597_v3 = vsel %vm230_vm0, %v567_v35, 0.0  ;;  %v580_v35 = vmul.f32 %v4065_v2, %v4058_v61 }
  0x70   : > { %420 = vadd.xlane.f32.xlu0 %v419_v53  ;;  %v603_v53 = vsel %vm230_vm0, %v569_v31, 0.0  ;;  %v582_v31 = vmul.f32 %v4065_v2, %v4074_v18 }
  0x72   : > { %429 = vadd.xlane.f32.xlu1 %v428_v11  ;;  %v612_v11 = vsel %vm230_vm0, %v572_v32, 0.0  ;;  %v581_v32 = vmul.f32 %v4065_v2, %v4080_v4 }
  0x74   : > { %426 = vadd.xlane.f32.xlu0 %v425_v22  ;;  %v609_v22 = vsel %vm230_vm0, %v571_v54, 0.0  ;;  %v584_v54 = vmul.f32 %v4065_v2, %v4094_v36 }
  0x76   : > { %435 = vadd.xlane.f32.xlu1 %v434_v16  ;;  %v618_v16 = vsel %vm230_vm0, %v574_v57, 0.0  ;;  %v583_v57 = vmul.f32 %v4065_v2, %v4100_v41 }
  0x78   : > { %432 = vadd.xlane.f32.xlu0 %v431_v63  ;;  %v615_v63 = vsel %vm230_vm0, %v573_v59, 0.0  ;;  %v648_v59 = vsel %vm230_vm0, %v584_v54, 0.0 }
  0x7a   : > { %441 = vadd.xlane.f32.xlu1 %v440_v30  ;;  %v624_v30 = vsel %vm230_vm0, %v576_v62, 0.0 }
  0x7c   : > { %438 = vadd.xlane.f32.xlu0 %v437_v38  ;;  %v578_v38 = vmul.f32 %v4065_v2, %v4046_v55 }
  0x7e   : > { %595 = vadd.xlane.f32.xlu1 %v594_v39  ;;  %v621_v39 = vsel %vm230_vm0, %v575_v28, 0.0  ;;  %v585_v28 = vmul.f32 %v4065_v2, %v4116_v51  ;;  %v877_v51 = vsel %vm230_vm0, %v811_v13, 0.0 }
  0x80   : > { %592 = vadd.xlane.f32.xlu0 %v591_v44  ;;  %v630_v44 = vsel %vm230_vm0, %v578_v38, 0.0 }
  0x82   : > { %601 = vadd.xlane.f32.xlu1 %v600_v47  ;;  %v627_v47 = vsel %vm230_vm0, %v577_v42, 0.0 }
  0x84   : > { %598 = vadd.xlane.f32.xlu0 %v597_v3  ;;  %v636_v3 = vsel %vm230_vm0, %v580_v35, 0.0  ;;  %v587_v35 = vmul.f32 %v4065_v2, %v4128_v5 }
  0x86   : > { %607 = vadd.xlane.f32.xlu1 %v606_v6  ;;  %v633_v6 = vsel %vm230_vm0, %v579_v48, 0.0 }
  0x88   : > { %604 = vadd.xlane.f32.xlu0 %v603_v53  ;;  %v642_v53 = vsel %vm230_vm0, %v582_v31, 0.0 }
  0x8a   : > { %613 = vadd.xlane.f32.xlu1 %v612_v11  ;;  %v639_v11 = vsel %vm230_vm0, %v581_v32, 0.0  ;;  %v589_v32 = vmul.f32 %v4065_v2, %v4148_v34 }
  0x8c   : > { %610 = vadd.xlane.f32.xlu0 %v609_v22 }
  0x8e   : > { %619 = vadd.xlane.f32.xlu1 %v618_v16  ;;  %v586_v16 = vmul.f32 %v4065_v2, %v4106_v45 }
  0x90   : > { %616 = vadd.xlane.f32.xlu0 %v615_v63  ;;  %v645_v63 = vsel %vm230_vm0, %v583_v57, 0.0  ;;  %v654_v38 = vsel %vm230_vm0, %v586_v16, 0.0  ;;  %v663_v57 = vsel %vm230_vm0, %v589_v32, 0.0  ;;  %v820_v16 = vsel %vm230_vm0, %v4132_v60, 0.0 }
  0x91   : > { %v796_v60 = vmul.f32 %v4113_v50, %v3990_v27  ;;  %v798_v32 = vmul.f32 %v4113_v50, %v4010_v37 }
  0x92   : > { %625 = vadd.xlane.f32.xlu1 %v624_v30 }
  0x94   : > { %622 = vadd.xlane.f32.xlu0 %v621_v39  ;;  %v588_v39 = vmul.f32 %v4065_v2, %v4122_v56 }
  0x96   : > { %631 = vadd.xlane.f32.xlu1 %v630_v44  ;;  %v651_v44 = vsel %vm230_vm0, %v585_v28, 0.0  ;;  %v660_v48 = vsel %vm230_vm0, %v588_v39, 0.0  ;;  %v817_v28 = vsel %vm230_vm0, %v4139_v8, 0.0 }
  0x98   : > { %628 = vadd.xlane.f32.xlu0 %v627_v47 }
  0x9a   : > { %637 = vadd.xlane.f32.xlu1 %v636_v3  ;;  %v590_v3 = vmul.f32 %v4065_v2, %v4142_v9 }
  0x9c   : > { %634 = vadd.xlane.f32.xlu0 %v633_v6  ;;  %v657_v6 = vsel %vm230_vm0, %v587_v35, 0.0  ;;  %v666_v54 = vsel %vm230_vm0, %v590_v3, 0.0  ;;  %v795_v3 = vmul.f32 %v4113_v50, %v4003_v33 }
  0x9e   : > { %643 = vadd.xlane.f32.xlu1 %v642_v53 }
  0x9f   : > { %v4296_v22 = vpop.xlane.xlu1 %238 }
  0xa0   : > { %640 = vadd.xlane.f32.xlu0 %v639_v11 }
  0xa1   : > { %v4301_v62 = vpop.xlane.xlu0 %232 }
  0xa2   : > { %649 = vadd.xlane.f32.xlu1 %v648_v59 }
  0xa3   : > { %v4306_v30 = vpop.xlane.xlu1 %241 }
  0xa4   : > { %646 = vadd.xlane.f32.xlu0 %v645_v63  ;;  %v794_v63 = vmul.f32 %v4113_v50, %v3963_v17 }
  0xa5   : > { %v4311_v42 = vpop.xlane.xlu0 %235 }
  0xa6   : > { %655 = vadd.xlane.f32.xlu1 %v654_v38  ;;  %v793_v38 = vmul.f32 %v4113_v50, %v3943_v10 }
  0xa7   : > { %v4316_v47 = vpop.xlane.xlu1 %247 }
  0xa8   : > { %652 = vadd.xlane.f32.xlu0 %v651_v44  ;;  %v826_v44 = vsel %vm230_vm0, %v794_v63, 0.0 }
  0xa9   : > { %v4321_v31 = vpop.xlane.xlu0 %244 }
  0xaa   : > { %661 = vadd.xlane.f32.xlu1 %v660_v48  ;;  %v823_v48 = vsel %vm230_vm0, %v793_v38, 0.0  ;;  %v800_v38 = vmul.f32 %v4113_v50, %v4022_v43 }
  0xab   : > { %v4326_v53 = vpop.xlane.xlu1 %253 }
  0xac   : > { %658 = vadd.xlane.f32.xlu0 %v657_v6  ;;  %v832_v6 = vsel %vm230_vm0, %v796_v60, 0.0 }
  0xad   : > { %v4329_v11 = vpop.xlane.xlu0 %250 }
  0xae   : > { %667 = vadd.xlane.f32.xlu1 %v666_v54 }
  0xaf   : > { %v4332_v59 = vpop.xlane.xlu1 %259 }
  0xb0   : > { %664 = vadd.xlane.f32.xlu0 %v663_v57  ;;  %v829_v57 = vsel %vm230_vm0, %v795_v3, 0.0 }
  0xb1   : > { %v4338_v2 = vpop.xlane.xlu0 %256 }
  0xb2   : > { %821 = vadd.xlane.f32.xlu1 %v820_v16  ;;  %v797_v16 = vmul.f32 %v4113_v50, %v4016_v40 }
  0xb3   : > { %v4344_v39 = vpop.xlane.xlu1 %265 }
  0xb4   : > { %818 = vadd.xlane.f32.xlu0 %v817_v28  ;;  %v838_v28 = vsel %vm230_vm0, %v798_v32, 0.0  ;;  %v835_v60 = vsel %vm230_vm0, %v797_v16, 0.0 }
  0xb5   : > { %v4349_v35 = vpop.xlane.xlu0 %262 }
  0xb6   : > { %827 = vadd.xlane.f32.xlu1 %v826_v44 }
  0xb7   : > { %v4354_v8 = vpop.xlane.xlu1 %271 }
  0xb8   : > { %824 = vadd.xlane.f32.xlu0 %v823_v48  ;;  %v799_v48 = vmul.f32 %v4113_v50, %v4028_v46 }
  0xb9   : > { %v4359_v54 = vpop.xlane.xlu0 %268 }
  0xba   : > { %833 = vadd.xlane.f32.xlu1 %v832_v6  ;;  %v844_v6 = vsel %vm230_vm0, %v800_v38, 0.0 }
  0xbb   : > { %v4364_v63 = vpop.xlane.xlu1 %277 }
  0xbc   : > { %830 = vadd.xlane.f32.xlu0 %v829_v57  ;;  %v841_v57 = vsel %vm230_vm0, %v799_v48, 0.0 }
  0xbd   : > { %v4369_v44 = vpop.xlane.xlu0 %274 }
  0xbe   : > { %839 = vadd.xlane.f32.xlu1 %v838_v28  ;;  %v850_v28 = vsel %vm230_vm0, %v802_v0, 0.0 }
  0xbf   : > { %v4374_v3 = vpop.xlane.xlu1 %283 }
  0xc0   : > { %836 = vadd.xlane.f32.xlu0 %v835_v60  ;;  %v847_v60 = vsel %vm230_vm0, %v801_v1, 0.0 }
  0xc1   : > { %v4379_v32 = vpop.xlane.xlu0 %280 }
  0xc2   : > { %845 = vadd.xlane.f32.xlu1 %v844_v6  ;;  %v856_v6 = vsel %vm230_vm0, %v804_v29, 0.0 }
  0xc3   : > { %v4384_v16 = vpop.xlane.xlu1 %289 }
  0xc4   : > { %842 = vadd.xlane.f32.xlu0 %v841_v57  ;;  %v853_v57 = vsel %vm230_vm0, %v803_v26, 0.0 }
  0xc5   : > { %v4389_v38 = vpop.xlane.xlu0 %286 }
  0xc6   : > { %851 = vadd.xlane.f32.xlu1 %v850_v28  ;;  %v862_v28 = vsel %vm230_vm0, %v806_v25, 0.0 }
  0xc7   : > { %v4394_v48 = vpop.xlane.xlu1 %295 }
  0xc8   : > { %848 = vadd.xlane.f32.xlu0 %v847_v60  ;;  %v859_v60 = vsel %vm230_vm0, %v805_v24, 0.0 }
  0xc9   : > { %v4399_v0 = vpop.xlane.xlu0 %292 }
  0xca   : > { %857 = vadd.xlane.f32.xlu1 %v856_v6  ;;  %v868_v6 = vsel %vm230_vm0, %v808_v23, 0.0 }
  0xcb   : > { %v4404_v1 = vpop.xlane.xlu1 %301 }
  0xcc   : > { %854 = vadd.xlane.f32.xlu0 %v853_v57  ;;  %v865_v57 = vsel %vm230_vm0, %v807_v21, 0.0 }
  0xcd   : > { %v4409_v29 = vpop.xlane.xlu0 %298 }
  0xce   : > { %7059 = vst [vmem:[#allocation15_spill] sm:$0xff] %v4409_v29  ;;  %863 = vadd.xlane.f32.xlu1 %v862_v28  ;;  %v812_v28 = vmul.f32 %v4113_v50, %v4106_v45 }
  0xcf   : > { %v4414_v26 = vpop.xlane.xlu1 %307 }
  0xd0   : > { %7060 = vst [vmem:[#allocation16_spill] sm:$0xff] %v4414_v26  ;;  %860 = vadd.xlane.f32.xlu0 %v859_v60  ;;  %v871_v60 = vsel %vm230_vm0, %v809_v19, 0.0  ;;  %v880_v20 = vsel %vm230_vm0, %v812_v28, 0.0  ;;  %v814_v26 = vmul.f32 %v4113_v50, %v4122_v56 }
  0xd1   : > { %v4419_v25 = vpop.xlane.xlu0 %304 }
  0xd2   : > { %7061 = vst [vmem:[#allocation17_spill] sm:$0xff] %v4419_v25  ;;  %869 = vadd.xlane.f32.xlu1 %v868_v6 }
  0xd3   : > { %v370_v24 = vpop.xlane.xlu1 %369 }
  0xd4   : > { %866 = vadd.xlane.f32.xlu0 %v865_v57  ;;  %v471_v23 = vrot.slane %v370_v24, 1 }
  0xd5   : > { %v367_v14 = vpop.xlane.xlu0 %366 }
  0xd6   : > { %v4431_v21 = vadd.f32 %v471_v23, %v4311_v42  ;;  %v470_v25 = vrot.slane %v367_v14, 1  ;;  %875 = vadd.xlane.f32.xlu1 %v874_v15  ;;  %v813_v14 = vmul.f32 %v4113_v50, %v4128_v5 }
  0xd7   : > { %v376_v6 = vpop.xlane.xlu1 %375 }
  0xd8   : > { %7062 = vst [vmem:[#allocation18_spill] sm:$0xff] %v4431_v21  ;;  %v472_v57 = vsel %vm469_vm1, %v470_v25, %v471_v23  ;;  %872 = vadd.xlane.f32.xlu0 %v871_v60  ;;  %v474_v24 = vrot.slane %v376_v6, 1  ;;  %v886_v21 = vsel %vm230_vm0, %v814_v26, 0.0  ;;  %v816_v25 = vmul.f32 %v4113_v50, %v4142_v9 }
  0xd9   : > { %v4438_v19 = vadd.f32 %v472_v57, %v4301_v62  ;;  %v373_v29 = vpop.xlane.xlu0 %372  ;;  %v883_v6 = vsel %vm230_vm0, %v813_v14, 0.0 }
  0xda   : > { %v4444_v15 = vadd.f32 %v474_v24, %v4306_v30  ;;  %v473_v42 = vrot.slane %v373_v29, 1  ;;  %881 = vadd.xlane.f32.xlu1 %v880_v20  ;;  %v815_v30 = vmul.f32 %v4113_v50, %v4148_v34  ;;  %v892_v57 = vsel %vm230_vm0, %v816_v25, 0.0 }
  0xdb   : > { %v382_v28 = vpop.xlane.xlu1 %381 }
  0xdc   : > { %v475_v62 = vsel %vm469_vm1, %v473_v42, %v474_v24  ;;  %878 = vadd.xlane.f32.xlu0 %v877_v51  ;;  %v477_v23 = vrot.slane %v382_v28, 1  ;;  %v1018_v51 = vmul.f32 %v3948_v12, %v3963_v17  ;;  %v889_v50 = vsel %vm230_vm0, %v815_v30, 0.0 }
  0xdd   : > { %v4451_v13 = vadd.f32 %v475_v62, %v4296_v22  ;;  %v379_v60 = vpop.xlane.xlu0 %378  ;;  %v1020_v62 = vmul.f32 %v3948_v12, %v3990_v27 }
  0xde   : > { %v4457_v29 = vadd.f32 %v477_v23, %v4316_v47  ;;  %v476_v26 = vrot.slane %v379_v60, 1  ;;  %887 = vadd.xlane.f32.xlu1 %v886_v21  ;;  %v1017_v47 = vmul.f32 %v3948_v12, %v3943_v10  ;;  %v1046_v17 = vsel %vm230_vm0, %v1018_v51, 0.0 }
  0xdf   : > { %v388_v20 = vpop.xlane.xlu1 %387  ;;  %v1052_v27 = vsel %vm230_vm0, %v1020_v62, 0.0 }
  0xe0   : > { %v478_v22 = vsel %vm469_vm1, %v476_v26, %v477_v23  ;;  %884 = vadd.xlane.f32.xlu0 %v883_v6  ;;  %v480_v24 = vrot.slane %v388_v20, 1  ;;  %v1043_v10 = vsel %vm230_vm0, %v1017_v47, 0.0 }
  0xe1   : > { %v4464_v14 = vadd.f32 %v478_v22, %v4321_v31  ;;  %v385_v42 = vpop.xlane.xlu0 %384 }
  0xe2   : > { %v4470_v21 = vadd.f32 %v480_v24, %v4326_v53  ;;  %v479_v28 = vrot.slane %v385_v42, 1  ;;  %893 = vadd.xlane.f32.xlu1 %v892_v57  ;;  %v1019_v53 = vmul.f32 %v3948_v12, %v4003_v33  ;;  %v1022_v57 = vmul.f32 %v3948_v12, %v4010_v37 }
  0xe3   : > { %v394_v25 = vpop.xlane.xlu1 %393 }
  0xe4   : > { %v481_v31 = vsel %vm469_vm1, %v479_v28, %v480_v24  ;;  %890 = vadd.xlane.f32.xlu0 %v889_v50  ;;  %v483_v23 = vrot.slane %v394_v25, 1  ;;  %v1049_v33 = vsel %vm230_vm0, %v1019_v53, 0.0  ;;  %v1058_v37 = vsel %vm230_vm0, %v1022_v57, 0.0 }
  0xe5   : > { %v4477_v60 = vadd.f32 %v481_v31, %v4329_v11  ;;  %v391_v6 = vpop.xlane.xlu0 %390  ;;  %v1024_v28 = vmul.f32 %v3948_v12, %v4022_v43 }
  0xe6   : > { %v4483_v30 = vadd.f32 %v483_v23, %v4332_v59  ;;  %v482_v26 = vrot.slane %v391_v6, 1  ;;  %1047 = vadd.xlane.f32.xlu1 %v1046_v17  ;;  %v1021_v59 = vmul.f32 %v3948_v12, %v4016_v40 }
  0xe7   : > { %v400_v20 = vpop.xlane.xlu1 %399  ;;  %v1064_v43 = vsel %vm230_vm0, %v1024_v28, 0.0  ;;  %v1030_v28 = vmul.f32 %v3948_v12, %v4058_v61 }
  0xe8   : > { %v484_v11 = vsel %vm469_vm1, %v482_v26, %v483_v23  ;;  %1044 = vadd.xlane.f32.xlu0 %v1043_v10  ;;  %v486_v51 = vrot.slane %v400_v20, 1  ;;  %v1055_v40 = vsel %vm230_vm0, %v1021_v59, 0.0  ;;  %v1026_v10 = vmul.f32 %v3948_v12, %v4034_v49 }
  0xe9   : > { %v4490_v22 = vadd.f32 %v484_v11, %v4338_v2  ;;  %v397_v24 = vpop.xlane.xlu0 %396  ;;  %v1082_v61 = vsel %vm230_vm0, %v1030_v28, 0.0  ;;  %v7065_v28 = vld [vmem:[#allocation16_spill] sm:$0xff] }
  0xea   : > { %v4496_v42 = vadd.f32 %v486_v51, %v4344_v39  ;;  %v485_v50 = vrot.slane %v397_v24, 1  ;;  %1053 = vadd.xlane.f32.xlu1 %v1052_v27  ;;  %v1023_v39 = vmul.f32 %v3948_v12, %v4028_v46  ;;  %v1070_v49 = vsel %vm230_vm0, %v1026_v10, 0.0 }
  0xeb   : > { %v406_v47 = vpop.xlane.xlu1 %405 }
  0xec   : > { %v487_v2 = vsel %vm469_vm1, %v485_v50, %v486_v51  ;;  %1050 = vadd.xlane.f32.xlu0 %v1049_v33  ;;  %v489_v25 = vrot.slane %v406_v47, 1  ;;  %v1061_v46 = vsel %vm230_vm0, %v1023_v39, 0.0  ;;  %v1028_v51 = vmul.f32 %v3948_v12, %v4046_v55 }
  0xed   : > { %v4503_v17 = vadd.f32 %v487_v2, %v4349_v35  ;;  %v403_v62 = vpop.xlane.xlu0 %402 }
  0xee   : > { %v4509_v31 = vadd.f32 %v489_v25, %v4354_v8  ;;  %v488_v23 = vrot.slane %v403_v62, 1  ;;  %1059 = vadd.xlane.f32.xlu1 %v1058_v37  ;;  %v1025_v8 = vmul.f32 %v3948_v12, %v4040_v52  ;;  %v1076_v55 = vsel %vm230_vm0, %v1028_v51, 0.0 }
  0xef   : > { %v412_v6 = vpop.xlane.xlu1 %411 }
  0xf0   : > { %v490_v35 = vsel %vm469_vm1, %v488_v23, %v489_v25  ;;  %1056 = vadd.xlane.f32.xlu0 %v1055_v40  ;;  %v492_v53 = vrot.slane %v412_v6, 1  ;;  %v1067_v52 = vsel %vm230_vm0, %v1025_v8, 0.0  ;;  %v1032_v6 = vmul.f32 %v3948_v12, %v4074_v18 }
  0xf1   : > { %v4516_v26 = vadd.f32 %v490_v35, %v4359_v54  ;;  %v409_v20 = vpop.xlane.xlu0 %408  ;;  %v1034_v8 = vmul.f32 %v3948_v12, %v4094_v36 }
  0xf2   : > { %v4522_v27 = vadd.f32 %v492_v53, %v4364_v63  ;;  %v491_v57 = vrot.slane %v409_v20, 1  ;;  %1065 = vadd.xlane.f32.xlu1 %v1064_v43  ;;  %v1027_v63 = vmul.f32 %v3948_v12, %v4052_v58  ;;  %v1088_v18 = vsel %vm230_vm0, %v1032_v6, 0.0 }
  0xf3   : > { %v418_v11 = vpop.xlane.xlu1 %417  ;;  %v1094_v36 = vsel %vm230_vm0, %v1034_v8, 0.0 }
  0xf4   : > { %v493_v54 = vsel %vm469_vm1, %v491_v57, %v492_v53  ;;  %1062 = vadd.xlane.f32.xlu0 %v1061_v46  ;;  %v495_v24 = vrot.slane %v418_v11, 1  ;;  %v1073_v58 = vsel %vm230_vm0, %v1027_v63, 0.0  ;;  %v7063_v63 = vld [vmem:[#allocation15_spill] sm:$0xff] }
  0xf5   : > { %v4529_v33 = vadd.f32 %v493_v54, %v4369_v44  ;;  %v415_v59 = vpop.xlane.xlu0 %414 }
  0xf6   : > { %v4535_v50 = vadd.f32 %v495_v24, %v4374_v3  ;;  %v494_v47 = vrot.slane %v415_v59, 1  ;;  %1071 = vadd.xlane.f32.xlu1 %v1070_v49  ;;  %v1029_v3 = vmul.f32 %v3948_v12, %v4068_v7  ;;  %v1036_v59 = vmul.f32 %v3948_v12, %v4106_v45 }
  0xf7   : > { %v424_v37 = vpop.xlane.xlu1 %423 }
  0xf8   : > { %v496_v44 = vsel %vm469_vm1, %v494_v47, %v495_v24  ;;  %1068 = vadd.xlane.f32.xlu0 %v1067_v52  ;;  %v498_v2 = vrot.slane %v424_v37, 1  ;;  %v1079_v7 = vsel %vm230_vm0, %v1029_v3, 0.0  ;;  %v1100_v45 = vsel %vm230_vm0, %v1036_v59, 0.0 }
  0xf9   : > { %v4542_v25 = vadd.f32 %v496_v44, %v4379_v32  ;;  %v421_v62 = vpop.xlane.xlu0 %420 }
  0xfa   : > { %v4548_v40 = vadd.f32 %v498_v2, %v4384_v16  ;;  %v497_v39 = vrot.slane %v421_v62, 1  ;;  %1077 = vadd.xlane.f32.xlu1 %v1076_v55  ;;  %v1031_v16 = vmul.f32 %v3948_v12, %v4080_v4 }
  0xfb   : > { %v430_v23 = vpop.xlane.xlu1 %429 }
  0xfc   : > { %v499_v32 = vsel %vm469_vm1, %v497_v39, %v498_v2  ;;  %1074 = vadd.xlane.f32.xlu0 %v1073_v58  ;;  %v501_v43 = vrot.slane %v430_v23, 1  ;;  %v1085_v4 = vsel %vm230_vm0, %v1031_v16, 0.0  ;;  %v1038_v58 = vmul.f32 %v3948_v12, %v4122_v56  ;;  %v7066_v23 = vld [vmem:[#allocation17_spill] sm:$0xff] }
  0xfd   : > { %v4555_v10 = vadd.f32 %v499_v32, %v4389_v38  ;;  %v427_v35 = vpop.xlane.xlu0 %426 }
  0xfe   : > { %v4561_v53 = vadd.f32 %v501_v43, %v4394_v48  ;;  %v500_v20 = vrot.slane %v427_v35, 1  ;;  %1083 = vadd.xlane.f32.xlu1 %v1082_v61  ;;  %v1033_v48 = vmul.f32 %v3948_v12, %v4100_v41  ;;  %v7067_v35 = vld [vmem:[#allocation18_spill] sm:$0xff] }
  0xff   : > { %v436_v46 = vpop.xlane.xlu1 %435 }
 0x100   : > { %v502_v38 = vsel %vm469_vm1, %v500_v20, %v501_v43  ;;  %1080 = vadd.xlane.f32.xlu0 %v1079_v7  ;;  %v504_v57 = vrot.slane %v436_v46, 1  ;;  %v1091_v41 = vsel %vm230_vm0, %v1033_v48, 0.0  ;;  %v1037_v43 = vmul.f32 %v3948_v12, %v4128_v5 }
 0x101   : > { %v4568_v11 = vadd.f32 %v502_v38, %v4399_v0  ;;  %v433_v49 = vpop.xlane.xlu0 %432  ;;  %v1106_v20 = vsel %vm230_vm0, %v1038_v58, 0.0  ;;  %v1040_v46 = vmul.f32 %v3948_v12, %v4142_v9  ;;  %v4607_v38 = vld [vmem:[%s3929_s18 + $0xd8] sm:$0xff]  ;;  %v4619_v9 = vld [vmem:[%s3929_s18 + $0xd0] sm:$0xff] }
 0x102   : > { %v4574_v51 = vadd.f32 %v504_v57, %v4404_v1  ;;  %v503_v54 = vrot.slane %v433_v49, 1  ;;  %1089 = vadd.xlane.f32.xlu1 %v1088_v18  ;;  %v7064_v1 = vld [vmem:[#allocation14_spill] sm:$0xff]  ;;  %v1103_v5 = vsel %vm230_vm0, %v1037_v43, 0.0  ;;  %v1039_v49 = vmul.f32 %v3948_v12, %v4148_v34 }
 0x103   : > { %v442_v24 = vpop.xlane.xlu1 %441  ;;  %v1035_v55 = vmul.f32 %v3948_v12, %v7064_v1  ;;  %v1042_v59 = vmul.f32 %v3948_v12, %v4607_v38 }
 0x104   : > { %v505_v0 = vsel %vm469_vm1, %v503_v54, %v504_v57  ;;  %1086 = vadd.xlane.f32.xlu0 %v1085_v4  ;;  %v507_v52 = vrot.slane %v442_v24, 1 }
 0x105   : > { %v4581_v47 = vadd.f32 %v505_v0, %v7063_v63  ;;  %v439_v37 = vpop.xlane.xlu0 %438  ;;  %v1097_v32 = vsel %vm230_vm0, %v1035_v55, 0.0  ;;  %v1118_v55 = vsel %vm230_vm0, %v1042_v59, 0.0 }
 0x106   : > { %v4587_v44 = vadd.f32 %v507_v52, %v7065_v28  ;;  %v506_v2 = vrot.slane %v439_v37, 1  ;;  %1095 = vadd.xlane.f32.xlu1 %v1094_v36  ;;  %v1112_v36 = vsel %vm230_vm0, %v1040_v46, 0.0  ;;  %v4636_v28 = vld [vmem:[%s3929_s18 + $0x18] sm:$0xff] }
 0x107   : > { %v596_v62 = vpop.xlane.xlu1 %595 }
 0x108   : > { %v508_v3 = vsel %vm469_vm1, %v506_v2, %v507_v52  ;;  %1092 = vadd.xlane.f32.xlu0 %v1091_v41  ;;  %v697_v39 = vrot.slane %v596_v62, 2  ;;  %v1041_v52 = vmul.f32 %v3948_v12, %v4619_v9  ;;  %v7068_v2 = vld [vmem:[#allocation3_spill] sm:$0xff] }
 0x109   : > { %v4594_v61 = vadd.f32 %v508_v3, %v7066_v23  ;;  %v593_v6 = vpop.xlane.xlu0 %592  ;;  %v1152_v62 = vmul.f32 %v4636_v28, %v7068_v2 }
 0x10a   : > { %v4600_v7 = vadd.f32 %v697_v39, %v7067_v35  ;;  %v696_v16 = vrot.slane %v593_v6, 2  ;;  %1101 = vadd.xlane.f32.xlu1 %v1100_v45  ;;  %v1115_v58 = vsel %vm230_vm0, %v1041_v52, 0.0  ;;  %v4655_v35 = vld [vmem:[%s3929_s18 + $0x28] sm:$0xff] }
 0x10b   : > { %v602_v56 = vpop.xlane.xlu1 %601  ;;  %v1180_v43 = vsel %vm230_vm0, %v1152_v62, 0.0  ;;  %v4693_v62 = vld [vmem:[%s3929_s18 + $0x48] sm:$0xff] }
 0x10c   : > { %v698_v18 = vsel %vm695_vm2, %v696_v16, %v697_v39  ;;  %1098 = vadd.xlane.f32.xlu0 %v1097_v32  ;;  %v700_v8 = vrot.slane %v602_v56, 2  ;;  %v1154_v16 = vmul.f32 %v4655_v35, %v7068_v2 }
 0x10d   : > { %v599_v57 = vpop.xlane.xlu0 %598  ;;  %v4613_v4 = vadd.f32 %v698_v18, %v4438_v19 }
 0x10e   : > { %v4616_v48 = vadd.f32 %v700_v8, %v4444_v15  ;;  %v699_v54 = vrot.slane %v599_v57, 2  ;;  %1107 = vadd.xlane.f32.xlu1 %v1106_v20  ;;  %v1109_v15 = vsel %vm230_vm0, %v1039_v49, 0.0 }
 0x10f   : > { %v608_v24 = vpop.xlane.xlu1 %607 }
 0x110   : > { %v701_v0 = vsel %vm695_vm2, %v699_v54, %v700_v8  ;;  %1104 = vadd.xlane.f32.xlu0 %v1103_v5  ;;  %v703_v34 = vrot.slane %v608_v24, 2  ;;  %v1186_v54 = vsel %vm230_vm0, %v1154_v16, 0.0  ;;  %v4674_v24 = vld [vmem:[%s3929_s18 + $0x38] sm:$0xff] }
 0x111   : > { %v605_v19 = vpop.xlane.xlu0 %604  ;;  %v4629_v63 = vadd.f32 %v701_v0, %v4451_v13 }
 0x112   : > { %v4632_v37 = vadd.f32 %v703_v34, %v4457_v29  ;;  %v702_v41 = vrot.slane %v605_v19, 2  ;;  %1113 = vadd.xlane.f32.xlu1 %v1112_v36  ;;  %v4643_v29 = vld [vmem:[%s3929_s18 + $0x10] sm:$0xff]  ;;  %v1156_v36 = vmul.f32 %v4674_v24, %v7068_v2 }
 0x113   : > { %v614_v1 = vpop.xlane.xlu1 %613  ;;  %v1151_v3 = vmul.f32 %v4643_v29, %v7068_v2 }
 0x114   : > { %v704_v45 = vsel %vm695_vm2, %v702_v41, %v703_v34  ;;  %1110 = vadd.xlane.f32.xlu0 %v1109_v15  ;;  %v706_v12 = vrot.slane %v614_v1, 2 }
 0x115   : > { %v611_v13 = vpop.xlane.xlu0 %610  ;;  %v4648_v39 = vadd.f32 %v704_v45, %v4464_v14  ;;  %v1177_v46 = vsel %vm230_vm0, %v1151_v3, 0.0  ;;  %v1158_v45 = vmul.f32 %v4693_v62, %v7068_v2 }
 0x116   : > { %v4651_v23 = vadd.f32 %v706_v12, %v4470_v21  ;;  %v705_v6 = vrot.slane %v611_v13, 2  ;;  %1119 = vadd.xlane.f32.xlu1 %v1118_v55  ;;  %v4662_v21 = vld [vmem:[%s3929_s18 + $0x20] sm:$0xff]  ;;  %v1192_v55 = vsel %vm230_vm0, %v1156_v36, 0.0 }
 0x117   : > { %v620_v32 = vpop.xlane.xlu1 %619  ;;  %v1153_v18 = vmul.f32 %v4662_v21, %v7068_v2 }
 0x118   : > { %v707_v56 = vsel %vm695_vm2, %v705_v6, %v706_v12  ;;  %1116 = vadd.xlane.f32.xlu0 %v1115_v58  ;;  %v709_v20 = vrot.slane %v620_v32, 2 }
 0x119   : > { %v617_v14 = vpop.xlane.xlu0 %616  ;;  %v4667_v8 = vadd.f32 %v707_v56, %v4477_v60  ;;  %v1183_v34 = vsel %vm230_vm0, %v1153_v18, 0.0  ;;  %v1198_v56 = vsel %vm230_vm0, %v1158_v45, 0.0 }
 0x11a   : > { %v4670_v57 = vadd.f32 %v709_v20, %v4483_v30  ;;  %v708_v5 = vrot.slane %v617_v14, 2  ;;  %1181 = vadd.xlane.f32.xlu1 %v1180_v43  ;;  %v4681_v30 = vld [vmem:[%s3929_s18 + $0x30] sm:$0xff] }
 0x11b   : > { %v626_v49 = vpop.xlane.xlu1 %625  ;;  %v1155_v19 = vmul.f32 %v4681_v30, %v7068_v2 }
 0x11c   : > { %v710_v59 = vsel %vm695_vm2, %v708_v5, %v709_v20  ;;  %1178 = vadd.xlane.f32.xlu0 %v1177_v46  ;;  %v712_v0 = vrot.slane %v626_v49, 2  ;;  %v4712_v20 = vld [vmem:[%s3929_s18 + $0x58] sm:$0xff] }
 0x11d   : > { %v623_v60 = vpop.xlane.xlu0 %622  ;;  %v4686_v15 = vadd.f32 %v710_v59, %v4490_v22  ;;  %v1189_v58 = vsel %vm230_vm0, %v1155_v19, 0.0  ;;  %v1160_v14 = vmul.f32 %v4712_v20, %v7068_v2 }
 0x11e   : > { %v4689_v52 = vadd.f32 %v712_v0, %v4496_v42  ;;  %v711_v41 = vrot.slane %v623_v60, 2  ;;  %1187 = vadd.xlane.f32.xlu1 %v1186_v54  ;;  %v4700_v42 = vld [vmem:[%s3929_s18 + $0x40] sm:$0xff] }
 0x11f   : > { %v632_v1 = vpop.xlane.xlu1 %631  ;;  %v1157_v3 = vmul.f32 %v4700_v42, %v7068_v2  ;;  %v1204_v60 = vsel %vm230_vm0, %v1160_v14, 0.0 }
 0x120   : > { %v713_v12 = vsel %vm695_vm2, %v711_v41, %v712_v0  ;;  %1184 = vadd.xlane.f32.xlu0 %v1183_v34  ;;  %v715_v13 = vrot.slane %v632_v1, 2  ;;  %v4731_v34 = vld [vmem:[%s3929_s18 + $0x68] sm:$0xff] }
 0x121   : > { %v629_v22 = vpop.xlane.xlu0 %628  ;;  %v4705_v6 = vadd.f32 %v713_v12, %v4503_v17  ;;  %v1195_v5 = vsel %vm230_vm0, %v1157_v3, 0.0  ;;  %v1162_v19 = vmul.f32 %v4731_v34, %v7068_v2 }
 0x122   : > { %v4708_v32 = vadd.f32 %v715_v13, %v4509_v31  ;;  %v714_v43 = vrot.slane %v629_v22, 2  ;;  %1193 = vadd.xlane.f32.xlu1 %v1192_v55  ;;  %v4719_v31 = vld [vmem:[%s3929_s18 + $0x50] sm:$0xff] }
 0x123   : > { %v638_v16 = vpop.xlane.xlu1 %637  ;;  %v1159_v49 = vmul.f32 %v4719_v31, %v7068_v2  ;;  %v1210_v3 = vsel %vm230_vm0, %v1162_v19, 0.0 }
 0x124   : > { %v716_v46 = vsel %vm695_vm2, %v714_v43, %v715_v13  ;;  %1190 = vadd.xlane.f32.xlu0 %v1189_v58  ;;  %v718_v18 = vrot.slane %v638_v16, 2  ;;  %v4750_v43 = vld [vmem:[%s3929_s18 + $0x78] sm:$0xff] }
 0x125   : > { %v635_v17 = vpop.xlane.xlu0 %634  ;;  %v4724_v54 = vadd.f32 %v716_v46, %v4516_v26  ;;  %v1201_v55 = vsel %vm230_vm0, %v1159_v49, 0.0  ;;  %v1164_v16 = vmul.f32 %v4750_v43, %v7068_v2 }
 0x126   : > { %v4727_v36 = vadd.f32 %v718_v18, %v4522_v27  ;;  %v717_v59 = vrot.slane %v635_v17, 2  ;;  %1199 = vadd.xlane.f32.xlu1 %v1198_v56  ;;  %v4738_v27 = vld [vmem:[%s3929_s18 + $0x60] sm:$0xff] }
 0x127   : > { %v644_v0 = vpop.xlane.xlu1 %643  ;;  %v1161_v45 = vmul.f32 %v4738_v27, %v7068_v2 }
 0x128   : > { %v719_v41 = vsel %vm695_vm2, %v717_v59, %v718_v18  ;;  %1196 = vadd.xlane.f32.xlu0 %v1195_v5  ;;  %v721_v1 = vrot.slane %v644_v0, 2  ;;  %v1216_v0 = vsel %vm230_vm0, %v1164_v16, 0.0 }
 0x129   : > { %v641_v26 = vpop.xlane.xlu0 %640  ;;  %v4743_v12 = vadd.f32 %v719_v41, %v4529_v33  ;;  %v1207_v46 = vsel %vm230_vm0, %v1161_v45, 0.0 }
 0x12a   : > { %v4746_v13 = vadd.f32 %v721_v1, %v4535_v50  ;;  %v720_v22 = vrot.slane %v641_v26, 2  ;;  %1205 = vadd.xlane.f32.xlu1 %v1204_v60  ;;  %v4757_v50 = vld [vmem:[%s3929_s18 + $0x70] sm:$0xff]  ;;  %v4769_v60 = vld [vmem:[%s3929_s18 + $0x88] sm:$0xff] }
 0x12b   : > { %v650_v58 = vpop.xlane.xlu1 %649  ;;  %v1163_v18 = vmul.f32 %v4757_v50, %v7068_v2  ;;  %v1166_v19 = vmul.f32 %v4769_v60, %v7068_v2 }
 0x12c   : > { %v722_v56 = vsel %vm695_vm2, %v720_v22, %v721_v1  ;;  %1202 = vadd.xlane.f32.xlu0 %v1201_v55  ;;  %v724_v14 = vrot.slane %v650_v58, 2 }
 0x12d   : > { %v647_v33 = vpop.xlane.xlu0 %646  ;;  %v4762_v17 = vadd.f32 %v722_v56, %v4542_v25  ;;  %v1213_v26 = vsel %vm230_vm0, %v1163_v18, 0.0  ;;  %v1222_v16 = vsel %vm230_vm0, %v1166_v19, 0.0  ;;  %v4788_v56 = vld [vmem:[%s3929_s18 + $0x98] sm:$0xff] }
 0x12e   : > { %v4765_v5 = vadd.f32 %v724_v14, %v4548_v40  ;;  %v723_v49 = vrot.slane %v647_v33, 2  ;;  %1211 = vadd.xlane.f32.xlu1 %v1210_v3  ;;  %v4776_v40 = vld [vmem:[%s3929_s18 + $0x80] sm:$0xff] }
 0x12f   : > { %v656_v59 = vpop.xlane.xlu1 %655  ;;  %v1165_v55 = vmul.f32 %v4776_v40, %v7068_v2 }
 0x130   : > { %v725_v41 = vsel %vm695_vm2, %v723_v49, %v724_v14  ;;  %1208 = vadd.xlane.f32.xlu0 %v1207_v46  ;;  %v727_v1 = vrot.slane %v656_v59, 2  ;;  %v1168_v14 = vmul.f32 %v4788_v56, %v7068_v2 }
 0x131   : > { %v653_v25 = vpop.xlane.xlu0 %652  ;;  %v4781_v45 = vadd.f32 %v725_v41, %v4555_v10  ;;  %v1219_v18 = vsel %vm230_vm0, %v1165_v55, 0.0 }
 0x132   : > { %v4784_v22 = vadd.f32 %v727_v1, %v4561_v53  ;;  %v726_v58 = vrot.slane %v653_v25, 2  ;;  %1217 = vadd.xlane.f32.xlu1 %v1216_v0  ;;  %v4795_v53 = vld [vmem:[%s3929_s18 + $0x90] sm:$0xff]  ;;  %v4807_v25 = vld [vmem:[%s3929_s18 + $0xa8] sm:$0xff] }
 0x133   : > { %v662_v3 = vpop.xlane.xlu1 %661  ;;  %7069 = vst [vmem:[#allocation15_spill] sm:$0xff] %v4795_v53  ;;  %v1167_v49 = vmul.f32 %v4795_v53, %v7068_v2 }
 0x134   : > { %v728_v33 = vsel %vm695_vm2, %v726_v58, %v727_v1  ;;  %1214 = vadd.xlane.f32.xlu0 %v1213_v26  ;;  %v730_v46 = vrot.slane %v662_v3, 2  ;;  %v1228_v1 = vsel %vm230_vm0, %v1168_v14, 0.0  ;;  %v1170_v26 = vmul.f32 %v4807_v25, %v7068_v2 }
 0x135   : > { %v659_v10 = vpop.xlane.xlu0 %658  ;;  %v4800_v59 = vadd.f32 %v728_v33, %v4568_v11  ;;  %v1225_v3 = vsel %vm230_vm0, %v1167_v49, 0.0 }
 0x136   : > { %v4803_v0 = vadd.f32 %v730_v46, %v4574_v51  ;;  %v729_v19 = vrot.slane %v659_v10, 2  ;;  %1223 = vadd.xlane.f32.xlu1 %v1222_v16  ;;  %v4814_v51 = vld [vmem:[%s3929_s18 + $0xa0] sm:$0xff] }
 0x137   : > { %v668_v41 = vpop.xlane.xlu1 %667  ;;  %7070 = vst [vmem:[#allocation14_spill] sm:$0xff] %v4814_v51  ;;  %v1169_v16 = vmul.f32 %v4814_v51, %v7068_v2 }
 0x138   : > { %v731_v55 = vsel %vm695_vm2, %v729_v19, %v730_v46  ;;  %1220 = vadd.xlane.f32.xlu0 %v1219_v18  ;;  %v733_v58 = vrot.slane %v668_v41, 2  ;;  %v1234_v18 = vsel %vm230_vm0, %v1170_v26, 0.0  ;;  %v4826_v19 = vld [vmem:[%s3929_s18 + $0xb8] sm:$0xff] }
 0x139   : > { %v665_v11 = vpop.xlane.xlu0 %664  ;;  %v4819_v14 = vadd.f32 %v731_v55, %v4581_v47  ;;  %7072 = vst [vmem:[#allocation17_spill] sm:$0xff] %v4826_v19  ;;  %v1172_v49 = vmul.f32 %v4826_v19, %v7068_v2  ;;  %v1231_v55 = vsel %vm230_vm0, %v1169_v16, 0.0 }
 0x13a   : > { %v4822_v33 = vadd.f32 %v733_v58, %v4587_v44  ;;  %v732_v10 = vrot.slane %v665_v11, 2  ;;  %1229 = vadd.xlane.f32.xlu1 %v1228_v1  ;;  %v4833_v44 = vld [vmem:[%s3929_s18 + $0xb0] sm:$0xff] }
 0x13b   : > { %v822_v46 = vpop.xlane.xlu1 %821  ;;  %7073 = vst [vmem:[#allocation18_spill] sm:$0xff] %v4833_v44  ;;  %v1171_v1 = vmul.f32 %v4833_v44, %v7068_v2 }
 0x13c   : > { %7071 = vst [vmem:[#allocation16_spill] sm:$0xff] %v4822_v33  ;;  %v734_v41 = vsel %vm695_vm2, %v732_v10, %v733_v58  ;;  %1226 = vadd.xlane.f32.xlu0 %v1225_v3  ;;  %v923_v51 = vrot.slane %v822_v46, 3  ;;  %v1240_v3 = vsel %vm230_vm0, %v1172_v49, 0.0  ;;  %v4845_v10 = vld [vmem:[%s3929_s18 + $0xc8] sm:$0xff] }
 0x13d   : > { %v819_v47 = vpop.xlane.xlu0 %818  ;;  %v4838_v26 = vadd.f32 %v734_v41, %v4594_v61  ;;  %7074 = vst [vmem:[#allocation3_spill] sm:$0xff] %v4845_v10  ;;  %v1174_v16 = vmul.f32 %v4845_v10, %v7068_v2  ;;  %v1237_v61 = vsel %vm230_vm0, %v1171_v1, 0.0  ;;  %v4852_v41 = vld [vmem:[%s3929_s18 + $0xc0] sm:$0xff] }
 0x13e   : > { %v922_v11 = vrot.slane %v819_v47, 3  ;;  %1235 = vadd.xlane.f32.xlu1 %v1234_v18  ;;  %v4841_v19 = vadd.f32 %v923_v51, %v4600_v7  ;;  %7075 = vst [vmem:[#allocation19_spill] sm:$0xff] %v4852_v41  ;;  %v1173_v7 = vmul.f32 %v4852_v41, %v7068_v2 }
 0x13f   : > { %v828_v58 = vpop.xlane.xlu1 %827 }
 0x140   : > { %1232 = vadd.xlane.f32.xlu0 %v1231_v55  ;;  %v926_v46 = vrot.slane %v828_v58, 3  ;;  %v924_v44 = vsel %vm921_vm3, %v922_v11, %v923_v51  ;;  %v1246_v58 = vsel %vm230_vm0, %v1174_v16, 0.0  ;;  %v1176_v51 = vmul.f32 %v7068_v2, %v4607_v38 }
 0x141   : > { %v825_v33 = vpop.xlane.xlu0 %824  ;;  %v4857_v18 = vadd.f32 %v924_v44, %v4613_v4  ;;  %v1243_v41 = vsel %vm230_vm0, %v1173_v7, 0.0  ;;  %v1175_v4 = vmul.f32 %v7068_v2, %v4619_v9 }
 0x142   : > { %v925_v49 = vrot.slane %v825_v33, 3  ;;  %1241 = vadd.xlane.f32.xlu1 %v1240_v3  ;;  %v4860_v47 = vadd.f32 %v926_v46, %v4616_v48  ;;  %v1252_v16 = vsel %vm230_vm0, %v1176_v51, 0.0 }
 0x143   : > { %v834_v55 = vpop.xlane.xlu1 %833  ;;  %v1249_v2 = vsel %vm230_vm0, %v1175_v4, 0.0 }
 0x144   : > { %1238 = vadd.xlane.f32.xlu0 %v1237_v61  ;;  %v929_v1 = vrot.slane %v834_v55, 3  ;;  %v927_v11 = vsel %vm921_vm3, %v925_v49, %v926_v46  ;;  %v7076_v61 = vld [vmem:[#allocation4_spill] sm:$0xff] }
 0x145   : > { %v831_v10 = vpop.xlane.xlu0 %830  ;;  %v4870_v33 = vadd.f32 %v927_v11, %v4629_v63  ;;  %v1377_v46 = vmul.f32 %v4636_v28, %v7076_v61  ;;  %v1376_v63 = vmul.f32 %v4643_v29, %v7076_v61 }
 0x146   : > { %v928_v48 = vrot.slane %v831_v10, 3  ;;  %1247 = vadd.xlane.f32.xlu1 %v1246_v58  ;;  %v4873_v44 = vadd.f32 %v929_v1, %v4632_v37 }
 0x147   : > { %v840_v3 = vpop.xlane.xlu1 %839 }
 0x148   : > { %1244 = vadd.xlane.f32.xlu0 %v1243_v41  ;;  %v932_v49 = vrot.slane %v840_v3, 3  ;;  %v930_v7 = vsel %vm921_vm3, %v928_v48, %v929_v1  ;;  %v1405_v41 = vsel %vm230_vm0, %v1377_v46, 0.0  ;;  %v1379_v1 = vmul.f32 %v4655_v35, %v7076_v61 }
 0x149   : > { %v837_v55 = vpop.xlane.xlu0 %836  ;;  %v4883_v10 = vadd.f32 %v930_v7, %v4648_v39  ;;  %v1402_v3 = vsel %vm230_vm0, %v1376_v63, 0.0  ;;  %v1378_v39 = vmul.f32 %v4662_v21, %v7076_v61 }
 0x14a   : > { %v931_v37 = vrot.slane %v837_v55, 3  ;;  %1253 = vadd.xlane.f32.xlu1 %v1252_v16  ;;  %v4886_v58 = vadd.f32 %v932_v49, %v4651_v23  ;;  %v1411_v55 = vsel %vm230_vm0, %v1379_v1, 0.0 }
 0x14b   : > { %v846_v51 = vpop.xlane.xlu1 %845 }
 0x14c   : > { %1250 = vadd.xlane.f32.xlu0 %v1249_v2  ;;  %v935_v11 = vrot.slane %v846_v51, 3  ;;  %v933_v4 = vsel %vm921_vm3, %v931_v37, %v932_v49  ;;  %v1381_v49 = vmul.f32 %v4674_v24, %v7076_v61  ;;  %v1408_v51 = vsel %vm230_vm0, %v1378_v39, 0.0 }
 0x14d   : > { %v843_v48 = vpop.xlane.xlu0 %842  ;;  %v4896_v16 = vadd.f32 %v933_v4, %v4667_v8  ;;  %v1380_v8 = vmul.f32 %v4681_v30, %v7076_v61 }
 0x14e   : > { %v934_v23 = vrot.slane %v843_v48, 3  ;;  %1406 = vadd.xlane.f32.xlu1 %v1405_v41  ;;  %v4899_v46 = vadd.f32 %v935_v11, %v4670_v57  ;;  %v1417_v48 = vsel %vm230_vm0, %v1381_v49, 0.0 }
 0x14f   : > { %v852_v7 = vpop.xlane.xlu1 %851 }
 0x150   : > { %1403 = vadd.xlane.f32.xlu0 %v1402_v3  ;;  %v938_v2 = vrot.slane %v852_v7, 3  ;;  %v936_v63 = vsel %vm921_vm3, %v934_v23, %v935_v11  ;;  %v1383_v11 = vmul.f32 %v4693_v62, %v7076_v61  ;;  %v1414_v7 = vsel %vm230_vm0, %v1380_v8, 0.0 }
 0x151   : > { %v849_v37 = vpop.xlane.xlu0 %848  ;;  %v4909_v41 = vadd.f32 %v936_v63, %v4686_v15  ;;  %v1382_v15 = vmul.f32 %v4700_v42, %v7076_v61 }
 0x152   : > { %v937_v57 = vrot.slane %v849_v37, 3  ;;  %1412 = vadd.xlane.f32.xlu1 %v1411_v55  ;;  %v4912_v1 = vadd.f32 %v938_v2, %v4689_v52  ;;  %v1423_v37 = vsel %vm230_vm0, %v1383_v11, 0.0 }
 0x153   : > { %v858_v4 = vpop.xlane.xlu1 %857 }
 0x154   : > { %1409 = vadd.xlane.f32.xlu0 %v1408_v51  ;;  %v941_v3 = vrot.slane %v858_v4, 3  ;;  %v939_v39 = vsel %vm921_vm3, %v937_v57, %v938_v2  ;;  %v1385_v2 = vmul.f32 %v4712_v20, %v7076_v61  ;;  %v1420_v4 = vsel %vm230_vm0, %v1382_v15, 0.0 }
 0x155   : > { %v855_v23 = vpop.xlane.xlu0 %854  ;;  %v4922_v55 = vadd.f32 %v939_v39, %v4705_v6  ;;  %v1384_v6 = vmul.f32 %v4719_v31, %v7076_v61 }
 0x156   : > { %v940_v52 = vrot.slane %v855_v23, 3  ;;  %1418 = vadd.xlane.f32.xlu1 %v1417_v48  ;;  %v4925_v49 = vadd.f32 %v941_v3, %v4708_v32  ;;  %v1429_v23 = vsel %vm230_vm0, %v1385_v2, 0.0 }
 0x157   : > { %v864_v63 = vpop.xlane.xlu1 %863 }
 0x158   : > { %1415 = vadd.xlane.f32.xlu0 %v1414_v7  ;;  %v944_v51 = vrot.slane %v864_v63, 3  ;;  %v942_v8 = vsel %vm921_vm3, %v940_v52, %v941_v3  ;;  %v1387_v3 = vmul.f32 %v4731_v34, %v7076_v61  ;;  %v1426_v63 = vsel %vm230_vm0, %v1384_v6, 0.0 }
 0x159   : > { %v861_v57 = vpop.xlane.xlu0 %860  ;;  %v4935_v48 = vadd.f32 %v942_v8, %v4724_v54  ;;  %v1386_v54 = vmul.f32 %v4738_v27, %v7076_v61 }
 0x15a   : > { %v943_v32 = vrot.slane %v861_v57, 3  ;;  %1424 = vadd.xlane.f32.xlu1 %v1423_v37  ;;  %v4938_v11 = vadd.f32 %v944_v51, %v4727_v36  ;;  %v1435_v57 = vsel %vm230_vm0, %v1387_v3, 0.0 }
 0x15b   : > { %v870_v39 = vpop.xlane.xlu1 %869 }
 0x15c   : > { %1421 = vadd.xlane.f32.xlu0 %v1420_v4  ;;  %v947_v7 = vrot.slane %v870_v39, 3  ;;  %v945_v15 = vsel %vm921_vm3, %v943_v32, %v944_v51  ;;  %v1389_v51 = vmul.f32 %v4750_v43, %v7076_v61  ;;  %v1432_v39 = vsel %vm230_vm0, %v1386_v54, 0.0 }
 0x15d   : > { %v867_v52 = vpop.xlane.xlu0 %866  ;;  %v4948_v37 = vadd.f32 %v945_v15, %v4743_v12  ;;  %v1388_v12 = vmul.f32 %v4757_v50, %v7076_v61 }
 0x15e   : > { %v946_v36 = vrot.slane %v867_v52, 3  ;;  %1430 = vadd.xlane.f32.xlu1 %v1429_v23  ;;  %v4951_v2 = vadd.f32 %v947_v7, %v4746_v13  ;;  %v1441_v52 = vsel %vm230_vm0, %v1389_v51, 0.0 }
 0x15f   : > { %v876_v8 = vpop.xlane.xlu1 %875 }
 0x160   : > { %1427 = vadd.xlane.f32.xlu0 %v1426_v63  ;;  %v950_v4 = vrot.slane %v876_v8, 3  ;;  %v948_v6 = vsel %vm921_vm3, %v946_v36, %v947_v7  ;;  %v1391_v7 = vmul.f32 %v4769_v60, %v7076_v61  ;;  %v1438_v8 = vsel %vm230_vm0, %v1388_v12, 0.0 }
 0x161   : > { %v873_v32 = vpop.xlane.xlu0 %872  ;;  %v4961_v23 = vadd.f32 %v948_v6, %v4762_v17  ;;  %v1390_v17 = vmul.f32 %v4776_v40, %v7076_v61 }
 0x162   : > { %v949_v13 = vrot.slane %v873_v32, 3  ;;  %1436 = vadd.xlane.f32.xlu1 %v1435_v57  ;;  %v4964_v3 = vadd.f32 %v950_v4, %v4765_v5  ;;  %v1447_v32 = vsel %vm230_vm0, %v1391_v7, 0.0 }
 0x163   : > { %v882_v15 = vpop.xlane.xlu1 %881 }
 0x164   : > { %1433 = vadd.xlane.f32.xlu0 %v1432_v39  ;;  %v953_v63 = vrot.slane %v882_v15, 3  ;;  %v951_v54 = vsel %vm921_vm3, %v949_v13, %v950_v4  ;;  %v1393_v4 = vmul.f32 %v4788_v56, %v7076_v61  ;;  %v1444_v15 = vsel %vm230_vm0, %v1390_v17, 0.0 }
 0x165   : > { %v879_v36 = vpop.xlane.xlu0 %878  ;;  %v4974_v57 = vadd.f32 %v951_v54, %v4781_v45  ;;  %v1392_v45 = vmul.f32 %v4795_v53, %v7076_v61 }
 0x166   : > { %v952_v5 = vrot.slane %v879_v36, 3  ;;  %1442 = vadd.xlane.f32.xlu1 %v1441_v52  ;;  %v4977_v51 = vadd.f32 %v953_v63, %v4784_v22  ;;  %v1453_v36 = vsel %vm230_vm0, %v1393_v4, 0.0 }
 0x167   : > { %v888_v6 = vpop.xlane.xlu1 %887 }
 0x168   : > { %1439 = vadd.xlane.f32.xlu0 %v1438_v8  ;;  %v956_v39 = vrot.slane %v888_v6, 3  ;;  %v954_v12 = vsel %vm921_vm3, %v952_v5, %v953_v63  ;;  %v1395_v63 = vmul.f32 %v4807_v25, %v7076_v61  ;;  %v1450_v6 = vsel %vm230_vm0, %v1392_v45, 0.0 }
 0x169   : > { %v885_v13 = vpop.xlane.xlu0 %884  ;;  %v4987_v52 = vadd.f32 %v954_v12, %v4800_v59  ;;  %v7077_v59 = vld [vmem:[#allocation14_spill] sm:$0xff] }
 0x16a   : > { %v955_v22 = vrot.slane %v885_v13, 3  ;;  %1448 = vadd.xlane.f32.xlu1 %v1447_v32  ;;  %v4990_v7 = vadd.f32 %v956_v39, %v4803_v0  ;;  %v1394_v12 = vmul.f32 %v7077_v59, %v7076_v61  ;;  %v7078_v13 = vld [vmem:[#allocation16_spill] sm:$0xff] }
 0x16b   : > { %v894_v54 = vpop.xlane.xlu1 %893 }
 0x16c   : > { %1445 = vadd.xlane.f32.xlu0 %v1444_v15  ;;  %v959_v8 = vrot.slane %v894_v54, 3  ;;  %v957_v17 = vsel %vm921_vm3, %v955_v22, %v956_v39  ;;  %v1459_v15 = vsel %vm230_vm0, %v1395_v63, 0.0  ;;  %v7079_v54 = vld [vmem:[#allocation17_spill] sm:$0xff] }
 0x16d   : > { %v891_v5 = vpop.xlane.xlu0 %890  ;;  %v5000_v32 = vadd.f32 %v957_v17, %v4819_v14  ;;  %v1397_v39 = vmul.f32 %v7079_v54, %v7076_v61  ;;  %v1456_v14 = vsel %vm230_vm0, %v1394_v12, 0.0 }
 0x16e   : > { %v958_v0 = vrot.slane %v891_v5, 3  ;;  %1454 = vadd.xlane.f32.xlu1 %v1453_v36  ;;  %v5003_v4 = vadd.f32 %v959_v8, %v7078_v13  ;;  %v7080_v36 = vld [vmem:[#allocation18_spill] sm:$0xff] }
 0x16f   : > { %v1048_v53 = vpop.xlane.xlu1 %1047  ;;  %v1396_v17 = vmul.f32 %v7080_v36, %v7076_v61 }
 0x170   : > { %1451 = vadd.xlane.f32.xlu0 %v1450_v6  ;;  %v5009_v45 = vadd.f32 %v1048_v53, %v4841_v19  ;;  %v960_v22 = vsel %vm921_vm3, %v958_v0, %v959_v8  ;;  %v1465_v6 = vsel %vm230_vm0, %v1397_v39, 0.0  ;;  %v7081_v53 = vld [vmem:[#allocation3_spill] sm:$0xff]  ;;  %v1401_v39 = vmul.f32 %v7076_v61, %v4607_v38 }
 0x171   : > { %v1045_v59 = vpop.xlane.xlu0 %1044  ;;  %v5016_v5 = vadd.f32 %v960_v22, %v4838_v26  ;;  %v1399_v19 = vmul.f32 %v7081_v53, %v7076_v61  ;;  %v1462_v0 = vsel %vm230_vm0, %v1396_v17, 0.0  ;;  %v7082_v26 = vld [vmem:[#allocation19_spill] sm:$0xff] }
 0x172   : > { %v5019_v63 = vadd.f32 %v1045_v59, %v4857_v18  ;;  %1460 = vadd.xlane.f32.xlu1 %v1459_v15  ;;  %v1398_v22 = vmul.f32 %v7082_v26, %v7076_v61 }
 0x173   : > { %v1054_v13 = vpop.xlane.xlu1 %1053  ;;  %v1471_v15 = vsel %vm230_vm0, %v1399_v19, 0.0  ;;  %v1477_v19 = vsel %vm230_vm0, %v1401_v39, 0.0 }
 0x174   : > { %1457 = vadd.xlane.f32.xlu0 %v1456_v14  ;;  %v5025_v8 = vadd.f32 %v1054_v13, %v4860_v47  ;;  %v1468_v17 = vsel %vm230_vm0, %v1398_v22, 0.0  ;;  %v1400_v13 = vmul.f32 %v7076_v61, %v4619_v9 }
 0x175   : > { %v1051_v12 = vpop.xlane.xlu0 %1050 }
 0x176   : > { %v5031_v18 = vadd.f32 %v1051_v12, %v4870_v33  ;;  %1466 = vadd.xlane.f32.xlu1 %v1465_v6  ;;  %v7084_v12 = vld [vmem:[#allocation5_spill] sm:$0xff]  ;;  %v1474_v22 = vsel %vm230_vm0, %v1400_v13, 0.0 }
 0x177   : > { %v1060_v59 = vpop.xlane.xlu1 %1059  ;;  %v1601_v61 = vmul.f32 %v4643_v29, %v7084_v12  ;;  %v1603_v29 = vmul.f32 %v4662_v21, %v7084_v12  ;;  %v1606_v13 = vmul.f32 %v4674_v24, %v7084_v12 }
 0x178   : > { %7083 = vst [vmem:[#allocation4_spill] sm:$0xff] %v5031_v18  ;;  %1463 = vadd.xlane.f32.xlu0 %v1462_v0  ;;  %v5037_v47 = vadd.f32 %v1060_v59, %v4873_v44  ;;  %v1602_v18 = vmul.f32 %v4636_v28, %v7084_v12  ;;  %v1604_v28 = vmul.f32 %v4655_v35, %v7084_v12 }
 0x179   : > { %v1057_v14 = vpop.xlane.xlu0 %1056 }
 0x17a   : > { %v5043_v33 = vadd.f32 %v1057_v14, %v4883_v10  ;;  %1472 = vadd.xlane.f32.xlu1 %v1471_v15  ;;  %v1630_v15 = vsel %vm230_vm0, %v1602_v18, 0.0  ;;  %v1627_v14 = vsel %vm230_vm0, %v1601_v61, 0.0  ;;  %v1636_v18 = vsel %vm230_vm0, %v1604_v28, 0.0 }
 0x17b   : > { %v1066_v6 = vpop.xlane.xlu1 %1065  ;;  %v1642_v61 = vsel %vm230_vm0, %v1606_v13, 0.0 }
 0x17c   : > { %1469 = vadd.xlane.f32.xlu0 %v1468_v17  ;;  %v5049_v44 = vadd.f32 %v1066_v6, %v4886_v58 }
 0x17d   : > { %v1063_v0 = vpop.xlane.xlu0 %1062 }
 0x17e   : > { %v5055_v10 = vadd.f32 %v1063_v0, %v4896_v16  ;;  %1478 = vadd.xlane.f32.xlu1 %v1477_v19  ;;  %v1633_v19 = vsel %vm230_vm0, %v1603_v29, 0.0  ;;  %v1605_v0 = vmul.f32 %v4681_v30, %v7084_v12 }
 0x17f   : > { %v1072_v59 = vpop.xlane.xlu1 %1071 }
 0x180   : > { %1475 = vadd.xlane.f32.xlu0 %v1474_v22  ;;  %v5061_v58 = vadd.f32 %v1072_v59, %v4899_v46  ;;  %v1608_v59 = vmul.f32 %v4693_v62, %v7084_v12  ;;  %v1639_v28 = vsel %vm230_vm0, %v1605_v0, 0.0 }
 0x181   : > { %v1069_v39 = vpop.xlane.xlu0 %1068 }
 0x182   : > { %v5067_v16 = vadd.f32 %v1069_v39, %v4909_v41  ;;  %1631 = vadd.xlane.f32.xlu1 %v1630_v15  ;;  %v1607_v39 = vmul.f32 %v4700_v42, %v7084_v12  ;;  %v1648_v29 = vsel %vm230_vm0, %v1608_v59, 0.0 }
 0x183   : > { %v1078_v17 = vpop.xlane.xlu1 %1077 }
 0x184   : > { %1628 = vadd.xlane.f32.xlu0 %v1627_v14  ;;  %v5073_v46 = vadd.f32 %v1078_v17, %v4912_v1  ;;  %v1610_v17 = vmul.f32 %v4712_v20, %v7084_v12  ;;  %v1645_v13 = vsel %vm230_vm0, %v1607_v39, 0.0 }
 0x185   : > { %v1075_v6 = vpop.xlane.xlu0 %1074 }
 0x186   : > { %v5079_v41 = vadd.f32 %v1075_v6, %v4922_v55  ;;  %1637 = vadd.xlane.f32.xlu1 %v1636_v18  ;;  %v1609_v6 = vmul.f32 %v4719_v31, %v7084_v12  ;;  %v1654_v0 = vsel %vm230_vm0, %v1610_v17, 0.0 }
 0x187   : > { %v1084_v22 = vpop.xlane.xlu1 %1083 }
 0x188   : > { %1634 = vadd.xlane.f32.xlu0 %v1633_v19  ;;  %v5085_v1 = vadd.f32 %v1084_v22, %v4925_v49  ;;  %v1612_v22 = vmul.f32 %v4731_v34, %v7084_v12  ;;  %v1651_v59 = vsel %vm230_vm0, %v1609_v6, 0.0 }
 0x189   : > { %v1081_v15 = vpop.xlane.xlu0 %1080 }
 0x18a   : > { %v5091_v55 = vadd.f32 %v1081_v15, %v4935_v48  ;;  %1643 = vadd.xlane.f32.xlu1 %v1642_v61  ;;  %v1611_v15 = vmul.f32 %v4738_v27, %v7084_v12  ;;  %v1660_v39 = vsel %vm230_vm0, %v1612_v22, 0.0 }
 0x18b   : > { %v1090_v14 = vpop.xlane.xlu1 %1089 }
 0x18c   : > { %1640 = vadd.xlane.f32.xlu0 %v1639_v28  ;;  %v5097_v49 = vadd.f32 %v1090_v14, %v4938_v11  ;;  %v1614_v14 = vmul.f32 %v4750_v43, %v7084_v12  ;;  %v1657_v17 = vsel %vm230_vm0, %v1611_v15, 0.0 }
 0x18d   : > { %v1087_v18 = vpop.xlane.xlu0 %1086 }
 0x18e   : > { %v5103_v48 = vadd.f32 %v1087_v18, %v4948_v37  ;;  %1649 = vadd.xlane.f32.xlu1 %v1648_v29  ;;  %v1613_v18 = vmul.f32 %v4757_v50, %v7084_v12  ;;  %v1666_v6 = vsel %vm230_vm0, %v1614_v14, 0.0 }
 0x18f   : > { %v1096_v19 = vpop.xlane.xlu1 %1095 }
 0x190   : > { %1646 = vadd.xlane.f32.xlu0 %v1645_v13  ;;  %v5109_v11 = vadd.f32 %v1096_v19, %v4951_v2  ;;  %v1616_v19 = vmul.f32 %v4769_v60, %v7084_v12  ;;  %v1663_v22 = vsel %vm230_vm0, %v1613_v18, 0.0 }
 0x191   : > { %v1093_v61 = vpop.xlane.xlu0 %1092 }
 0x192   : > { %v5115_v37 = vadd.f32 %v1093_v61, %v4961_v23  ;;  %1655 = vadd.xlane.f32.xlu1 %v1654_v0  ;;  %v1615_v61 = vmul.f32 %v4776_v40, %v7084_v12  ;;  %v1672_v15 = vsel %vm230_vm0, %v1616_v19, 0.0 }
 0x193   : > { %v1102_v28 = vpop.xlane.xlu1 %1101 }
 0x194   : > { %1652 = vadd.xlane.f32.xlu0 %v1651_v59  ;;  %v5121_v2 = vadd.f32 %v1102_v28, %v4964_v3  ;;  %v1618_v28 = vmul.f32 %v4788_v56, %v7084_v12  ;;  %v1669_v14 = vsel %vm230_vm0, %v1615_v61, 0.0 }
 0x195   : > { %v1099_v29 = vpop.xlane.xlu0 %1098 }
 0x196   : > { %v5127_v23 = vadd.f32 %v1099_v29, %v4974_v57  ;;  %1661 = vadd.xlane.f32.xlu1 %v1660_v39  ;;  %v7085_v29 = vld [vmem:[#allocation15_spill] sm:$0xff] }
 0x197   : > { %v1108_v13 = vpop.xlane.xlu1 %1107 }
 0x198   : > { %1658 = vadd.xlane.f32.xlu0 %v1657_v17  ;;  %v5133_v3 = vadd.f32 %v1108_v13, %v4977_v51  ;;  %v1617_v17 = vmul.f32 %v7085_v29, %v7084_v12  ;;  %v1678_v13 = vsel %vm230_vm0, %v1618_v28, 0.0  ;;  %v1622_v28 = vmul.f32 %v7079_v54, %v7084_v12 }
 0x199   : > { %v1105_v0 = vpop.xlane.xlu0 %1104 }
 0x19a   : > { %v5139_v57 = vadd.f32 %v1105_v0, %v4987_v52  ;;  %1667 = vadd.xlane.f32.xlu1 %v1666_v6  ;;  %v1620_v6 = vmul.f32 %v4807_v25, %v7084_v12  ;;  %v1675_v0 = vsel %vm230_vm0, %v1617_v17, 0.0  ;;  %v1621_v17 = vmul.f32 %v7080_v36, %v7084_v12 }
 0x19b   : > { %v1114_v59 = vpop.xlane.xlu1 %1113 }
 0x19c   : > { %1664 = vadd.xlane.f32.xlu0 %v1663_v22  ;;  %v5145_v51 = vadd.f32 %v1114_v59, %v4990_v7  ;;  %v7087_v22 = vld [vmem:[#allocation14_spill] sm:$0xff] }
 0x19d   : > { %v1111_v39 = vpop.xlane.xlu0 %1110  ;;  %v1619_v61 = vmul.f32 %v7087_v22, %v7084_v12 }
 0x19e   : > { %v5151_v52 = vadd.f32 %v1111_v39, %v5000_v32  ;;  %1673 = vadd.xlane.f32.xlu1 %v1672_v15  ;;  %v1684_v15 = vsel %vm230_vm0, %v1620_v6, 0.0  ;;  %v1624_v6 = vmul.f32 %v7081_v53, %v7084_v12 }
 0x19f   : > { %v1120_v18 = vpop.xlane.xlu1 %1119 }
 0x1a0   : > { %1670 = vadd.xlane.f32.xlu0 %v1669_v14  ;;  %v5157_v7 = vadd.f32 %v1120_v18, %v5003_v4  ;;  %v1681_v14 = vsel %vm230_vm0, %v1619_v61, 0.0 }
 0x1a1   : > { %v1117_v19 = vpop.xlane.xlu0 %1116 }
 0x1a2   : > { %7086 = vst [vmem:[#allocation16_spill] sm:$0xff] %v5157_v7  ;;  %v5163_v32 = vadd.f32 %v1117_v19, %v5016_v5  ;;  %1679 = vadd.xlane.f32.xlu1 %v1678_v13  ;;  %v1690_v19 = vsel %vm230_vm0, %v1622_v28, 0.0  ;;  %v1687_v7 = vsel %vm230_vm0, %v1621_v17, 0.0 }
 0x1a3   : > { %v1182_v59 = vpop.xlane.xlu1 %1181 }
 0x1a4   : > { %7088 = vst [vmem:[#allocation17_spill] sm:$0xff] %v5163_v32  ;;  %1676 = vadd.xlane.f32.xlu0 %v1675_v0  ;;  %v1282_v39 = vrot.slane %v1182_v59, 1 }
 0x1a5   : > { %v1179_v4 = vpop.xlane.xlu0 %1178 }
 0x1a6   : > { %v5172_v18 = vadd.f32 %v1282_v39, %v5009_v45  ;;  %v1281_v5 = vrot.slane %v1179_v4, 1  ;;  %1685 = vadd.xlane.f32.xlu1 %v1684_v15  ;;  %v1623_v45 = vmul.f32 %v7082_v26, %v7084_v12 }
 0x1a7   : > { %v1188_v13 = vpop.xlane.xlu1 %1187 }
 0x1a8   : > { %7089 = vst [vmem:[#allocation18_spill] sm:$0xff] %v5172_v18  ;;  %v1283_v0 = vsel %vm469_vm1, %v1281_v5, %v1282_v39  ;;  %1682 = vadd.xlane.f32.xlu0 %v1681_v14  ;;  %v1285_v59 = vrot.slane %v1188_v13, 1  ;;  %v1696_v18 = vsel %vm230_vm0, %v1624_v6, 0.0  ;;  %v1626_v39 = vmul.f32 %v7084_v12, %v4607_v38  ;;  %v7090_v5 = vld [vmem:[#allocation4_spill] sm:$0xff] }
 0x1a9   : > { %v5179_v61 = vadd.f32 %v1283_v0, %v5019_v63  ;;  %v1185_v32 = vpop.xlane.xlu0 %1184  ;;  %v1693_v0 = vsel %vm230_vm0, %v1623_v45, 0.0 }
 0x1aa   : > { %v5185_v15 = vadd.f32 %v1285_v59, %v5025_v8  ;;  %v1284_v28 = vrot.slane %v1185_v32, 1  ;;  %1691 = vadd.xlane.f32.xlu1 %v1690_v19  ;;  %v1625_v8 = vmul.f32 %v7084_v12, %v4619_v9  ;;  %v1702_v38 = vsel %vm230_vm0, %v1626_v39, 0.0 }
 0x1ab   : > { %v1194_v4 = vpop.xlane.xlu1 %1193 }
 0x1ac   : > { %v1286_v63 = vsel %vm469_vm1, %v1284_v28, %v1285_v59  ;;  %1688 = vadd.xlane.f32.xlu0 %v1687_v7  ;;  %v1288_v14 = vrot.slane %v1194_v4, 1  ;;  %v7091_v59 = vld [vmem:[#allocation6_spill] sm:$0xff]  ;;  %v1699_v9 = vsel %vm230_vm0, %v1625_v8, 0.0 }
 0x1ad   : > { %v5192_v17 = vadd.f32 %v1286_v63, %v7090_v5  ;;  %v1191_v13 = vpop.xlane.xlu0 %1190  ;;  %v1827_v7 = vmul.f32 %v4655_v35, %v7091_v59 }
 0x1ae   : > { %v5198_v32 = vadd.f32 %v1288_v14, %v5037_v47  ;;  %v1287_v19 = vrot.slane %v1191_v13, 1  ;;  %1697 = vadd.xlane.f32.xlu1 %v1696_v18  ;;  %v1826_v47 = vmul.f32 %v4662_v21, %v7091_v59 }
 0x1af   : > { %v1200_v6 = vpop.xlane.xlu1 %1199  ;;  %v1855_v35 = vsel %vm230_vm0, %v1827_v7, 0.0 }
 0x1b0   : > { %v1289_v28 = vsel %vm469_vm1, %v1287_v19, %v1288_v14  ;;  %1694 = vadd.xlane.f32.xlu0 %v1693_v0  ;;  %v1291_v4 = vrot.slane %v1200_v6, 1  ;;  %v1829_v14 = vmul.f32 %v4674_v24, %v7091_v59  ;;  %v1852_v21 = vsel %vm230_vm0, %v1826_v47, 0.0 }
 0x1b1   : > { %v5205_v45 = vadd.f32 %v1289_v28, %v5043_v33  ;;  %v1197_v63 = vpop.xlane.xlu0 %1196 }
 0x1b2   : > { %v5211_v12 = vadd.f32 %v1291_v4, %v5049_v44  ;;  %v1290_v18 = vrot.slane %v1197_v63, 1  ;;  %1703 = vadd.xlane.f32.xlu1 %v1702_v38  ;;  %v1828_v44 = vmul.f32 %v4681_v30, %v7091_v59  ;;  %v1861_v24 = vsel %vm230_vm0, %v1829_v14, 0.0 }
 0x1b3   : > { %v1206_v39 = vpop.xlane.xlu1 %1205  ;;  %v1831_v38 = vmul.f32 %v4693_v62, %v7091_v59 }
 0x1b4   : > { %v1292_v33 = vsel %vm469_vm1, %v1290_v18, %v1291_v4  ;;  %1700 = vadd.xlane.f32.xlu0 %v1699_v9  ;;  %v1294_v5 = vrot.slane %v1206_v39, 1  ;;  %v1858_v30 = vsel %vm230_vm0, %v1828_v44, 0.0  ;;  %v1833_v18 = vmul.f32 %v4712_v20, %v7091_v59 }
 0x1b5   : > { %v5218_v13 = vadd.f32 %v1292_v33, %v5055_v10  ;;  %v1203_v0 = vpop.xlane.xlu0 %1202  ;;  %v1867_v62 = vsel %vm230_vm0, %v1831_v38, 0.0 }
 0x1b6   : > { %v5224_v8 = vadd.f32 %v1294_v5, %v5061_v58  ;;  %v1293_v19 = vrot.slane %v1203_v0, 1  ;;  %1856 = vadd.xlane.f32.xlu1 %v1855_v35  ;;  %v1830_v58 = vmul.f32 %v4700_v42, %v7091_v59  ;;  %v1873_v20 = vsel %vm230_vm0, %v1833_v18, 0.0 }
 0x1b7   : > { %v1212_v6 = vpop.xlane.xlu1 %1211  ;;  %v1839_v18 = vmul.f32 %v4769_v60, %v7091_v59 }
 0x1b8   : > { %v1295_v10 = vsel %vm469_vm1, %v1293_v19, %v1294_v5  ;;  %1853 = vadd.xlane.f32.xlu0 %v1852_v21  ;;  %v1297_v7 = vrot.slane %v1212_v6, 1  ;;  %v1864_v42 = vsel %vm230_vm0, %v1830_v58, 0.0  ;;  %v1835_v21 = vmul.f32 %v4731_v34, %v7091_v59 }
 0x1b9   : > { %v5231_v28 = vadd.f32 %v1295_v10, %v5067_v16  ;;  %v1209_v4 = vpop.xlane.xlu0 %1208  ;;  %v1891_v60 = vsel %vm230_vm0, %v1839_v18, 0.0 }
 0x1ba   : > { %v5237_v63 = vadd.f32 %v1297_v7, %v5073_v46  ;;  %v1296_v9 = vrot.slane %v1209_v4, 1  ;;  %1862 = vadd.xlane.f32.xlu1 %v1861_v24  ;;  %v1832_v46 = vmul.f32 %v4719_v31, %v7091_v59  ;;  %v1879_v34 = vsel %vm230_vm0, %v1835_v21, 0.0 }
 0x1bb   : > { %v1218_v47 = vpop.xlane.xlu1 %1217 }
 0x1bc   : > { %v1298_v16 = vsel %vm469_vm1, %v1296_v9, %v1297_v7  ;;  %1859 = vadd.xlane.f32.xlu0 %v1858_v30  ;;  %v1300_v39 = vrot.slane %v1218_v47, 1  ;;  %v1870_v31 = vsel %vm230_vm0, %v1832_v46, 0.0  ;;  %v1837_v7 = vmul.f32 %v4750_v43, %v7091_v59 }
 0x1bd   : > { %v5244_v35 = vadd.f32 %v1298_v16, %v5079_v41  ;;  %v1215_v14 = vpop.xlane.xlu0 %1214 }
 0x1be   : > { %v5250_v33 = vadd.f32 %v1300_v39, %v5085_v1  ;;  %v1299_v5 = vrot.slane %v1215_v14, 1  ;;  %1868 = vadd.xlane.f32.xlu1 %v1867_v62  ;;  %v1834_v1 = vmul.f32 %v4738_v27, %v7091_v59  ;;  %v1885_v43 = vsel %vm230_vm0, %v1837_v7, 0.0 }
 0x1bf   : > { %v1224_v0 = vpop.xlane.xlu1 %1223 }
 0x1c0   : > { %v1301_v41 = vsel %vm469_vm1, %v1299_v5, %v1300_v39  ;;  %1865 = vadd.xlane.f32.xlu0 %v1864_v42  ;;  %v1303_v44 = vrot.slane %v1224_v0, 1  ;;  %v1876_v27 = vsel %vm230_vm0, %v1834_v1, 0.0  ;;  %v1841_v0 = vmul.f32 %v4788_v56, %v7091_v59 }
 0x1c1   : > { %v5257_v19 = vadd.f32 %v1301_v41, %v5091_v55  ;;  %v1221_v6 = vpop.xlane.xlu0 %1220  ;;  %v1843_v1 = vmul.f32 %v4807_v25, %v7091_v59 }
 0x1c2   : > { %v5263_v24 = vadd.f32 %v1303_v44, %v5097_v49  ;;  %v1302_v38 = vrot.slane %v1221_v6, 1  ;;  %1874 = vadd.xlane.f32.xlu1 %v1873_v20  ;;  %v1836_v49 = vmul.f32 %v4757_v50, %v7091_v59  ;;  %v1897_v56 = vsel %vm230_vm0, %v1841_v0, 0.0 }
 0x1c3   : > { %v1230_v10 = vpop.xlane.xlu1 %1229  ;;  %v1903_v25 = vsel %vm230_vm0, %v1843_v1, 0.0  ;;  %v5355_v1 = vld [vmem:[%s3929_s18 + $0xd0] sm:$0xff] }
 0x1c4   : > { %v1304_v55 = vsel %vm469_vm1, %v1302_v38, %v1303_v44  ;;  %1871 = vadd.xlane.f32.xlu0 %v1870_v31  ;;  %v1306_v4 = vrot.slane %v1230_v10, 1  ;;  %v1882_v50 = vsel %vm230_vm0, %v1836_v49, 0.0 }
 0x1c5   : > { %v5270_v30 = vadd.f32 %v1304_v55, %v5103_v48  ;;  %v1227_v58 = vpop.xlane.xlu0 %1226 }
 0x1c6   : > { %v5276_v9 = vadd.f32 %v1306_v4, %v5109_v11  ;;  %v1305_v47 = vrot.slane %v1227_v58, 1  ;;  %1880 = vadd.xlane.f32.xlu1 %v1879_v34  ;;  %v1838_v11 = vmul.f32 %v4776_v40, %v7091_v59  ;;  %v1845_v58 = vmul.f32 %v7079_v54, %v7091_v59 }
 0x1c7   : > { %v1236_v62 = vpop.xlane.xlu1 %1235 }
 0x1c8   : > { %v1307_v48 = vsel %vm469_vm1, %v1305_v47, %v1306_v4  ;;  %1877 = vadd.xlane.f32.xlu0 %v1876_v27  ;;  %v1309_v16 = vrot.slane %v1236_v62, 1  ;;  %v1888_v40 = vsel %vm230_vm0, %v1838_v11, 0.0  ;;  %v7092_v62 = vld [vmem:[#allocation16_spill] sm:$0xff] }
 0x1c9   : > { %v5283_v39 = vadd.f32 %v1307_v48, %v5115_v37  ;;  %v1233_v14 = vpop.xlane.xlu0 %1232  ;;  %v1909_v48 = vsel %vm230_vm0, %v1845_v58, 0.0 }
 0x1ca   : > { %v5289_v42 = vadd.f32 %v1309_v16, %v5121_v2  ;;  %v1308_v46 = vrot.slane %v1233_v14, 1  ;;  %1886 = vadd.xlane.f32.xlu1 %v1885_v43  ;;  %v1840_v2 = vmul.f32 %v7085_v29, %v7091_v59 }
 0x1cb   : > { %v1242_v5 = vpop.xlane.xlu1 %1241 }
 0x1cc   : > { %v1310_v37 = vsel %vm469_vm1, %v1308_v46, %v1309_v16  ;;  %1883 = vadd.xlane.f32.xlu0 %v1882_v50  ;;  %v1312_v20 = vrot.slane %v1242_v5, 1  ;;  %v1894_v29 = vsel %vm230_vm0, %v1840_v2, 0.0  ;;  %v1847_v16 = vmul.f32 %v7081_v53, %v7091_v59  ;;  %v7093_v50 = vld [vmem:[#allocation17_spill] sm:$0xff] }
 0x1cd   : > { %v5296_v21 = vadd.f32 %v1310_v37, %v5127_v23  ;;  %v1239_v41 = vpop.xlane.xlu0 %1238  ;;  %v1846_v5 = vmul.f32 %v7082_v26, %v7091_v59 }
 0x1ce   : > { %v5302_v44 = vadd.f32 %v1312_v20, %v5133_v3  ;;  %v1311_v6 = vrot.slane %v1239_v41, 1  ;;  %1892 = vadd.xlane.f32.xlu1 %v1891_v60  ;;  %v1842_v3 = vmul.f32 %v7087_v22, %v7091_v59  ;;  %v7094_v60 = vld [vmem:[#allocation18_spill] sm:$0xff]  ;;  %v5345_v41 = vld [vmem:[%s3929_s18 + $0xd8] sm:$0xff] }
 0x1cf   : > { %v1248_v31 = vpop.xlane.xlu1 %1247 }
 0x1d0   : > { %v1313_v23 = vsel %vm469_vm1, %v1311_v6, %v1312_v20  ;;  %1889 = vadd.xlane.f32.xlu0 %v1888_v40  ;;  %v1315_v38 = vrot.slane %v1248_v31, 1  ;;  %v1900_v22 = vsel %vm230_vm0, %v1842_v3, 0.0  ;;  %v1915_v20 = vsel %vm230_vm0, %v1847_v16, 0.0  ;;  %v5351_v31 = vld [vmem:[%s3929_s18 + $0xe8] sm:$0xff]  ;;  %v5366_v3 = vld [vmem:[%s3929_s18 + $0xe0] sm:$0xff] }
 0x1d1   : > { %v5309_v10 = vadd.f32 %v1313_v23, %v5139_v57  ;;  %v1245_v34 = vpop.xlane.xlu0 %1244  ;;  %v1849_v40 = vmul.f32 %v5345_v41, %v7091_v59  ;;  %v1848_v23 = vmul.f32 %v5355_v1, %v7091_v59 }
 0x1d2   : > { %v5315_v7 = vadd.f32 %v1315_v38, %v5145_v51  ;;  %v1314_v55 = vrot.slane %v1245_v34, 1  ;;  %1898 = vadd.xlane.f32.xlu1 %v1897_v56  ;;  %v1844_v51 = vmul.f32 %v7080_v36, %v7091_v59  ;;  %v1912_v56 = vsel %vm230_vm0, %v1846_v5, 0.0 }
 0x1d3   : > { %v1254_v4 = vpop.xlane.xlu1 %1253 }
 0x1d4   : > { %v1316_v57 = vsel %vm469_vm1, %v1314_v55, %v1315_v38  ;;  %1895 = vadd.xlane.f32.xlu0 %v1894_v29  ;;  %v1318_v27 = vrot.slane %v1254_v4, 1  ;;  %v1906_v46 = vsel %vm230_vm0, %v1844_v51, 0.0  ;;  %v1921_v4 = vsel %vm230_vm0, %v1849_v40, 0.0 }
 0x1d5   : > { %v5322_v49 = vadd.f32 %v1316_v57, %v5151_v52  ;;  %v1251_v47 = vpop.xlane.xlu0 %1250 }
 0x1d6   : > { %v5328_v43 = vadd.f32 %v1318_v27, %v7092_v62  ;;  %v1317_v18 = vrot.slane %v1251_v47, 1  ;;  %1904 = vadd.xlane.f32.xlu1 %v1903_v25  ;;  %v1851_v25 = vmul.f32 %v7091_v59, %v5351_v31 }
 0x1d7   : > { %v1407_v54 = vpop.xlane.xlu1 %1406 }
 0x1d8   : > { %v1319_v52 = vsel %vm469_vm1, %v1317_v18, %v1318_v27  ;;  %1901 = vadd.xlane.f32.xlu0 %v1900_v22  ;;  %v1507_v14 = vrot.slane %v1407_v54, 2  ;;  %v1850_v27 = vmul.f32 %v7091_v59, %v5366_v3  ;;  %v1927_v18 = vsel %vm230_vm0, %v1851_v25, 0.0  ;;  %v5383_v54 = vld [vmem:[%s3929_s18 + $0x28] sm:$0xff] }
 0x1d9   : > { %v5335_v11 = vadd.f32 %v1319_v52, %v7093_v50  ;;  %v1404_v36 = vpop.xlane.xlu0 %1403  ;;  %v5421_v25 = vld [vmem:[%s3929_s18 + $0x48] sm:$0xff] }
 0x1da   : > { %v5341_v0 = vadd.f32 %v1507_v14, %v7094_v60  ;;  %v1506_v37 = vrot.slane %v1404_v36, 2  ;;  %1910 = vadd.xlane.f32.xlu1 %v1909_v48  ;;  %v7095_v48 = vld [vmem:[#allocation7_spill] sm:$0xff] }
 0x1db   : > { %v1413_v53 = vpop.xlane.xlu1 %1412  ;;  %v1961_v16 = vmul.f32 %v5383_v54, %v7095_v48 }
 0x1dc   : > { %v1508_v2 = vsel %vm695_vm2, %v1506_v37, %v1507_v14  ;;  %1907 = vadd.xlane.f32.xlu0 %v1906_v46  ;;  %v1510_v6 = vrot.slane %v1413_v53, 2  ;;  %v1924_v14 = vsel %vm230_vm0, %v1850_v27, 0.0  ;;  %v5402_v53 = vld [vmem:[%s3929_s18 + $0x38] sm:$0xff] }
 0x1dd   : > { %v1410_v26 = vpop.xlane.xlu0 %1409  ;;  %v5360_v38 = vadd.f32 %v1508_v2, %v5179_v61  ;;  %v1989_v37 = vsel %vm230_vm0, %v1961_v16, 0.0 }
 0x1de   : > { %v5363_v34 = vadd.f32 %v1510_v6, %v5185_v15  ;;  %v1509_v29 = vrot.slane %v1410_v26, 2  ;;  %1916 = vadd.xlane.f32.xlu1 %v1915_v20  ;;  %v1918_v15 = vsel %vm230_vm0, %v1848_v23, 0.0  ;;  %v1963_v20 = vmul.f32 %v5402_v53, %v7095_v48 }
 0x1df   : > { %v1419_v55 = vpop.xlane.xlu1 %1418 }
 0x1e0   : > { %v1511_v58 = vsel %vm695_vm2, %v1509_v29, %v1510_v6  ;;  %1913 = vadd.xlane.f32.xlu0 %v1912_v56  ;;  %v1513_v57 = vrot.slane %v1419_v55, 2 }
 0x1e1   : > { %v1416_v61 = vpop.xlane.xlu0 %1415  ;;  %v5376_v47 = vadd.f32 %v1511_v58, %v5192_v17  ;;  %v1965_v58 = vmul.f32 %v5421_v25, %v7095_v48 }
 0x1e2   : > { %v5379_v22 = vadd.f32 %v1513_v57, %v5198_v32  ;;  %v1512_v51 = vrot.slane %v1416_v61, 2  ;;  %1922 = vadd.xlane.f32.xlu1 %v1921_v4  ;;  %v5390_v32 = vld [vmem:[%s3929_s18 + $0x20] sm:$0xff]  ;;  %v1995_v4 = vsel %vm230_vm0, %v1963_v20, 0.0 }
 0x1e3   : > { %v1425_v62 = vpop.xlane.xlu1 %1424  ;;  %v1960_v50 = vmul.f32 %v5390_v32, %v7095_v48 }
 0x1e4   : > { %v1514_v52 = vsel %vm695_vm2, %v1512_v51, %v1513_v57  ;;  %1919 = vadd.xlane.f32.xlu0 %v1918_v15  ;;  %v1516_v59 = vrot.slane %v1425_v62, 2 }
 0x1e5   : > { %v1422_v17 = vpop.xlane.xlu0 %1421  ;;  %v5395_v36 = vadd.f32 %v1514_v52, %v5205_v45  ;;  %v1986_v6 = vsel %vm230_vm0, %v1960_v50, 0.0  ;;  %v2001_v52 = vsel %vm230_vm0, %v1965_v58, 0.0 }
 0x1e6   : > { %v5398_v46 = vadd.f32 %v1516_v59, %v5211_v12  ;;  %v1515_v5 = vrot.slane %v1422_v17, 2  ;;  %1928 = vadd.xlane.f32.xlu1 %v1927_v18  ;;  %v5409_v12 = vld [vmem:[%s3929_s18 + $0x30] sm:$0xff] }
 0x1e7   : > { %v1431_v60 = vpop.xlane.xlu1 %1430  ;;  %v1962_v26 = vmul.f32 %v5409_v12, %v7095_v48 }
 0x1e8   : > { %v1517_v40 = vsel %vm695_vm2, %v1515_v5, %v1516_v59  ;;  %1925 = vadd.xlane.f32.xlu0 %v1924_v14  ;;  %v1519_v2 = vrot.slane %v1431_v60, 2  ;;  %v5440_v59 = vld [vmem:[%s3929_s18 + $0x58] sm:$0xff] }
 0x1e9   : > { %v1428_v45 = vpop.xlane.xlu0 %1427  ;;  %v5414_v56 = vadd.f32 %v1517_v40, %v5218_v13  ;;  %v1992_v15 = vsel %vm230_vm0, %v1962_v26, 0.0  ;;  %v1967_v17 = vmul.f32 %v5440_v59, %v7095_v48 }
 0x1ea   : > { %v5417_v23 = vadd.f32 %v1519_v2, %v5224_v8  ;;  %v1518_v29 = vrot.slane %v1428_v45, 2  ;;  %1990 = vadd.xlane.f32.xlu1 %v1989_v37  ;;  %v5428_v8 = vld [vmem:[%s3929_s18 + $0x40] sm:$0xff] }
 0x1eb   : > { %v1437_v55 = vpop.xlane.xlu1 %1436  ;;  %v1964_v27 = vmul.f32 %v5428_v8, %v7095_v48  ;;  %v2007_v45 = vsel %vm230_vm0, %v1967_v17, 0.0 }
 0x1ec   : > { %v1520_v57 = vsel %vm695_vm2, %v1518_v29, %v1519_v2  ;;  %1987 = vadd.xlane.f32.xlu0 %v1986_v6  ;;  %v1522_v61 = vrot.slane %v1437_v55, 2  ;;  %v5459_v6 = vld [vmem:[%s3929_s18 + $0x68] sm:$0xff] }
 0x1ed   : > { %v1434_v13 = vpop.xlane.xlu0 %1433  ;;  %v5433_v51 = vadd.f32 %v1520_v57, %v5231_v28  ;;  %v1998_v5 = vsel %vm230_vm0, %v1964_v27, 0.0  ;;  %v1969_v26 = vmul.f32 %v5459_v6, %v7095_v48 }
 0x1ee   : > { %v5436_v62 = vadd.f32 %v1522_v61, %v5237_v63  ;;  %v1521_v18 = vrot.slane %v1434_v13, 2  ;;  %1996 = vadd.xlane.f32.xlu1 %v1995_v4  ;;  %v5447_v63 = vld [vmem:[%s3929_s18 + $0x50] sm:$0xff] }
 0x1ef   : > { %v1443_v16 = vpop.xlane.xlu1 %1442  ;;  %v1966_v60 = vmul.f32 %v5447_v63, %v7095_v48  ;;  %v2013_v27 = vsel %vm230_vm0, %v1969_v26, 0.0 }
 0x1f0   : > { %v1523_v14 = vsel %vm695_vm2, %v1521_v18, %v1522_v61  ;;  %1993 = vadd.xlane.f32.xlu0 %v1992_v15  ;;  %v1525_v50 = vrot.slane %v1443_v16, 2  ;;  %v5478_v18 = vld [vmem:[%s3929_s18 + $0x78] sm:$0xff] }
 0x1f1   : > { %v1440_v28 = vpop.xlane.xlu0 %1439  ;;  %v5452_v37 = vadd.f32 %v1523_v14, %v5244_v35  ;;  %v2004_v4 = vsel %vm230_vm0, %v1966_v60, 0.0  ;;  %v1971_v16 = vmul.f32 %v5478_v18, %v7095_v48 }
 0x1f2   : > { %v5455_v20 = vadd.f32 %v1525_v50, %v5250_v33  ;;  %v1524_v40 = vrot.slane %v1440_v28, 2  ;;  %2002 = vadd.xlane.f32.xlu1 %v2001_v52  ;;  %v5466_v33 = vld [vmem:[%s3929_s18 + $0x60] sm:$0xff] }
 0x1f3   : > { %v1449_v2 = vpop.xlane.xlu1 %1448  ;;  %v1968_v58 = vmul.f32 %v5466_v33, %v7095_v48 }
 0x1f4   : > { %v1526_v29 = vsel %vm695_vm2, %v1524_v40, %v1525_v50  ;;  %1999 = vadd.xlane.f32.xlu0 %v1998_v5  ;;  %v1528_v55 = vrot.slane %v1449_v2, 2  ;;  %v2019_v2 = vsel %vm230_vm0, %v1971_v16, 0.0 }
 0x1f5   : > { %v1446_v35 = vpop.xlane.xlu0 %1445  ;;  %v5471_v57 = vadd.f32 %v1526_v29, %v5257_v19  ;;  %v2010_v14 = vsel %vm230_vm0, %v1968_v58, 0.0 }
 0x1f6   : > { %v5474_v61 = vadd.f32 %v1528_v55, %v5263_v24  ;;  %v1527_v13 = vrot.slane %v1446_v35, 2  ;;  %2008 = vadd.xlane.f32.xlu1 %v2007_v45  ;;  %v5485_v24 = vld [vmem:[%s3929_s18 + $0x70] sm:$0xff]  ;;  %v5497_v45 = vld [vmem:[%s3929_s18 + $0x88] sm:$0xff] }
 0x1f7   : > { %v1455_v15 = vpop.xlane.xlu1 %1454  ;;  %v1970_v50 = vmul.f32 %v5485_v24, %v7095_v48  ;;  %v1973_v26 = vmul.f32 %v5497_v45, %v7095_v48 }
 0x1f8   : > { %v1529_v52 = vsel %vm695_vm2, %v1527_v13, %v1528_v55  ;;  %2005 = vadd.xlane.f32.xlu0 %v2004_v4  ;;  %v1531_v17 = vrot.slane %v1455_v15, 2 }
 0x1f9   : > { %v1452_v19 = vpop.xlane.xlu0 %1451  ;;  %v5490_v28 = vadd.f32 %v1529_v52, %v5270_v30  ;;  %v2016_v35 = vsel %vm230_vm0, %v1970_v50, 0.0  ;;  %v2025_v16 = vsel %vm230_vm0, %v1973_v26, 0.0  ;;  %v5516_v52 = vld [vmem:[%s3929_s18 + $0x98] sm:$0xff] }
 0x1fa   : > { %v5493_v5 = vadd.f32 %v1531_v17, %v5276_v9  ;;  %v1530_v60 = vrot.slane %v1452_v19, 2  ;;  %2014 = vadd.xlane.f32.xlu1 %v2013_v27  ;;  %v5504_v9 = vld [vmem:[%s3929_s18 + $0x80] sm:$0xff] }
 0x1fb   : > { %v1461_v40 = vpop.xlane.xlu1 %1460  ;;  %v1972_v4 = vmul.f32 %v5504_v9, %v7095_v48 }
 0x1fc   : > { %v1532_v29 = vsel %vm695_vm2, %v1530_v60, %v1531_v17  ;;  %2011 = vadd.xlane.f32.xlu0 %v2010_v14  ;;  %v1534_v55 = vrot.slane %v1461_v40, 2  ;;  %v1975_v17 = vmul.f32 %v5516_v52, %v7095_v48 }
 0x1fd   : > { %v1458_v30 = vpop.xlane.xlu0 %1457  ;;  %v5509_v58 = vadd.f32 %v1532_v29, %v5283_v39  ;;  %v2022_v50 = vsel %vm230_vm0, %v1972_v4, 0.0 }
 0x1fe   : > { %v5512_v13 = vadd.f32 %v1534_v55, %v5289_v42  ;;  %v1533_v15 = vrot.slane %v1458_v30, 2  ;;  %2020 = vadd.xlane.f32.xlu1 %v2019_v2  ;;  %v5523_v42 = vld [vmem:[%s3929_s18 + $0x90] sm:$0xff]  ;;  %v5535_v30 = vld [vmem:[%s3929_s18 + $0xa8] sm:$0xff] }
 0x1ff   : > { %v1467_v27 = vpop.xlane.xlu1 %1466  ;;  %7096 = vst [vmem:[#allocation3_spill] sm:$0xff] %v5523_v42  ;;  %v1974_v60 = vmul.f32 %v5523_v42, %v7095_v48  ;;  %7097 = vst [vmem:[#allocation19_spill] sm:$0xff] %v5535_v30 }
 0x200   : > { %v1535_v19 = vsel %vm695_vm2, %v1533_v15, %v1534_v55  ;;  %2017 = vadd.xlane.f32.xlu0 %v2016_v35  ;;  %v1537_v14 = vrot.slane %v1467_v27, 2  ;;  %v2031_v55 = vsel %vm230_vm0, %v1975_v17, 0.0  ;;  %v1977_v35 = vmul.f32 %v5535_v30, %v7095_v48 }
 0x201   : > { %v1464_v39 = vpop.xlane.xlu0 %1463  ;;  %v5528_v40 = vadd.f32 %v1535_v19, %v5296_v21  ;;  %v2028_v27 = vsel %vm230_vm0, %v1974_v60, 0.0 }
 0x202   : > { %v5531_v2 = vadd.f32 %v1537_v14, %v5302_v44  ;;  %v1536_v26 = vrot.slane %v1464_v39, 2  ;;  %2026 = vadd.xlane.f32.xlu1 %v2025_v16  ;;  %v5542_v44 = vld [vmem:[%s3929_s18 + $0xa0] sm:$0xff] }
 0x203   : > { %v1473_v29 = vpop.xlane.xlu1 %1472  ;;  %7098 = vst [vmem:[#allocation5_spill] sm:$0xff] %v5542_v44  ;;  %v1976_v16 = vmul.f32 %v5542_v44, %v7095_v48 }
 0x204   : > { %v1538_v4 = vsel %vm695_vm2, %v1536_v26, %v1537_v14  ;;  %2023 = vadd.xlane.f32.xlu0 %v2022_v50  ;;  %v1540_v15 = vrot.slane %v1473_v29, 2  ;;  %v2037_v50 = vsel %vm230_vm0, %v1977_v35, 0.0  ;;  %v5554_v26 = vld [vmem:[%s3929_s18 + $0xb8] sm:$0xff] }
 0x205   : > { %v1470_v21 = vpop.xlane.xlu0 %1469  ;;  %v5547_v17 = vadd.f32 %v1538_v4, %v5309_v10  ;;  %7100 = vst [vmem:[#allocation14_spill] sm:$0xff] %v5554_v26  ;;  %v1979_v60 = vmul.f32 %v5554_v26, %v7095_v48  ;;  %v2034_v4 = vsel %vm230_vm0, %v1976_v16, 0.0 }
 0x206   : > { %v5550_v19 = vadd.f32 %v1540_v15, %v5315_v7  ;;  %v1539_v39 = vrot.slane %v1470_v21, 2  ;;  %2032 = vadd.xlane.f32.xlu1 %v2031_v55  ;;  %v5561_v7 = vld [vmem:[%s3929_s18 + $0xb0] sm:$0xff] }
 0x207   : > { %v1479_v14 = vpop.xlane.xlu1 %1478  ;;  %7101 = vst [vmem:[#allocation4_spill] sm:$0xff] %v5561_v7  ;;  %v1978_v55 = vmul.f32 %v5561_v7, %v7095_v48 }
 0x208   : > { %7099 = vst [vmem:[#allocation15_spill] sm:$0xff] %v5550_v19  ;;  %v1541_v29 = vsel %vm695_vm2, %v1539_v39, %v1540_v15  ;;  %2029 = vadd.xlane.f32.xlu0 %v2028_v27  ;;  %v1543_v44 = vrot.slane %v1479_v14, 2  ;;  %v2043_v27 = vsel %vm230_vm0, %v1979_v60, 0.0  ;;  %v5573_v39 = vld [vmem:[%s3929_s18 + $0xc8] sm:$0xff] }
 0x209   : > { %v1476_v10 = vpop.xlane.xlu0 %1475  ;;  %v5566_v35 = vadd.f32 %v1541_v29, %v5322_v49  ;;  %7102 = vst [vmem:[#allocation6_spill] sm:$0xff] %v5573_v39  ;;  %v1981_v16 = vmul.f32 %v5573_v39, %v7095_v48  ;;  %v2040_v49 = vsel %vm230_vm0, %v1978_v55, 0.0  ;;  %v5580_v29 = vld [vmem:[%s3929_s18 + $0xc0] sm:$0xff] }
 0x20a   : > { %v5569_v21 = vadd.f32 %v1543_v44, %v5328_v43  ;;  %v1542_v26 = vrot.slane %v1476_v10, 2  ;;  %2038 = vadd.xlane.f32.xlu1 %v2037_v50  ;;  %7103 = vst [vmem:[#allocation16_spill] sm:$0xff] %v5580_v29  ;;  %v1980_v43 = vmul.f32 %v5580_v29, %v7095_v48 }
 0x20b   : > { %v1632_v15 = vpop.xlane.xlu1 %1631 }
 0x20c   : > { %v1544_v14 = vsel %vm695_vm2, %v1542_v26, %v1543_v44  ;;  %2035 = vadd.xlane.f32.xlu0 %v2034_v4  ;;  %v1732_v7 = vrot.slane %v1632_v15, 3  ;;  %v2049_v44 = vsel %vm230_vm0, %v1981_v16, 0.0  ;;  %v1983_v26 = vmul.f32 %v5345_v41, %v7095_v48 }
 0x20d   : > { %v1629_v19 = vpop.xlane.xlu0 %1628  ;;  %v5585_v50 = vadd.f32 %v1544_v14, %v5335_v11  ;;  %v2046_v29 = vsel %vm230_vm0, %v1980_v43, 0.0  ;;  %v1982_v11 = vmul.f32 %v5355_v1, %v7095_v48 }
 0x20e   : > { %v1731_v60 = vrot.slane %v1629_v19, 3  ;;  %2044 = vadd.xlane.f32.xlu1 %v2043_v27  ;;  %v5588_v10 = vadd.f32 %v1732_v7, %v5341_v0  ;;  %v2055_v14 = vsel %vm230_vm0, %v1983_v26, 0.0 }
 0x20f   : > { %v1638_v39 = vpop.xlane.xlu1 %1637 }
 0x210   : > { %2041 = vadd.xlane.f32.xlu0 %v2040_v49  ;;  %v1735_v4 = vrot.slane %v1638_v39, 3  ;;  %v1733_v55 = vsel %vm921_vm3, %v1731_v60, %v1732_v7  ;;  %v1985_v7 = vmul.f32 %v7095_v48, %v5351_v31  ;;  %v2052_v60 = vsel %vm230_vm0, %v1982_v11, 0.0 }
 0x211   : > { %v1635_v15 = vpop.xlane.xlu0 %1634  ;;  %v5598_v19 = vadd.f32 %v1733_v55, %v5360_v38  ;;  %v1984_v38 = vmul.f32 %v7095_v48, %v5366_v3 }
 0x212   : > { %v1734_v0 = vrot.slane %v1635_v15, 3  ;;  %2050 = vadd.xlane.f32.xlu1 %v2049_v44  ;;  %v5601_v27 = vadd.f32 %v1735_v4, %v5363_v34  ;;  %v7104_v15 = vld [vmem:[#allocation8_spill] sm:$0xff] }
 0x213   : > { %v1644_v16 = vpop.xlane.xlu1 %1643  ;;  %v2058_v48 = vsel %vm230_vm0, %v1984_v38, 0.0 }
 0x214   : > { %2047 = vadd.xlane.f32.xlu0 %v2046_v29  ;;  %v1738_v39 = vrot.slane %v1644_v16, 3  ;;  %v1736_v49 = vsel %vm921_vm3, %v1734_v0, %v1735_v4  ;;  %v2061_v29 = vsel %vm230_vm0, %v1985_v7, 0.0  ;;  %v2186_v4 = vmul.f32 %v5383_v54, %v7104_v15 }
 0x215   : > { %v1641_v43 = vpop.xlane.xlu0 %1640  ;;  %v5611_v44 = vadd.f32 %v1736_v49, %v5376_v47  ;;  %v2185_v47 = vmul.f32 %v5390_v32, %v7104_v15 }
 0x216   : > { %v1737_v34 = vrot.slane %v1641_v43, 3  ;;  %2056 = vadd.xlane.f32.xlu1 %v2055_v14  ;;  %v5614_v26 = vadd.f32 %v1738_v39, %v5379_v22  ;;  %v2214_v43 = vsel %vm230_vm0, %v2186_v4, 0.0 }
 0x217   : > { %v1650_v55 = vpop.xlane.xlu1 %1649 }
 0x218   : > { %2053 = vadd.xlane.f32.xlu0 %v2052_v60  ;;  %v1741_v0 = vrot.slane %v1650_v55, 3  ;;  %v1739_v11 = vsel %vm921_vm3, %v1737_v34, %v1738_v39  ;;  %v2188_v39 = vmul.f32 %v5402_v53, %v7104_v15  ;;  %v2211_v55 = vsel %vm230_vm0, %v2185_v47, 0.0 }
 0x219   : > { %v1647_v16 = vpop.xlane.xlu0 %1646  ;;  %v5624_v14 = vadd.f32 %v1739_v11, %v5395_v36  ;;  %v2187_v36 = vmul.f32 %v5409_v12, %v7104_v15 }
 0x21a   : > { %v1740_v22 = vrot.slane %v1647_v16, 3  ;;  %2062 = vadd.xlane.f32.xlu1 %v2061_v29  ;;  %v5627_v7 = vadd.f32 %v1741_v0, %v5398_v46  ;;  %v2220_v16 = vsel %vm230_vm0, %v2188_v39, 0.0 }
 0x21b   : > { %v1656_v49 = vpop.xlane.xlu1 %1655 }
 0x21c   : > { %2059 = vadd.xlane.f32.xlu0 %v2058_v48  ;;  %v1744_v60 = vrot.slane %v1656_v49, 3  ;;  %v1742_v38 = vsel %vm921_vm3, %v1740_v22, %v1741_v0  ;;  %v2190_v0 = vmul.f32 %v5421_v25, %v7104_v15  ;;  %v2217_v49 = vsel %vm230_vm0, %v2187_v36, 0.0 }
 0x21d   : > { %v1653_v34 = vpop.xlane.xlu0 %1652  ;;  %v5637_v29 = vadd.f32 %v1742_v38, %v5414_v56  ;;  %v2189_v56 = vmul.f32 %v5428_v8, %v7104_v15 }
 0x21e   : > { %v1743_v46 = vrot.slane %v1653_v34, 3  ;;  %2215 = vadd.xlane.f32.xlu1 %v2214_v43  ;;  %v5640_v4 = vadd.f32 %v1744_v60, %v5417_v23  ;;  %v2226_v34 = vsel %vm230_vm0, %v2190_v0, 0.0 }
 0x21f   : > { %v1662_v11 = vpop.xlane.xlu1 %1661 }
 0x220   : > { %2212 = vadd.xlane.f32.xlu0 %v2211_v55  ;;  %v1747_v48 = vrot.slane %v1662_v11, 3  ;;  %v1745_v47 = vsel %vm921_vm3, %v1743_v46, %v1744_v60  ;;  %v2192_v60 = vmul.f32 %v5440_v59, %v7104_v15  ;;  %v2223_v11 = vsel %vm230_vm0, %v2189_v56, 0.0 }
 0x221   : > { %v1659_v22 = vpop.xlane.xlu0 %1658  ;;  %v5650_v43 = vadd.f32 %v1745_v47, %v5433_v51  ;;  %v2191_v51 = vmul.f32 %v5447_v63, %v7104_v15 }
 0x222   : > { %v1746_v23 = vrot.slane %v1659_v22, 3  ;;  %2221 = vadd.xlane.f32.xlu1 %v2220_v16  ;;  %v5653_v39 = vadd.f32 %v1747_v48, %v5436_v62  ;;  %v2232_v22 = vsel %vm230_vm0, %v2192_v60, 0.0 }
 0x223   : > { %v1668_v38 = vpop.xlane.xlu1 %1667 }
 0x224   : > { %2218 = vadd.xlane.f32.xlu0 %v2217_v49  ;;  %v1750_v55 = vrot.slane %v1668_v38, 3  ;;  %v1748_v36 = vsel %vm921_vm3, %v1746_v23, %v1747_v48  ;;  %v2194_v48 = vmul.f32 %v5459_v6, %v7104_v15  ;;  %v2229_v38 = vsel %vm230_vm0, %v2191_v51, 0.0 }
 0x225   : > { %v1665_v46 = vpop.xlane.xlu0 %1664  ;;  %v5663_v16 = vadd.f32 %v1748_v36, %v5452_v37  ;;  %v2193_v37 = vmul.f32 %v5466_v33, %v7104_v15 }
 0x226   : > { %v1749_v62 = vrot.slane %v1665_v46, 3  ;;  %2227 = vadd.xlane.f32.xlu1 %v2226_v34  ;;  %v5666_v0 = vadd.f32 %v1750_v55, %v5455_v20  ;;  %v2238_v46 = vsel %vm230_vm0, %v2194_v48, 0.0 }
 0x227   : > { %v1674_v47 = vpop.xlane.xlu1 %1673 }
 0x228   : > { %2224 = vadd.xlane.f32.xlu0 %v2223_v11  ;;  %v1753_v49 = vrot.slane %v1674_v47, 3  ;;  %v1751_v56 = vsel %vm921_vm3, %v1749_v62, %v1750_v55  ;;  %v2196_v55 = vmul.f32 %v5478_v18, %v7104_v15  ;;  %v2235_v47 = vsel %vm230_vm0, %v2193_v37, 0.0 }
 0x229   : > { %v1671_v23 = vpop.xlane.xlu0 %1670  ;;  %v5676_v34 = vadd.f32 %v1751_v56, %v5471_v57  ;;  %v2195_v57 = vmul.f32 %v5485_v24, %v7104_v15 }
 0x22a   : > { %v1752_v20 = vrot.slane %v1671_v23, 3  ;;  %2233 = vadd.xlane.f32.xlu1 %v2232_v22  ;;  %v5679_v60 = vadd.f32 %v1753_v49, %v5474_v61  ;;  %v2244_v23 = vsel %vm230_vm0, %v2196_v55, 0.0 }
 0x22b   : > { %v1680_v36 = vpop.xlane.xlu1 %1679 }
 0x22c   : > { %2230 = vadd.xlane.f32.xlu0 %v2229_v38  ;;  %v1756_v11 = vrot.slane %v1680_v36, 3  ;;  %v1754_v51 = vsel %vm921_vm3, %v1752_v20, %v1753_v49  ;;  %v2198_v49 = vmul.f32 %v5497_v45, %v7104_v15  ;;  %v2241_v36 = vsel %vm230_vm0, %v2195_v57, 0.0 }
 0x22d   : > { %v1677_v62 = vpop.xlane.xlu0 %1676  ;;  %v5689_v22 = vadd.f32 %v1754_v51, %v5490_v28  ;;  %v2197_v28 = vmul.f32 %v5504_v9, %v7104_v15 }
 0x22e   : > { %v1755_v61 = vrot.slane %v1677_v62, 3  ;;  %2239 = vadd.xlane.f32.xlu1 %v2238_v46  ;;  %v5692_v48 = vadd.f32 %v1756_v11, %v5493_v5  ;;  %v2250_v62 = vsel %vm230_vm0, %v2198_v49, 0.0 }
 0x22f   : > { %v1686_v56 = vpop.xlane.xlu1 %1685 }
 0x230   : > { %2236 = vadd.xlane.f32.xlu0 %v2235_v47  ;;  %v1759_v38 = vrot.slane %v1686_v56, 3  ;;  %v1757_v37 = vsel %vm921_vm3, %v1755_v61, %v1756_v11  ;;  %v2200_v11 = vmul.f32 %v5516_v52, %v7104_v15  ;;  %v2247_v56 = vsel %vm230_vm0, %v2197_v28, 0.0 }
 0x231   : > { %v1683_v20 = vpop.xlane.xlu0 %1682  ;;  %v5702_v46 = vadd.f32 %v1757_v37, %v5509_v58  ;;  %v2199_v58 = vmul.f32 %v5523_v42, %v7104_v15 }
 0x232   : > { %v1758_v5 = vrot.slane %v1683_v20, 3  ;;  %2245 = vadd.xlane.f32.xlu1 %v2244_v23  ;;  %v5705_v55 = vadd.f32 %v1759_v38, %v5512_v13  ;;  %v2256_v20 = vsel %vm230_vm0, %v2200_v11, 0.0 }
 0x233   : > { %v1692_v51 = vpop.xlane.xlu1 %1691 }
 0x234   : > { %2242 = vadd.xlane.f32.xlu0 %v2241_v36  ;;  %v1762_v47 = vrot.slane %v1692_v51, 3  ;;  %v1760_v57 = vsel %vm921_vm3, %v1758_v5, %v1759_v38  ;;  %v2202_v38 = vmul.f32 %v5535_v30, %v7104_v15  ;;  %v2253_v51 = vsel %vm230_vm0, %v2199_v58, 0.0 }
 0x235   : > { %v1689_v61 = vpop.xlane.xlu0 %1688  ;;  %v5715_v23 = vadd.f32 %v1760_v57, %v5528_v40  ;;  %v7105_v40 = vld [vmem:[#allocation5_spill] sm:$0xff] }
 0x236   : > { %v1761_v13 = vrot.slane %v1689_v61, 3  ;;  %2251 = vadd.xlane.f32.xlu1 %v2250_v62  ;;  %v5718_v49 = vadd.f32 %v1762_v47, %v5531_v2  ;;  %v2201_v57 = vmul.f32 %v7105_v40, %v7104_v15  ;;  %v7106_v61 = vld [vmem:[#allocation15_spill] sm:$0xff] }
 0x237   : > { %v1698_v37 = vpop.xlane.xlu1 %1697 }
 0x238   : > { %2248 = vadd.xlane.f32.xlu0 %v2247_v56  ;;  %v1765_v36 = vrot.slane %v1698_v37, 3  ;;  %v1763_v28 = vsel %vm921_vm3, %v1761_v13, %v1762_v47  ;;  %v2262_v56 = vsel %vm230_vm0, %v2202_v38, 0.0  ;;  %v7107_v37 = vld [vmem:[#allocation14_spill] sm:$0xff]  ;;  %v2259_v40 = vsel %vm230_vm0, %v2201_v57, 0.0 }
 0x239   : > { %v1695_v5 = vpop.xlane.xlu0 %1694  ;;  %v5728_v62 = vadd.f32 %v1763_v28, %v5547_v17  ;;  %v2204_v47 = vmul.f32 %v7107_v37, %v7104_v15  ;;  %v7108_v17 = vld [vmem:[#allocation4_spill] sm:$0xff] }
 0x23a   : > { %v1764_v2 = vrot.slane %v1695_v5, 3  ;;  %2257 = vadd.xlane.f32.xlu1 %v2256_v20  ;;  %v5731_v11 = vadd.f32 %v1765_v36, %v7106_v61  ;;  %v2203_v28 = vmul.f32 %v7108_v17, %v7104_v15 }
 0x23b   : > { %v1704_v42 = vpop.xlane.xlu1 %1703 }
 0x23c   : > { %2254 = vadd.xlane.f32.xlu0 %v2253_v51  ;;  %v1768_v13 = vrot.slane %v1704_v42, 3  ;;  %v1766_v58 = vsel %vm921_vm3, %v1764_v2, %v1765_v36  ;;  %v2268_v51 = vsel %vm230_vm0, %v2204_v47, 0.0  ;;  %v7109_v42 = vld [vmem:[#allocation6_spill] sm:$0xff] }
 0x23d   : > { %v1701_v30 = vpop.xlane.xlu0 %1700  ;;  %v5741_v20 = vadd.f32 %v1766_v58, %v5566_v35  ;;  %v2206_v36 = vmul.f32 %v7109_v42, %v7104_v15  ;;  %v2265_v35 = vsel %vm230_vm0, %v2203_v28, 0.0 }
 0x23e   : > { %v1767_v5 = vrot.slane %v1701_v30, 3  ;;  %2263 = vadd.xlane.f32.xlu1 %v2262_v56  ;;  %v5744_v38 = vadd.f32 %v1768_v13, %v5569_v21  ;;  %v7110_v30 = vld [vmem:[#allocation16_spill] sm:$0xff] }
 0x23f   : > { %v1857_v61 = vpop.xlane.xlu1 %1856  ;;  %v2205_v56 = vmul.f32 %v7110_v30, %v7104_v15 }
 0x240   : > { %2260 = vadd.xlane.f32.xlu0 %v2259_v40  ;;  %v5750_v57 = vadd.f32 %v1857_v61, %v5588_v10  ;;  %v1769_v2 = vsel %vm921_vm3, %v1767_v5, %v1768_v13  ;;  %v2274_v40 = vsel %vm230_vm0, %v2206_v36, 0.0  ;;  %v2208_v10 = vmul.f32 %v5345_v41, %v7104_v15 }
 0x241   : > { %v1854_v17 = vpop.xlane.xlu0 %1853  ;;  %v5757_v21 = vadd.f32 %v1769_v2, %v5585_v50  ;;  %v2271_v5 = vsel %vm230_vm0, %v2205_v56, 0.0  ;;  %v2207_v50 = vmul.f32 %v5355_v1, %v7104_v15 }
 0x242   : > { %v5760_v47 = vadd.f32 %v1854_v17, %v5598_v19  ;;  %2269 = vadd.xlane.f32.xlu1 %v2268_v51  ;;  %v2280_v61 = vsel %vm230_vm0, %v2208_v10, 0.0  ;;  %v2210_v51 = vmul.f32 %v7104_v15, %v5351_v31 }
 0x243   : > { %v1863_v58 = vpop.xlane.xlu1 %1862  ;;  %v2277_v2 = vsel %vm230_vm0, %v2207_v50, 0.0 }
 0x244   : > { %2266 = vadd.xlane.f32.xlu0 %v2265_v35  ;;  %v5766_v13 = vadd.f32 %v1863_v58, %v5601_v27  ;;  %v2209_v35 = vmul.f32 %v7104_v15, %v5366_v3  ;;  %v2286_v58 = vsel %vm230_vm0, %v2210_v51, 0.0 }
 0x245   : > { %v1860_v28 = vpop.xlane.xlu0 %1859 }
 0x246   : > { %v5772_v19 = vadd.f32 %v1860_v28, %v5611_v44  ;;  %2275 = vadd.xlane.f32.xlu1 %v2274_v40  ;;  %v7111_v40 = vld [vmem:[#allocation9_spill] sm:$0xff] }
 0x247   : > { %v1869_v17 = vpop.xlane.xlu1 %1868  ;;  %v2411_v10 = vmul.f32 %v5383_v54, %v7111_v40  ;;  %v2410_v15 = vmul.f32 %v5390_v32, %v7111_v40  ;;  %v2413_v54 = vmul.f32 %v5402_v53, %v7111_v40  ;;  %v2412_v32 = vmul.f32 %v5409_v12, %v7111_v40 }
 0x248   : > { %2272 = vadd.xlane.f32.xlu0 %v2271_v5  ;;  %v5778_v27 = vadd.f32 %v1869_v17, %v5614_v26  ;;  %v2283_v5 = vsel %vm230_vm0, %v2209_v35, 0.0  ;;  %v2415_v35 = vmul.f32 %v5421_v25, %v7111_v40 }
 0x249   : > { %v1866_v36 = vpop.xlane.xlu0 %1865  ;;  %v2439_v17 = vsel %vm230_vm0, %v2411_v10, 0.0  ;;  %v2436_v51 = vsel %vm230_vm0, %v2410_v15, 0.0  ;;  %v2414_v10 = vmul.f32 %v5428_v8, %v7111_v40  ;;  %v2417_v15 = vmul.f32 %v5440_v59, %v7111_v40 }
 0x24a   : > { %v5784_v44 = vadd.f32 %v1866_v36, %v5624_v14  ;;  %2281 = vadd.xlane.f32.xlu1 %v2280_v61 }
 0x24b   : > { %v1875_v56 = vpop.xlane.xlu1 %1874 }
 0x24c   : > { %2278 = vadd.xlane.f32.xlu0 %v2277_v2  ;;  %v5790_v26 = vadd.f32 %v1875_v56, %v5627_v7  ;;  %v2445_v2 = vsel %vm230_vm0, %v2413_v54, 0.0  ;;  %v2416_v54 = vmul.f32 %v5447_v63, %v7111_v40 }
 0x24d   : > { %v1872_v28 = vpop.xlane.xlu0 %1871 }
 0x24e   : > { %v5796_v14 = vadd.f32 %v1872_v28, %v5637_v29  ;;  %2287 = vadd.xlane.f32.xlu1 %v2286_v58  ;;  %v2442_v58 = vsel %vm230_vm0, %v2412_v32, 0.0  ;;  %v2419_v32 = vmul.f32 %v5459_v6, %v7111_v40 }
 0x24f   : > { %v1881_v50 = vpop.xlane.xlu1 %1880 }
 0x250   : > { %2284 = vadd.xlane.f32.xlu0 %v2283_v5  ;;  %v5802_v7 = vadd.f32 %v1881_v50, %v5640_v4  ;;  %v2451_v5 = vsel %vm230_vm0, %v2415_v35, 0.0  ;;  %v2418_v35 = vmul.f32 %v5466_v33, %v7111_v40 }
 0x251   : > { %v1878_v61 = vpop.xlane.xlu0 %1877 }
 0x252   : > { %v5808_v29 = vadd.f32 %v1878_v61, %v5650_v43  ;;  %2440 = vadd.xlane.f32.xlu1 %v2439_v17  ;;  %v2448_v17 = vsel %vm230_vm0, %v2414_v10, 0.0  ;;  %v2421_v10 = vmul.f32 %v5478_v18, %v7111_v40 }
 0x253   : > { %v1887_v36 = vpop.xlane.xlu1 %1886 }
 0x254   : > { %2437 = vadd.xlane.f32.xlu0 %v2436_v51  ;;  %v5814_v4 = vadd.f32 %v1887_v36, %v5653_v39  ;;  %v2457_v51 = vsel %vm230_vm0, %v2417_v15, 0.0  ;;  %v2420_v15 = vmul.f32 %v5485_v24, %v7111_v40 }
 0x255   : > { %v1884_v56 = vpop.xlane.xlu0 %1883 }
 0x256   : > { %v5820_v43 = vadd.f32 %v1884_v56, %v5663_v16  ;;  %2446 = vadd.xlane.f32.xlu1 %v2445_v2  ;;  %v2454_v2 = vsel %vm230_vm0, %v2416_v54, 0.0  ;;  %v2423_v54 = vmul.f32 %v5497_v45, %v7111_v40 }
 0x257   : > { %v1893_v28 = vpop.xlane.xlu1 %1892 }
 0x258   : > { %2443 = vadd.xlane.f32.xlu0 %v2442_v58  ;;  %v5826_v39 = vadd.f32 %v1893_v28, %v5666_v0  ;;  %v2463_v58 = vsel %vm230_vm0, %v2419_v32, 0.0  ;;  %v2422_v32 = vmul.f32 %v5504_v9, %v7111_v40 }
 0x259   : > { %v1890_v50 = vpop.xlane.xlu0 %1889 }
 0x25a   : > { %v5832_v16 = vadd.f32 %v1890_v50, %v5676_v34  ;;  %2452 = vadd.xlane.f32.xlu1 %v2451_v5  ;;  %v2460_v5 = vsel %vm230_vm0, %v2418_v35, 0.0  ;;  %v2425_v35 = vmul.f32 %v5516_v52, %v7111_v40 }
 0x25b   : > { %v1899_v61 = vpop.xlane.xlu1 %1898 }
 0x25c   : > { %2449 = vadd.xlane.f32.xlu0 %v2448_v17  ;;  %v5838_v0 = vadd.f32 %v1899_v61, %v5679_v60  ;;  %v2469_v17 = vsel %vm230_vm0, %v2421_v10, 0.0  ;;  %v7112_v10 = vld [vmem:[#allocation3_spill] sm:$0xff] }
 0x25d   : > { %v1896_v36 = vpop.xlane.xlu0 %1895 }
 0x25e   : > { %v5844_v34 = vadd.f32 %v1896_v36, %v5689_v22  ;;  %2458 = vadd.xlane.f32.xlu1 %v2457_v51  ;;  %v2466_v51 = vsel %vm230_vm0, %v2420_v15, 0.0  ;;  %v2481_v15 = vsel %vm230_vm0, %v2425_v35, 0.0  ;;  %v2429_v35 = vmul.f32 %v7107_v37, %v7111_v40 }
 0x25f   : > { %v1905_v56 = vpop.xlane.xlu1 %1904 }
 0x260   : > { %2455 = vadd.xlane.f32.xlu0 %v2454_v2  ;;  %v5850_v60 = vadd.f32 %v1905_v56, %v5692_v48  ;;  %v2475_v2 = vsel %vm230_vm0, %v2423_v54, 0.0 }
 0x261   : > { %v1902_v28 = vpop.xlane.xlu0 %1901 }
 0x262   : > { %v5856_v22 = vadd.f32 %v1902_v28, %v5702_v46  ;;  %2464 = vadd.xlane.f32.xlu1 %v2463_v58  ;;  %v2472_v58 = vsel %vm230_vm0, %v2422_v32, 0.0  ;;  %v2424_v28 = vmul.f32 %v7112_v10, %v7111_v40 }
 0x263   : > { %v1911_v50 = vpop.xlane.xlu1 %1910 }
 0x264   : > { %2461 = vadd.xlane.f32.xlu0 %v2460_v5  ;;  %v5862_v48 = vadd.f32 %v1911_v50, %v5705_v55  ;;  %v7113_v50 = vld [vmem:[#allocation19_spill] sm:$0xff] }
 0x265   : > { %v1908_v61 = vpop.xlane.xlu0 %1907 }
 0x266   : > { %v5868_v46 = vadd.f32 %v1908_v61, %v5715_v23  ;;  %2470 = vadd.xlane.f32.xlu1 %v2469_v17  ;;  %v2427_v17 = vmul.f32 %v7113_v50, %v7111_v40  ;;  %v2478_v61 = vsel %vm230_vm0, %v2424_v28, 0.0  ;;  %v7116_v28 = vld [vmem:[#allocation4_spill] sm:$0xff] }
 0x267   : > { %v1917_v36 = vpop.xlane.xlu1 %1916 }
 0x268   : > { %2467 = vadd.xlane.f32.xlu0 %v2466_v51  ;;  %v5874_v55 = vadd.f32 %v1917_v36, %v5718_v49  ;;  %v7114_v51 = vld [vmem:[#allocation5_spill] sm:$0xff] }
 0x269   : > { %v1914_v56 = vpop.xlane.xlu0 %1913  ;;  %v2426_v32 = vmul.f32 %v7114_v51, %v7111_v40 }
 0x26a   : > { %v5880_v23 = vadd.f32 %v1914_v56, %v5728_v62  ;;  %2476 = vadd.xlane.f32.xlu1 %v2475_v2  ;;  %v2487_v2 = vsel %vm230_vm0, %v2427_v17, 0.0  ;;  %v2493_v17 = vsel %vm230_vm0, %v2429_v35, 0.0  ;;  %v2433_v35 = vmul.f32 %v5345_v41, %v7111_v40 }
 0x26b   : > { %v1923_v5 = vpop.xlane.xlu1 %1922 }
 0x26c   : > { %2473 = vadd.xlane.f32.xlu0 %v2472_v58  ;;  %v5886_v49 = vadd.f32 %v1923_v5, %v5731_v11  ;;  %v2484_v58 = vsel %vm230_vm0, %v2426_v32, 0.0  ;;  %v2428_v5 = vmul.f32 %v7116_v28, %v7111_v40  ;;  %v2430_v32 = vmul.f32 %v7110_v30, %v7111_v40 }
 0x26d   : > { %v1920_v54 = vpop.xlane.xlu0 %1919  ;;  %v2505_v41 = vsel %vm230_vm0, %v2433_v35, 0.0  ;;  %v7118_v35 = vld [vmem:[#allocation10_spill] sm:$0xff] }
 0x26e   : > { %v5892_v62 = vadd.f32 %v1920_v54, %v5741_v20  ;;  %2482 = vadd.xlane.f32.xlu1 %v2481_v15  ;;  %v2431_v54 = vmul.f32 %v7109_v42, %v7111_v40  ;;  %v2496_v30 = vsel %vm230_vm0, %v2430_v32, 0.0 }
 0x26f   : > { %v1929_v36 = vpop.xlane.xlu1 %1928 }
 0x270   : > { %2479 = vadd.xlane.f32.xlu0 %v2478_v61  ;;  %v5898_v11 = vadd.f32 %v1929_v36, %v5744_v38  ;;  %v2490_v36 = vsel %vm230_vm0, %v2428_v5, 0.0 }
 0x271   : > { %v1926_v56 = vpop.xlane.xlu0 %1925 }
 0x272   : > { %7115 = vst [vmem:[#allocation17_spill] sm:$0xff] %v5898_v11  ;;  %v5904_v20 = vadd.f32 %v1926_v56, %v5757_v21  ;;  %2488 = vadd.xlane.f32.xlu1 %v2487_v2  ;;  %v2499_v56 = vsel %vm230_vm0, %v2431_v54, 0.0 }
 0x273   : > { %v1991_v15 = vpop.xlane.xlu1 %1990 }
 0x274   : > { %7117 = vst [vmem:[#allocation18_spill] sm:$0xff] %v5904_v20  ;;  %2485 = vadd.xlane.f32.xlu0 %v2484_v58  ;;  %v2091_v61 = vrot.slane %v1991_v15, 1 }
 0x275   : > { %v1988_v38 = vpop.xlane.xlu0 %1987 }
 0x276   : > { %v5913_v11 = vadd.f32 %v2091_v61, %v5750_v57  ;;  %v2090_v21 = vrot.slane %v1988_v38, 1  ;;  %2494 = vadd.xlane.f32.xlu1 %v2493_v17  ;;  %v2432_v57 = vmul.f32 %v5355_v1, %v7111_v40 }
 0x277   : > { %v1997_v2 = vpop.xlane.xlu1 %1996 }
 0x278   : > { %v2092_v58 = vsel %vm469_vm1, %v2090_v21, %v2091_v61  ;;  %2491 = vadd.xlane.f32.xlu0 %v2490_v36  ;;  %v2094_v15 = vrot.slane %v1997_v2, 1  ;;  %v2435_v61 = vmul.f32 %v7111_v40, %v5351_v31  ;;  %v2502_v1 = vsel %vm230_vm0, %v2432_v57, 0.0 }
 0x279   : > { %v5920_v5 = vadd.f32 %v2092_v58, %v5760_v47  ;;  %v1994_v20 = vpop.xlane.xlu0 %1993 }
 0x27a   : > { %v5926_v17 = vadd.f32 %v2094_v15, %v5766_v13  ;;  %v2093_v54 = vrot.slane %v1994_v20, 1  ;;  %2500 = vadd.xlane.f32.xlu1 %v2499_v56  ;;  %v2434_v13 = vmul.f32 %v7111_v40, %v5366_v3  ;;  %v2511_v31 = vsel %vm230_vm0, %v2435_v61, 0.0 }
 0x27b   : > { %v2003_v38 = vpop.xlane.xlu1 %2002 }
 0x27c   : > { %v2095_v47 = vsel %vm469_vm1, %v2093_v54, %v2094_v15  ;;  %2497 = vadd.xlane.f32.xlu0 %v2496_v30  ;;  %v2097_v36 = vrot.slane %v2003_v38, 1  ;;  %v2636_v30 = vmul.f32 %v5402_v53, %v7118_v35  ;;  %v2508_v3 = vsel %vm230_vm0, %v2434_v13, 0.0 }
 0x27d   : > { %v5933_v32 = vadd.f32 %v2095_v47, %v5772_v19  ;;  %v2000_v21 = vpop.xlane.xlu0 %1999 }
 0x27e   : > { %v5939_v20 = vadd.f32 %v2097_v36, %v5778_v27  ;;  %v2096_v2 = vrot.slane %v2000_v21, 1  ;;  %2506 = vadd.xlane.f32.xlu1 %v2505_v41  ;;  %v2635_v27 = vmul.f32 %v5409_v12, %v7118_v35  ;;  %v2664_v53 = vsel %vm230_vm0, %v2636_v30, 0.0 }
 0x27f   : > { %v2009_v56 = vpop.xlane.xlu1 %2008  ;;  %v2638_v41 = vmul.f32 %v5421_v25, %v7118_v35 }
 0x280   : > { %v2098_v19 = vsel %vm469_vm1, %v2096_v2, %v2097_v36  ;;  %2503 = vadd.xlane.f32.xlu0 %v2502_v1  ;;  %v2100_v58 = vrot.slane %v2009_v56, 1  ;;  %v2661_v12 = vsel %vm230_vm0, %v2635_v27, 0.0  ;;  %v2640_v2 = vmul.f32 %v5440_v59, %v7118_v35 }
 0x281   : > { %v5946_v15 = vadd.f32 %v2098_v19, %v5784_v44  ;;  %v2006_v57 = vpop.xlane.xlu0 %2005  ;;  %v2670_v25 = vsel %vm230_vm0, %v2638_v41, 0.0 }
 0x282   : > { %v5952_v40 = vadd.f32 %v2100_v58, %v5790_v26  ;;  %v2099_v54 = vrot.slane %v2006_v57, 1  ;;  %2512 = vadd.xlane.f32.xlu1 %v2511_v31  ;;  %v2637_v26 = vmul.f32 %v5428_v8, %v7118_v35  ;;  %v2676_v59 = vsel %vm230_vm0, %v2640_v2, 0.0 }
 0x283   : > { %v2015_v38 = vpop.xlane.xlu1 %2014  ;;  %v2646_v2 = vmul.f32 %v5497_v45, %v7118_v35 }
 0x284   : > { %v2101_v44 = vsel %vm469_vm1, %v2099_v54, %v2100_v58  ;;  %2509 = vadd.xlane.f32.xlu0 %v2508_v3  ;;  %v2103_v61 = vrot.slane %v2015_v38, 1  ;;  %v2667_v8 = vsel %vm230_vm0, %v2637_v26, 0.0  ;;  %v2642_v3 = vmul.f32 %v5459_v6, %v7118_v35 }
 0x285   : > { %v5959_v47 = vadd.f32 %v2101_v44, %v5796_v14  ;;  %v2012_v36 = vpop.xlane.xlu0 %2011  ;;  %v2694_v45 = vsel %vm230_vm0, %v2646_v2, 0.0 }
 0x286   : > { %v5965_v21 = vadd.f32 %v2103_v61, %v5802_v7  ;;  %v2102_v1 = vrot.slane %v2012_v36, 1  ;;  %2665 = vadd.xlane.f32.xlu1 %v2664_v53  ;;  %v2639_v7 = vmul.f32 %v5447_v63, %v7118_v35  ;;  %v2682_v6 = vsel %vm230_vm0, %v2642_v3, 0.0 }
 0x287   : > { %v2021_v13 = vpop.xlane.xlu1 %2020 }
 0x288   : > { %v2104_v14 = vsel %vm469_vm1, %v2102_v1, %v2103_v61  ;;  %2662 = vadd.xlane.f32.xlu0 %v2661_v12  ;;  %v2106_v56 = vrot.slane %v2021_v13, 1  ;;  %v2673_v63 = vsel %vm230_vm0, %v2639_v7, 0.0  ;;  %v2644_v61 = vmul.f32 %v5478_v18, %v7118_v35 }
 0x289   : > { %v5972_v31 = vadd.f32 %v2104_v14, %v5808_v29  ;;  %v2018_v30 = vpop.xlane.xlu0 %2017 }
 0x28a   : > { %v5978_v19 = vadd.f32 %v2106_v56, %v5814_v4  ;;  %v2105_v58 = vrot.slane %v2018_v30, 1  ;;  %2671 = vadd.xlane.f32.xlu1 %v2670_v25  ;;  %v2641_v4 = vmul.f32 %v5466_v33, %v7118_v35  ;;  %v2688_v18 = vsel %vm230_vm0, %v2644_v61, 0.0 }
 0x28b   : > { %v2027_v57 = vpop.xlane.xlu1 %2026 }
 0x28c   : > { %v2107_v29 = vsel %vm469_vm1, %v2105_v58, %v2106_v56  ;;  %2668 = vadd.xlane.f32.xlu0 %v2667_v8  ;;  %v2109_v27 = vrot.slane %v2027_v57, 1  ;;  %v2679_v33 = vsel %vm230_vm0, %v2641_v4, 0.0  ;;  %v2648_v57 = vmul.f32 %v5516_v52, %v7118_v35 }
 0x28d   : > { %v5985_v54 = vadd.f32 %v2107_v29, %v5820_v43  ;;  %v2024_v38 = vpop.xlane.xlu0 %2023  ;;  %v2650_v4 = vmul.f32 %v7113_v50, %v7118_v35 }
 0x28e   : > { %v5991_v53 = vadd.f32 %v2109_v27, %v5826_v39  ;;  %v2108_v41 = vrot.slane %v2024_v38, 1  ;;  %2677 = vadd.xlane.f32.xlu1 %v2676_v59  ;;  %v2643_v39 = vmul.f32 %v5485_v24, %v7118_v35  ;;  %v2700_v52 = vsel %vm230_vm0, %v2648_v57, 0.0 }
 0x28f   : > { %v2033_v44 = vpop.xlane.xlu1 %2032  ;;  %v2706_v50 = vsel %vm230_vm0, %v2650_v4, 0.0 }
 0x290   : > { %v2110_v43 = vsel %vm469_vm1, %v2108_v41, %v2109_v27  ;;  %2674 = vadd.xlane.f32.xlu0 %v2673_v63  ;;  %v2112_v36 = vrot.slane %v2033_v44, 1  ;;  %v2685_v24 = vsel %vm230_vm0, %v2643_v39, 0.0 }
 0x291   : > { %v5998_v12 = vadd.f32 %v2110_v43, %v5832_v16  ;;  %v2030_v26 = vpop.xlane.xlu0 %2029 }
 0x292   : > { %v6004_v1 = vadd.f32 %v2112_v36, %v5838_v0  ;;  %v2111_v13 = vrot.slane %v2030_v26, 1  ;;  %2683 = vadd.xlane.f32.xlu1 %v2682_v6  ;;  %v2645_v0 = vmul.f32 %v5504_v9, %v7118_v35  ;;  %v2652_v26 = vmul.f32 %v7107_v37, %v7118_v35 }
 0x293   : > { %v2039_v25 = vpop.xlane.xlu1 %2038 }
 0x294   : > { %v2113_v16 = vsel %vm469_vm1, %v2111_v13, %v2112_v36  ;;  %2680 = vadd.xlane.f32.xlu0 %v2679_v33  ;;  %v2115_v14 = vrot.slane %v2039_v25, 1  ;;  %v2691_v9 = vsel %vm230_vm0, %v2645_v0, 0.0  ;;  %v2712_v2 = vsel %vm230_vm0, %v2652_v26, 0.0  ;;  %v6098_v26 = vld [vmem:[%s3929_s18 + $0xf8] sm:$0xff] }
 0x295   : > { %v6011_v56 = vadd.f32 %v2113_v16, %v5844_v34  ;;  %v2036_v30 = vpop.xlane.xlu0 %2035  ;;  %v2654_v16 = vmul.f32 %v7109_v42, %v7118_v35 }
 0x296   : > { %v6017_v8 = vadd.f32 %v2115_v14, %v5850_v60  ;;  %v2114_v7 = vrot.slane %v2036_v30, 1  ;;  %2689 = vadd.xlane.f32.xlu1 %v2688_v18  ;;  %v2647_v60 = vmul.f32 %v7112_v10, %v7118_v35 }
 0x297   : > { %v2045_v58 = vpop.xlane.xlu1 %2044  ;;  %v2718_v57 = vsel %vm230_vm0, %v2654_v16, 0.0 }
 0x298   : > { %v2116_v34 = vsel %vm469_vm1, %v2114_v7, %v2115_v14  ;;  %2686 = vadd.xlane.f32.xlu0 %v2685_v24  ;;  %v2118_v59 = vrot.slane %v2045_v58, 1  ;;  %v2697_v10 = vsel %vm230_vm0, %v2647_v60, 0.0  ;;  %v7119_v24 = vld [vmem:[#allocation16_spill] sm:$0xff]  ;;  %v7120_v7 = vld [vmem:[#allocation17_spill] sm:$0xff] }
 0x299   : > { %v6024_v3 = vadd.f32 %v2116_v34, %v5856_v22  ;;  %v2042_v29 = vpop.xlane.xlu0 %2041  ;;  %v2653_v0 = vmul.f32 %v7119_v24, %v7118_v35  ;;  %v6073_v34 = vld [vmem:[%s3929_s18 + $0xd8] sm:$0xff] }
 0x29a   : > { %v6030_v27 = vadd.f32 %v2118_v59, %v5862_v48  ;;  %v2117_v38 = vrot.slane %v2042_v29, 1  ;;  %2695 = vadd.xlane.f32.xlu1 %v2694_v45  ;;  %v2649_v48 = vmul.f32 %v7114_v51, %v7118_v35 }
 0x29b   : > { %v2051_v63 = vpop.xlane.xlu1 %2050 }
 0x29c   : > { %v2119_v22 = vsel %vm469_vm1, %v2117_v38, %v2118_v59  ;;  %2692 = vadd.xlane.f32.xlu0 %v2691_v9  ;;  %v2121_v41 = vrot.slane %v2051_v63, 1  ;;  %v2703_v51 = vsel %vm230_vm0, %v2649_v48, 0.0  ;;  %v7121_v9 = vld [vmem:[#allocation18_spill] sm:$0xff]  ;;  %v2715_v63 = vsel %vm230_vm0, %v2653_v0, 0.0  ;;  %v6092_v48 = vld [vmem:[%s3929_s18 + $0xe8] sm:$0xff] }
 0x29d   : > { %v6037_v44 = vadd.f32 %v2119_v22, %v5868_v46  ;;  %v2048_v6 = vpop.xlane.xlu0 %2047 }
 0x29e   : > { %v6043_v61 = vadd.f32 %v2121_v41, %v5874_v55  ;;  %v2120_v43 = vrot.slane %v2048_v6, 1  ;;  %2701 = vadd.xlane.f32.xlu1 %v2700_v52  ;;  %v2651_v55 = vmul.f32 %v7116_v28, %v7118_v35  ;;  %v6083_v52 = vld [vmem:[%s3929_s18 + $0xd0] sm:$0xff] }
 0x29f   : > { %v2057_v36 = vpop.xlane.xlu1 %2056  ;;  %v2655_v4 = vmul.f32 %v6083_v52, %v7118_v35 }
 0x2a0   : > { %v2122_v46 = vsel %vm469_vm1, %v2120_v43, %v2121_v41  ;;  %2698 = vadd.xlane.f32.xlu0 %v2697_v10  ;;  %v2124_v33 = vrot.slane %v2057_v36, 1  ;;  %v2658_v43 = vmul.f32 %v6092_v48, %v7118_v35 }
 0x2a1   : > { %v6050_v39 = vadd.f32 %v2122_v46, %v5880_v23  ;;  %v2054_v13 = vpop.xlane.xlu0 %2053 }
 0x2a2   : > { %v6056_v25 = vadd.f32 %v2124_v33, %v5886_v49  ;;  %v2123_v18 = vrot.slane %v2054_v13, 1  ;;  %2707 = vadd.xlane.f32.xlu1 %v2706_v50  ;;  %v2709_v49 = vsel %vm230_vm0, %v2651_v55, 0.0  ;;  %v2730_v16 = vsel %vm230_vm0, %v2658_v43, 0.0  ;;  %v6149_v43 = vld [vmem:[%s3929_s18 + $0x48] sm:$0xff] }
 0x2a3   : > { %v2063_v37 = vpop.xlane.xlu1 %2062 }
 0x2a4   : > { %v2125_v23 = vsel %vm469_vm1, %v2123_v18, %v2124_v33  ;;  %2704 = vadd.xlane.f32.xlu0 %v2703_v51  ;;  %v2127_v14 = vrot.slane %v2063_v37, 1  ;;  %v6102_v33 = vld [vmem:[%s3929_s18 + $0xe0] sm:$0xff]  ;;  %v6113_v37 = vld [vmem:[%s3929_s18 + $0xf0] sm:$0xff] }
 0x2a5   : > { %v6063_v30 = vadd.f32 %v2125_v23, %v5892_v62  ;;  %v2060_v28 = vpop.xlane.xlu0 %2059  ;;  %v2656_v62 = vmul.f32 %v6073_v34, %v7118_v35  ;;  %v2657_v13 = vmul.f32 %v6102_v33, %v7118_v35  ;;  %v2660_v23 = vmul.f32 %v7118_v35, %v6098_v26 }
 0x2a6   : > { %v6069_v58 = vadd.f32 %v2127_v14, %v7120_v7  ;;  %v2126_v45 = vrot.slane %v2060_v28, 1  ;;  %2713 = vadd.xlane.f32.xlu1 %v2712_v2 }
 0x2a7   : > { %v2216_v42 = vpop.xlane.xlu1 %2215  ;;  %v2724_v10 = vsel %vm230_vm0, %v2656_v62, 0.0  ;;  %v7122_v62 = vld [vmem:[#allocation11_spill] sm:$0xff] }
 0x2a8   : > { %v2128_v59 = vsel %vm469_vm1, %v2126_v45, %v2127_v14  ;;  %2710 = vadd.xlane.f32.xlu0 %v2709_v49  ;;  %v2316_v29 = vrot.slane %v2216_v42, 2  ;;  %v2659_v49 = vmul.f32 %v7118_v35, %v6113_v37  ;;  %v2736_v42 = vsel %vm230_vm0, %v2660_v23, 0.0 }
 0x2a9   : > { %v6079_v60 = vadd.f32 %v2128_v59, %v7121_v9  ;;  %v2213_v38 = vpop.xlane.xlu0 %2212 }
 0x2aa   : > { %v6088_v22 = vadd.f32 %v2316_v29, %v5913_v11  ;;  %v2315_v41 = vrot.slane %v2213_v38, 2  ;;  %2719 = vadd.xlane.f32.xlu1 %v2718_v57  ;;  %v2721_v11 = vsel %vm230_vm0, %v2655_v4, 0.0  ;;  %v6130_v57 = vld [vmem:[%s3929_s18 + $0x38] sm:$0xff]  ;;  %v2733_v9 = vsel %vm230_vm0, %v2659_v49, 0.0 }
 0x2ab   : > { %v2222_v6 = vpop.xlane.xlu1 %2221  ;;  %v2770_v59 = vmul.f32 %v6130_v57, %v7122_v62 }
 0x2ac   : > { %v2317_v36 = vsel %vm695_vm2, %v2315_v41, %v2316_v29  ;;  %2716 = vadd.xlane.f32.xlu0 %v2715_v63  ;;  %v2319_v50 = vrot.slane %v2222_v6, 2 }
 0x2ad   : > { %v2219_v46 = vpop.xlane.xlu0 %2218  ;;  %v6107_v51 = vadd.f32 %v2317_v36, %v5920_v5  ;;  %v2772_v36 = vmul.f32 %v6149_v43, %v7122_v62 }
 0x2ae   : > { %v6110_v55 = vadd.f32 %v2319_v50, %v5926_v17  ;;  %v2318_v18 = vrot.slane %v2219_v46, 2  ;;  %2725 = vadd.xlane.f32.xlu1 %v2724_v10  ;;  %v2727_v17 = vsel %vm230_vm0, %v2657_v13, 0.0  ;;  %v2798_v10 = vsel %vm230_vm0, %v2770_v59, 0.0 }
 0x2af   : > { %v2228_v2 = vpop.xlane.xlu1 %2227 }
 0x2b0   : > { %v2320_v14 = vsel %vm695_vm2, %v2318_v18, %v2319_v50  ;;  %2722 = vadd.xlane.f32.xlu0 %v2721_v11  ;;  %v2322_v28 = vrot.slane %v2228_v2, 2 }
 0x2b1   : > { %v2225_v5 = vpop.xlane.xlu0 %2224  ;;  %v6123_v24 = vadd.f32 %v2320_v14, %v5933_v32  ;;  %v2804_v14 = vsel %vm230_vm0, %v2772_v36, 0.0 }
 0x2b2   : > { %v6126_v0 = vadd.f32 %v2322_v28, %v5939_v20  ;;  %v2321_v7 = vrot.slane %v2225_v5, 2  ;;  %2731 = vadd.xlane.f32.xlu1 %v2730_v16  ;;  %v6137_v20 = vld [vmem:[%s3929_s18 + $0x30] sm:$0xff] }
 0x2b3   : > { %v2234_v45 = vpop.xlane.xlu1 %2233  ;;  %v2769_v38 = vmul.f32 %v6137_v20, %v7122_v62 }
 0x2b4   : > { %v2323_v29 = vsel %vm695_vm2, %v2321_v7, %v2322_v28  ;;  %2728 = vadd.xlane.f32.xlu0 %v2727_v17  ;;  %v2325_v35 = vrot.slane %v2234_v45, 2  ;;  %v6168_v28 = vld [vmem:[%s3929_s18 + $0x58] sm:$0xff] }
 0x2b5   : > { %v2231_v32 = vpop.xlane.xlu0 %2230  ;;  %v6142_v63 = vadd.f32 %v2323_v29, %v5946_v15  ;;  %v2795_v11 = vsel %vm230_vm0, %v2769_v38, 0.0  ;;  %v2774_v5 = vmul.f32 %v6168_v28, %v7122_v62 }
 0x2b6   : > { %v6145_v4 = vadd.f32 %v2325_v35, %v5952_v40  ;;  %v2324_v41 = vrot.slane %v2231_v32, 2  ;;  %2737 = vadd.xlane.f32.xlu1 %v2736_v42  ;;  %v6156_v40 = vld [vmem:[%s3929_s18 + $0x40] sm:$0xff] }
 0x2b7   : > { %v2240_v6 = vpop.xlane.xlu1 %2239  ;;  %v2771_v13 = vmul.f32 %v6156_v40, %v7122_v62  ;;  %v2810_v32 = vsel %vm230_vm0, %v2774_v5, 0.0 }
 0x2b8   : > { %v2326_v50 = vsel %vm695_vm2, %v2324_v41, %v2325_v35  ;;  %2734 = vadd.xlane.f32.xlu0 %v2733_v9  ;;  %v2328_v46 = vrot.slane %v2240_v6, 2  ;;  %v6187_v9 = vld [vmem:[%s3929_s18 + $0x68] sm:$0xff] }
 0x2b9   : > { %v2237_v15 = vpop.xlane.xlu0 %2236  ;;  %v6161_v18 = vadd.f32 %v2326_v50, %v5959_v47  ;;  %v2801_v7 = vsel %vm230_vm0, %v2771_v13, 0.0  ;;  %v2776_v38 = vmul.f32 %v6187_v9, %v7122_v62 }
 0x2ba   : > { %v6164_v2 = vadd.f32 %v2328_v46, %v5965_v21  ;;  %v2327_v16 = vrot.slane %v2237_v15, 2  ;;  %2799 = vadd.xlane.f32.xlu1 %v2798_v10  ;;  %v6175_v21 = vld [vmem:[%s3929_s18 + $0x50] sm:$0xff] }
 0x2bb   : > { %v2246_v23 = vpop.xlane.xlu1 %2245  ;;  %v2773_v45 = vmul.f32 %v6175_v21, %v7122_v62  ;;  %v2816_v13 = vsel %vm230_vm0, %v2776_v38, 0.0 }
 0x2bc   : > { %v2329_v17 = vsel %vm695_vm2, %v2327_v16, %v2328_v46  ;;  %2796 = vadd.xlane.f32.xlu0 %v2795_v11  ;;  %v2331_v49 = vrot.slane %v2246_v23, 2  ;;  %v6206_v16 = vld [vmem:[%s3929_s18 + $0x78] sm:$0xff] }
 0x2bd   : > { %v2243_v47 = vpop.xlane.xlu0 %2242  ;;  %v6180_v42 = vadd.f32 %v2329_v17, %v5972_v31  ;;  %v2807_v10 = vsel %vm230_vm0, %v2773_v45, 0.0  ;;  %v2778_v23 = vmul.f32 %v6206_v16, %v7122_v62 }
 0x2be   : > { %v6183_v59 = vadd.f32 %v2331_v49, %v5978_v19  ;;  %v2330_v29 = vrot.slane %v2243_v47, 2  ;;  %2805 = vadd.xlane.f32.xlu1 %v2804_v14  ;;  %v6194_v19 = vld [vmem:[%s3929_s18 + $0x60] sm:$0xff] }
 0x2bf   : > { %v2252_v35 = vpop.xlane.xlu1 %2251  ;;  %v2775_v36 = vmul.f32 %v6194_v19, %v7122_v62 }
 0x2c0   : > { %v2332_v41 = vsel %vm695_vm2, %v2330_v29, %v2331_v49  ;;  %2802 = vadd.xlane.f32.xlu0 %v2801_v7  ;;  %v2334_v6 = vrot.slane %v2252_v35, 2  ;;  %v2822_v35 = vsel %vm230_vm0, %v2778_v23, 0.0 }
 0x2c1   : > { %v2249_v31 = vpop.xlane.xlu0 %2248  ;;  %v6199_v50 = vadd.f32 %v2332_v41, %v5985_v54  ;;  %v2813_v17 = vsel %vm230_vm0, %v2775_v36, 0.0 }
 0x2c2   : > { %v6202_v46 = vadd.f32 %v2334_v6, %v5991_v53  ;;  %v2333_v15 = vrot.slane %v2249_v31, 2  ;;  %2811 = vadd.xlane.f32.xlu1 %v2810_v32  ;;  %v6213_v53 = vld [vmem:[%s3929_s18 + $0x70] sm:$0xff]  ;;  %v6225_v32 = vld [vmem:[%s3929_s18 + $0x88] sm:$0xff] }
 0x2c3   : > { %v2258_v11 = vpop.xlane.xlu1 %2257  ;;  %v2777_v49 = vmul.f32 %v6213_v53, %v7122_v62  ;;  %v2780_v38 = vmul.f32 %v6225_v32, %v7122_v62 }
 0x2c4   : > { %v2335_v14 = vsel %vm695_vm2, %v2333_v15, %v2334_v6  ;;  %2808 = vadd.xlane.f32.xlu0 %v2807_v10  ;;  %v2337_v5 = vrot.slane %v2258_v11, 2 }
 0x2c5   : > { %v2255_v54 = vpop.xlane.xlu0 %2254  ;;  %v6218_v47 = vadd.f32 %v2335_v14, %v5998_v12  ;;  %v2819_v31 = vsel %vm230_vm0, %v2777_v49, 0.0  ;;  %v2828_v23 = vsel %vm230_vm0, %v2780_v38, 0.0  ;;  %v6244_v14 = vld [vmem:[%s3929_s18 + $0x98] sm:$0xff] }
 0x2c6   : > { %v6221_v7 = vadd.f32 %v2337_v5, %v6004_v1  ;;  %v2336_v45 = vrot.slane %v2255_v54, 2  ;;  %2817 = vadd.xlane.f32.xlu1 %v2816_v13  ;;  %v6232_v1 = vld [vmem:[%s3929_s18 + $0x80] sm:$0xff] }
 0x2c7   : > { %v2264_v29 = vpop.xlane.xlu1 %2263  ;;  %v2779_v10 = vmul.f32 %v6232_v1, %v7122_v62 }
 0x2c8   : > { %v2338_v41 = vsel %vm695_vm2, %v2336_v45, %v2337_v5  ;;  %2814 = vadd.xlane.f32.xlu0 %v2813_v17  ;;  %v2340_v6 = vrot.slane %v2264_v29, 2  ;;  %v2782_v5 = vmul.f32 %v6244_v14, %v7122_v62 }
 0x2c9   : > { %v2261_v12 = vpop.xlane.xlu0 %2260  ;;  %v6237_v36 = vadd.f32 %v2338_v41, %v6011_v56  ;;  %v2825_v49 = vsel %vm230_vm0, %v2779_v10, 0.0 }
 0x2ca   : > { %v6240_v15 = vadd.f32 %v2340_v6, %v6017_v8  ;;  %v2339_v11 = vrot.slane %v2261_v12, 2  ;;  %2823 = vadd.xlane.f32.xlu1 %v2822_v35  ;;  %v6251_v8 = vld [vmem:[%s3929_s18 + $0x90] sm:$0xff]  ;;  %v6263_v12 = vld [vmem:[%s3929_s18 + $0xa8] sm:$0xff] }
 0x2cb   : > { %v2270_v13 = vpop.xlane.xlu1 %2269  ;;  %v2781_v45 = vmul.f32 %v6251_v8, %v7122_v62 }
 0x2cc   : > { %v2341_v54 = vsel %vm695_vm2, %v2339_v11, %v2340_v6  ;;  %2820 = vadd.xlane.f32.xlu0 %v2819_v31  ;;  %v2343_v17 = vrot.slane %v2270_v13, 2  ;;  %v2834_v6 = vsel %vm230_vm0, %v2782_v5, 0.0  ;;  %v2784_v31 = vmul.f32 %v6263_v12, %v7122_v62 }
 0x2cd   : > { %v2267_v56 = vpop.xlane.xlu0 %2266  ;;  %v6256_v29 = vadd.f32 %v2341_v54, %v6024_v3  ;;  %v2831_v13 = vsel %vm230_vm0, %v2781_v45, 0.0 }
 0x2ce   : > { %v6259_v35 = vadd.f32 %v2343_v17, %v6030_v27  ;;  %v2342_v38 = vrot.slane %v2267_v56, 2  ;;  %2829 = vadd.xlane.f32.xlu1 %v2828_v23  ;;  %v6270_v27 = vld [vmem:[%s3929_s18 + $0xa0] sm:$0xff] }
 0x2cf   : > { %v2276_v41 = vpop.xlane.xlu1 %2275  ;;  %7123 = vst [vmem:[#allocation7_spill] sm:$0xff] %v6270_v27  ;;  %v2783_v23 = vmul.f32 %v6270_v27, %v7122_v62 }
 0x2d0   : > { %v2344_v10 = vsel %vm695_vm2, %v2342_v38, %v2343_v17  ;;  %2826 = vadd.xlane.f32.xlu0 %v2825_v49  ;;  %v2346_v11 = vrot.slane %v2276_v41, 2  ;;  %v2840_v49 = vsel %vm230_vm0, %v2784_v31, 0.0  ;;  %v6282_v38 = vld [vmem:[%s3929_s18 + $0xb8] sm:$0xff] }
 0x2d1   : > { %v2273_v3 = vpop.xlane.xlu0 %2272  ;;  %v6275_v5 = vadd.f32 %v2344_v10, %v6037_v44  ;;  %7125 = vst [vmem:[#allocation15_spill] sm:$0xff] %v6282_v38  ;;  %v2786_v45 = vmul.f32 %v6282_v38, %v7122_v62  ;;  %v2837_v10 = vsel %vm230_vm0, %v2783_v23, 0.0 }
 0x2d2   : > { %v6278_v54 = vadd.f32 %v2346_v11, %v6043_v61  ;;  %v2345_v56 = vrot.slane %v2273_v3, 2  ;;  %2835 = vadd.xlane.f32.xlu1 %v2834_v6  ;;  %v6289_v61 = vld [vmem:[%s3929_s18 + $0xb0] sm:$0xff] }
 0x2d3   : > { %v2282_v17 = vpop.xlane.xlu1 %2281  ;;  %7126 = vst [vmem:[#allocation14_spill] sm:$0xff] %v6289_v61  ;;  %v2785_v6 = vmul.f32 %v6289_v61, %v7122_v62 }
 0x2d4   : > { %7124 = vst [vmem:[#allocation8_spill] sm:$0xff] %v6278_v54  ;;  %v2347_v41 = vsel %vm695_vm2, %v2345_v56, %v2346_v11  ;;  %2832 = vadd.xlane.f32.xlu0 %v2831_v13  ;;  %v2349_v27 = vrot.slane %v2282_v17, 2  ;;  %v2846_v13 = vsel %vm230_vm0, %v2786_v45, 0.0  ;;  %v6301_v56 = vld [vmem:[%s3929_s18 + $0xc8] sm:$0xff] }
 0x2d5   : > { %v2279_v44 = vpop.xlane.xlu0 %2278  ;;  %v6294_v31 = vadd.f32 %v2347_v41, %v6050_v39  ;;  %7127 = vst [vmem:[#allocation6_spill] sm:$0xff] %v6301_v56  ;;  %v2788_v23 = vmul.f32 %v6301_v56, %v7122_v62  ;;  %v2843_v39 = vsel %vm230_vm0, %v2785_v6, 0.0  ;;  %v6308_v41 = vld [vmem:[%s3929_s18 + $0xc0] sm:$0xff] }
 0x2d6   : > { %v6297_v3 = vadd.f32 %v2349_v27, %v6056_v25  ;;  %v2348_v38 = vrot.slane %v2279_v44, 2  ;;  %2841 = vadd.xlane.f32.xlu1 %v2840_v49  ;;  %7128 = vst [vmem:[#allocation9_spill] sm:$0xff] %v6308_v41  ;;  %v2787_v25 = vmul.f32 %v6308_v41, %v7122_v62 }
 0x2d7   : > { %v2288_v11 = vpop.xlane.xlu1 %2287 }
 0x2d8   : > { %v2350_v17 = vsel %vm695_vm2, %v2348_v38, %v2349_v27  ;;  %2838 = vadd.xlane.f32.xlu0 %v2837_v10  ;;  %v2352_v61 = vrot.slane %v2288_v11, 2  ;;  %v2852_v27 = vsel %vm230_vm0, %v2788_v23, 0.0  ;;  %v2790_v38 = vmul.f32 %v6073_v34, %v7122_v62 }
 0x2d9   : > { %v2285_v54 = vpop.xlane.xlu0 %2284  ;;  %v6313_v49 = vadd.f32 %v2350_v17, %v6063_v30  ;;  %v2849_v41 = vsel %vm230_vm0, %v2787_v25, 0.0  ;;  %v2789_v30 = vmul.f32 %v6083_v52, %v7122_v62 }
 0x2da   : > { %v6316_v45 = vadd.f32 %v2352_v61, %v6069_v58  ;;  %v2351_v44 = vrot.slane %v2285_v54, 2  ;;  %2847 = vadd.xlane.f32.xlu1 %v2846_v13  ;;  %v2858_v17 = vsel %vm230_vm0, %v2790_v38, 0.0 }
 0x2db   : > { %v2441_v56 = vpop.xlane.xlu1 %2440 }
 0x2dc   : > { %v2353_v10 = vsel %vm695_vm2, %v2351_v44, %v2352_v61  ;;  %2844 = vadd.xlane.f32.xlu0 %v2843_v39  ;;  %v2541_v6 = vrot.slane %v2441_v56, 3  ;;  %v2792_v61 = vmul.f32 %v6092_v48, %v7122_v62  ;;  %v2855_v44 = vsel %vm230_vm0, %v2789_v30, 0.0 }
 0x2dd   : > { %v2438_v11 = vpop.xlane.xlu0 %2437  ;;  %v6326_v58 = vadd.f32 %v2353_v10, %v6079_v60  ;;  %v2791_v60 = vmul.f32 %v6102_v33, %v7122_v62 }
 0x2de   : > { %v2540_v54 = vrot.slane %v2438_v11, 3  ;;  %2853 = vadd.xlane.f32.xlu1 %v2852_v27  ;;  %v6329_v13 = vadd.f32 %v2541_v6, %v6088_v22 }
 0x2df   : > { %v2447_v23 = vpop.xlane.xlu1 %2446 }
 0x2e0   : > { %2850 = vadd.xlane.f32.xlu0 %v2849_v41  ;;  %v2544_v56 = vrot.slane %v2447_v23, 3  ;;  %v2542_v39 = vsel %vm921_vm3, %v2540_v54, %v2541_v6  ;;  %v2864_v41 = vsel %vm230_vm0, %v2792_v61, 0.0  ;;  %v2794_v6 = vmul.f32 %v7122_v62, %v6098_v26 }
 0x2e1   : > { %v2444_v25 = vpop.xlane.xlu0 %2443  ;;  %v6339_v27 = vadd.f32 %v2542_v39, %v6107_v51  ;;  %v2861_v23 = vsel %vm230_vm0, %v2791_v60, 0.0  ;;  %v2793_v51 = vmul.f32 %v7122_v62, %v6113_v37 }
 0x2e2   : > { %v2543_v22 = vrot.slane %v2444_v25, 3  ;;  %2859 = vadd.xlane.f32.xlu1 %v2858_v17  ;;  %v6342_v38 = vadd.f32 %v2544_v56, %v6110_v55  ;;  %v2870_v25 = vsel %vm230_vm0, %v2794_v6, 0.0 }
 0x2e3   : > { %v2453_v10 = vpop.xlane.xlu1 %2452  ;;  %v2867_v62 = vsel %vm230_vm0, %v2793_v51, 0.0 }
 0x2e4   : > { %2856 = vadd.xlane.f32.xlu0 %v2855_v44  ;;  %v2547_v11 = vrot.slane %v2453_v10, 3  ;;  %v2545_v30 = vsel %vm921_vm3, %v2543_v22, %v2544_v56  ;;  %v7129_v44 = vld [vmem:[#allocation12_spill] sm:$0xff] }
 0x2e5   : > { %v2450_v54 = vpop.xlane.xlu0 %2449  ;;  %v6352_v17 = vadd.f32 %v2545_v30, %v6123_v24  ;;  %v2995_v56 = vmul.f32 %v6130_v57, %v7129_v44  ;;  %v2994_v24 = vmul.f32 %v6137_v20, %v7129_v44 }
 0x2e6   : > { %v2546_v55 = vrot.slane %v2450_v54, 3  ;;  %2865 = vadd.xlane.f32.xlu1 %v2864_v41  ;;  %v6355_v61 = vadd.f32 %v2547_v11, %v6126_v0 }
 0x2e7   : > { %v2459_v39 = vpop.xlane.xlu1 %2458  ;;  %v3023_v54 = vsel %vm230_vm0, %v2995_v56, 0.0 }
 0x2e8   : > { %2862 = vadd.xlane.f32.xlu0 %v2861_v23  ;;  %v2550_v22 = vrot.slane %v2459_v39, 3  ;;  %v2548_v60 = vsel %vm921_vm3, %v2546_v55, %v2547_v11  ;;  %v2997_v11 = vmul.f32 %v6149_v43, %v7129_v44  ;;  %v3020_v39 = vsel %vm230_vm0, %v2994_v24, 0.0 }
 0x2e9   : > { %v2456_v10 = vpop.xlane.xlu0 %2455  ;;  %v6365_v41 = vadd.f32 %v2548_v60, %v6142_v63  ;;  %v2996_v63 = vmul.f32 %v6156_v40, %v7129_v44 }
 0x2ea   : > { %v2549_v0 = vrot.slane %v2456_v10, 3  ;;  %2871 = vadd.xlane.f32.xlu1 %v2870_v25  ;;  %v6368_v6 = vadd.f32 %v2550_v22, %v6145_v4  ;;  %v3029_v10 = vsel %vm230_vm0, %v2997_v11, 0.0 }
 0x2eb   : > { %v2465_v30 = vpop.xlane.xlu1 %2464 }
 0x2ec   : > { %7130 = vst [vmem:[#allocation3_spill] sm:$0xff] %v6368_v6  ;;  %2868 = vadd.xlane.f32.xlu0 %v2867_v62  ;;  %v2553_v23 = vrot.slane %v2465_v30, 3  ;;  %v2551_v51 = vsel %vm921_vm3, %v2549_v0, %v2550_v22  ;;  %v2999_v22 = vmul.f32 %v6168_v28, %v7129_v44  ;;  %v3026_v30 = vsel %vm230_vm0, %v2996_v63, 0.0 }
 0x2ed   : > { %v2462_v55 = vpop.xlane.xlu0 %2461  ;;  %v6378_v25 = vadd.f32 %v2551_v51, %v6161_v18  ;;  %v2998_v18 = vmul.f32 %v6175_v21, %v7129_v44 }
 0x2ee   : > { %v2552_v4 = vrot.slane %v2462_v55, 3  ;;  %3024 = vadd.xlane.f32.xlu1 %v3023_v54  ;;  %v6381_v56 = vadd.f32 %v2553_v23, %v6164_v2  ;;  %v3035_v55 = vsel %vm230_vm0, %v2999_v22, 0.0 }
 0x2ef   : > { %v2471_v60 = vpop.xlane.xlu1 %2470 }
 0x2f0   : > { %7131 = vst [vmem:[#allocation19_spill] sm:$0xff] %v6381_v56  ;;  %3021 = vadd.xlane.f32.xlu0 %v3020_v39  ;;  %v2556_v62 = vrot.slane %v2471_v60, 3  ;;  %v2554_v24 = vsel %vm921_vm3, %v2552_v4, %v2553_v23  ;;  %v3001_v23 = vmul.f32 %v6187_v9, %v7129_v44  ;;  %v3032_v60 = vsel %vm230_vm0, %v2998_v18, 0.0 }
 0x2f1   : > { %v2468_v0 = vpop.xlane.xlu0 %2467  ;;  %v6391_v54 = vadd.f32 %v2554_v24, %v6180_v42  ;;  %v3000_v42 = vmul.f32 %v6194_v19, %v7129_v44 }
 0x2f2   : > { %v2555_v2 = vrot.slane %v2468_v0, 3  ;;  %3030 = vadd.xlane.f32.xlu1 %v3029_v10  ;;  %v6394_v11 = vadd.f32 %v2556_v62, %v6183_v59  ;;  %v3041_v0 = vsel %vm230_vm0, %v3001_v23, 0.0 }
 0x2f3   : > { %v2477_v51 = vpop.xlane.xlu1 %2476 }
 0x2f4   : > { %7132 = vst [vmem:[#allocation5_spill] sm:$0xff] %v6394_v11  ;;  %3027 = vadd.xlane.f32.xlu0 %v3026_v30  ;;  %v2559_v39 = vrot.slane %v2477_v51, 3  ;;  %v2557_v63 = vsel %vm921_vm3, %v2555_v2, %v2556_v62  ;;  %v3003_v62 = vmul.f32 %v6206_v16, %v7129_v44  ;;  %v3038_v51 = vsel %vm230_vm0, %v3000_v42, 0.0 }
 0x2f5   : > { %v2474_v4 = vpop.xlane.xlu0 %2473  ;;  %v6404_v10 = vadd.f32 %v2557_v63, %v6199_v50  ;;  %v3002_v50 = vmul.f32 %v6213_v53, %v7129_v44 }
 0x2f6   : > { %v2558_v59 = vrot.slane %v2474_v4, 3  ;;  %3036 = vadd.xlane.f32.xlu1 %v3035_v55  ;;  %v6407_v22 = vadd.f32 %v2559_v39, %v6202_v46  ;;  %v3047_v4 = vsel %vm230_vm0, %v3003_v62, 0.0 }
 0x2f7   : > { %v2483_v24 = vpop.xlane.xlu1 %2482 }
 0x2f8   : > { %3033 = vadd.xlane.f32.xlu0 %v3032_v60  ;;  %v2562_v30 = vrot.slane %v2483_v24, 3  ;;  %v2560_v18 = vsel %vm921_vm3, %v2558_v59, %v2559_v39  ;;  %v3005_v39 = vmul.f32 %v6225_v32, %v7129_v44  ;;  %v3044_v24 = vsel %vm230_vm0, %v3002_v50, 0.0 }
 0x2f9   : > { %v2480_v2 = vpop.xlane.xlu0 %2479  ;;  %v6417_v55 = vadd.f32 %v2560_v18, %v6218_v47  ;;  %v3004_v47 = vmul.f32 %v6232_v1, %v7129_v44 }
 0x2fa   : > { %v2561_v46 = vrot.slane %v2480_v2, 3  ;;  %3042 = vadd.xlane.f32.xlu1 %v3041_v0  ;;  %v6420_v23 = vadd.f32 %v2562_v30, %v6221_v7  ;;  %v3053_v2 = vsel %vm230_vm0, %v3005_v39, 0.0 }
 0x2fb   : > { %v2489_v63 = vpop.xlane.xlu1 %2488 }
 0x2fc   : > { %3039 = vadd.xlane.f32.xlu0 %v3038_v51  ;;  %v2565_v60 = vrot.slane %v2489_v63, 3  ;;  %v2563_v42 = vsel %vm921_vm3, %v2561_v46, %v2562_v30  ;;  %v3007_v30 = vmul.f32 %v6244_v14, %v7129_v44  ;;  %v3050_v63 = vsel %vm230_vm0, %v3004_v47, 0.0 }
 0x2fd   : > { %v2486_v59 = vpop.xlane.xlu0 %2485  ;;  %v6430_v0 = vadd.f32 %v2563_v42, %v6237_v36  ;;  %v3006_v36 = vmul.f32 %v6251_v8, %v7129_v44 }
 0x2fe   : > { %v2564_v7 = vrot.slane %v2486_v59, 3  ;;  %3048 = vadd.xlane.f32.xlu1 %v3047_v4  ;;  %v6433_v62 = vadd.f32 %v2565_v60, %v6240_v15  ;;  %v3059_v59 = vsel %vm230_vm0, %v3007_v30, 0.0 }
 0x2ff   : > { %v2495_v18 = vpop.xlane.xlu1 %2494 }
 0x300   : > { %3045 = vadd.xlane.f32.xlu0 %v3044_v24  ;;  %v2568_v51 = vrot.slane %v2495_v18, 3  ;;  %v2566_v50 = vsel %vm921_vm3, %v2564_v7, %v2565_v60  ;;  %v3009_v60 = vmul.f32 %v6263_v12, %v7129_v44  ;;  %v3056_v18 = vsel %vm230_vm0, %v3006_v36, 0.0 }
 0x301   : > { %v2492_v46 = vpop.xlane.xlu0 %2491  ;;  %v6443_v4 = vadd.f32 %v2566_v50, %v6256_v29  ;;  %v7133_v29 = vld [vmem:[#allocation7_spill] sm:$0xff] }
 0x302   : > { %v2567_v15 = vrot.slane %v2492_v46, 3  ;;  %3054 = vadd.xlane.f32.xlu1 %v3053_v2  ;;  %v6446_v39 = vadd.f32 %v2568_v51, %v6259_v35  ;;  %v3008_v50 = vmul.f32 %v7133_v29, %v7129_v44  ;;  %v7135_v46 = vld [vmem:[#allocation8_spill] sm:$0xff] }
 0x303   : > { %v2501_v42 = vpop.xlane.xlu1 %2500 }
 0x304   : > { %3051 = vadd.xlane.f32.xlu0 %v3050_v63  ;;  %v2571_v24 = vrot.slane %v2501_v42, 3  ;;  %v2569_v47 = vsel %vm921_vm3, %v2567_v15, %v2568_v51  ;;  %v3065_v63 = vsel %vm230_vm0, %v3009_v60, 0.0  ;;  %v7137_v42 = vld [vmem:[#allocation15_spill] sm:$0xff]  ;;  %v3062_v11 = vsel %vm230_vm0, %v3008_v50, 0.0 }
 0x305   : > { %v2498_v7 = vpop.xlane.xlu0 %2497  ;;  %v6456_v2 = vadd.f32 %v2569_v47, %v6275_v5  ;;  %v3011_v51 = vmul.f32 %v7137_v42, %v7129_v44  ;;  %v7138_v5 = vld [vmem:[#allocation14_spill] sm:$0xff] }
 0x306   : > { %v2570_v35 = vrot.slane %v2498_v7, 3  ;;  %3060 = vadd.xlane.f32.xlu1 %v3059_v59  ;;  %v6459_v30 = vadd.f32 %v2571_v24, %v7135_v46  ;;  %v3010_v47 = vmul.f32 %v7138_v5, %v7129_v44 }
 0x307   : > { %7134 = vst [vmem:[#allocation4_spill] sm:$0xff] %v6456_v2  ;;  %v2507_v6 = vpop.xlane.xlu1 %2506 }
 0x308   : > { %7136 = vst [vmem:[#allocation10_spill] sm:$0xff] %v6459_v30  ;;  %3057 = vadd.xlane.f32.xlu0 %v3056_v18  ;;  %v2574_v15 = vrot.slane %v2507_v6, 3  ;;  %v2572_v36 = vsel %vm921_vm3, %v2570_v35, %v2571_v24  ;;  %v3071_v18 = vsel %vm230_vm0, %v3011_v51, 0.0  ;;  %v7139_v6 = vld [vmem:[#allocation6_spill] sm:$0xff]  ;;  %v3068_v2 = vsel %vm230_vm0, %v3010_v47, 0.0 }
 0x309   : > { %v2504_v56 = vpop.xlane.xlu0 %2503  ;;  %v6469_v59 = vadd.f32 %v2572_v36, %v6294_v31  ;;  %v3013_v24 = vmul.f32 %v7139_v6, %v7129_v44  ;;  %v7140_v31 = vld [vmem:[#allocation9_spill] sm:$0xff] }
 0x30a   : > { %v2573_v7 = vrot.slane %v2504_v56, 3  ;;  %3066 = vadd.xlane.f32.xlu1 %v3065_v63  ;;  %v6472_v60 = vadd.f32 %v2574_v15, %v6297_v3  ;;  %v3012_v56 = vmul.f32 %v7140_v31, %v7129_v44 }
 0x30b   : > { %v2513_v46 = vpop.xlane.xlu1 %2512 }
 0x30c   : > { %3063 = vadd.xlane.f32.xlu0 %v3062_v11  ;;  %v2577_v35 = vrot.slane %v2513_v46, 3  ;;  %v2575_v50 = vsel %vm921_vm3, %v2573_v7, %v2574_v15  ;;  %v3077_v11 = vsel %vm230_vm0, %v3013_v24, 0.0  ;;  %v3015_v15 = vmul.f32 %v6073_v34, %v7129_v44 }
 0x30d   : > { %v2510_v30 = vpop.xlane.xlu0 %2509  ;;  %v6482_v63 = vadd.f32 %v2575_v50, %v6313_v49  ;;  %v3074_v49 = vsel %vm230_vm0, %v3012_v56, 0.0 }
 0x30e   : > { %v2576_v3 = vrot.slane %v2510_v30, 3  ;;  %3072 = vadd.xlane.f32.xlu1 %v3071_v18  ;;  %v6485_v51 = vadd.f32 %v2577_v35, %v6316_v45  ;;  %v3014_v30 = vmul.f32 %v6083_v52, %v7129_v44 }
 0x30f   : > { %v2666_v36 = vpop.xlane.xlu1 %2665 }
 0x310   : > { %3069 = vadd.xlane.f32.xlu0 %v3068_v2  ;;  %v6491_v47 = vadd.f32 %v2666_v36, %v6329_v13  ;;  %v2578_v7 = vsel %vm921_vm3, %v2576_v3, %v2577_v35  ;;  %v3083_v2 = vsel %vm230_vm0, %v3015_v15, 0.0  ;;  %v3017_v13 = vmul.f32 %v6092_v48, %v7129_v44 }
 0x311   : > { %v2663_v46 = vpop.xlane.xlu0 %2662  ;;  %v6498_v45 = vadd.f32 %v2578_v7, %v6326_v58  ;;  %v3080_v56 = vsel %vm230_vm0, %v3014_v30, 0.0  ;;  %v3016_v58 = vmul.f32 %v6102_v33, %v7129_v44 }
 0x312   : > { %v6501_v18 = vadd.f32 %v2663_v46, %v6339_v27  ;;  %3078 = vadd.xlane.f32.xlu1 %v3077_v11  ;;  %v3089_v36 = vsel %vm230_vm0, %v3017_v13, 0.0  ;;  %v3019_v11 = vmul.f32 %v7129_v44, %v6098_v26  ;;  %v3018_v46 = vmul.f32 %v7129_v44, %v6113_v37 }
 0x313   : > { %v2672_v24 = vpop.xlane.xlu1 %2671  ;;  %v3086_v7 = vsel %vm230_vm0, %v3016_v58, 0.0 }
 0x314   : > { %3075 = vadd.xlane.f32.xlu0 %v3074_v49  ;;  %v6507_v35 = vadd.f32 %v2672_v24, %v6342_v38  ;;  %v3095_v30 = vsel %vm230_vm0, %v3019_v11, 0.0  ;;  %v7141_v24 = vld [vmem:[#allocation13_spill] sm:$0xff]  ;;  %v3092_v13 = vsel %vm230_vm0, %v3018_v46, 0.0 }
 0x315   : > { %v2669_v50 = vpop.xlane.xlu0 %2668  ;;  %v3224_v11 = vmul.f32 %v6168_v28, %v7141_v24 }
 0x316   : > { %v6513_v27 = vadd.f32 %v2669_v50, %v6352_v17  ;;  %3084 = vadd.xlane.f32.xlu1 %v3083_v2  ;;  %v3220_v2 = vmul.f32 %v6130_v57, %v7141_v24  ;;  %v3219_v50 = vmul.f32 %v6137_v20, %v7141_v24 }
 0x317   : > { %v2678_v3 = vpop.xlane.xlu1 %2677 }
 0x318   : > { %3081 = vadd.xlane.f32.xlu0 %v3080_v56  ;;  %v6519_v38 = vadd.f32 %v2678_v3, %v6355_v61  ;;  %v3222_v56 = vmul.f32 %v6149_v43, %v7141_v24  ;;  %v3245_v57 = vsel %vm230_vm0, %v3219_v50, 0.0  ;;  %v3221_v3 = vmul.f32 %v6156_v40, %v7141_v24 }
 0x319   : > { %v2675_v15 = vpop.xlane.xlu0 %2674  ;;  %v3260_v40 = vsel %vm230_vm0, %v3224_v11, 0.0 }
 0x31a   : > { %v6525_v17 = vadd.f32 %v2675_v15, %v6365_v41  ;;  %3090 = vadd.xlane.f32.xlu1 %v3089_v36  ;;  %v3248_v41 = vsel %vm230_vm0, %v3220_v2, 0.0  ;;  %v3254_v20 = vsel %vm230_vm0, %v3222_v56, 0.0  ;;  %v3251_v43 = vsel %vm230_vm0, %v3221_v3, 0.0 }
 0x31b   : > { %v6527_v49 = vpop.xlane.xlu1 %2683 }
 0x31c   : > { %3087 = vadd.xlane.f32.xlu0 %v3086_v7  ;;  %v3223_v7 = vmul.f32 %v6175_v21, %v7141_v24 }
 0x31d   : > { %v6532_v61 = vpop.xlane.xlu0 %2680 }
 0x31e   : > { %3096 = vadd.xlane.f32.xlu1 %v3095_v30  ;;  %v3226_v30 = vmul.f32 %v6187_v9, %v7141_v24  ;;  %v3257_v28 = vsel %vm230_vm0, %v3223_v7, 0.0 }
 0x31f   : > { %v6537_v44 = vpop.xlane.xlu1 %2689 }
 0x320   : > { %3093 = vadd.xlane.f32.xlu0 %v3092_v13  ;;  %v3225_v13 = vmul.f32 %v6194_v19, %v7141_v24  ;;  %v3266_v21 = vsel %vm230_vm0, %v3226_v30, 0.0  ;;  %v3889_v30 = vmov 0  }
 0x321   : > { %v6542_v58 = vpop.xlane.xlu0 %2686  ;;  %3808 = vset.pattern.permute.xlu1 %v3889_v30  ;;  %3807 = vset.pattern.permute.xlu0 %v3889_v30 }
 0x322   : > { %3249 = vadd.xlane.f32.xlu1 %v3248_v41  ;;  %v3228_v41 = vmul.f32 %v6206_v16, %v7141_v24  ;;  %v3263_v9 = vsel %vm230_vm0, %v3225_v13, 0.0  ;;  %v3231_v13 = vmul.f32 %v6251_v8, %v7141_v24 }
 0x323   : > { %v6547_v36 = vpop.xlane.xlu1 %2695 }
 0x324   : > { %3246 = vadd.xlane.f32.xlu0 %v3245_v57  ;;  %v3227_v57 = vmul.f32 %v6213_v53, %v7141_v24  ;;  %v3272_v19 = vsel %vm230_vm0, %v3228_v41, 0.0  ;;  %v3236_v41 = vmul.f32 %v7137_v42, %v7141_v24 }
 0x325   : > { %v6552_v15 = vpop.xlane.xlu0 %2692 }
 0x326   : > { %3255 = vadd.xlane.f32.xlu1 %v3254_v20  ;;  %v3230_v20 = vmul.f32 %v6225_v32, %v7141_v24  ;;  %v3269_v16 = vsel %vm230_vm0, %v3227_v57, 0.0  ;;  %v3235_v57 = vmul.f32 %v7138_v5, %v7141_v24  ;;  %v3296_v8 = vsel %vm230_vm0, %v3236_v41, 0.0 }
 0x327   : > { %v6557_v46 = vpop.xlane.xlu1 %2701 }
 0x328   : > { %3252 = vadd.xlane.f32.xlu0 %v3251_v43  ;;  %v3229_v43 = vmul.f32 %v6232_v1, %v7141_v24  ;;  %v3278_v53 = vsel %vm230_vm0, %v3230_v20, 0.0  ;;  %v3238_v20 = vmul.f32 %v7139_v6, %v7141_v24  ;;  %v3293_v42 = vsel %vm230_vm0, %v3235_v57, 0.0 }
 0x329   : > { %v6562_v2 = vpop.xlane.xlu0 %2698  ;;  %v3241_v57 = vmul.f32 %v6102_v33, %v7141_v24 }
 0x32a   : > { %3261 = vadd.xlane.f32.xlu1 %v3260_v40  ;;  %v3232_v40 = vmul.f32 %v6244_v14, %v7141_v24  ;;  %v3302_v5 = vsel %vm230_vm0, %v3238_v20, 0.0 }
 0x32b   : > { %v6567_v50 = vpop.xlane.xlu1 %2707 }
 0x32c   : > { %3258 = vadd.xlane.f32.xlu0 %v3257_v28  ;;  %v3275_v28 = vsel %vm230_vm0, %v3229_v43, 0.0  ;;  %v3237_v43 = vmul.f32 %v7140_v31, %v7141_v24 }
 0x32d   : > { %v6572_v56 = vpop.xlane.xlu0 %2704 }
 0x32e   : > { %3267 = vadd.xlane.f32.xlu1 %v3266_v21  ;;  %v3284_v21 = vsel %vm230_vm0, %v3232_v40, 0.0  ;;  %v3240_v40 = vmul.f32 %v6073_v34, %v7141_v24  ;;  %v3299_v6 = vsel %vm230_vm0, %v3237_v43, 0.0 }
 0x32f   : > { %v6577_v3 = vpop.xlane.xlu1 %2713 }
 0x330   : > { %3264 = vadd.xlane.f32.xlu0 %v3263_v9  ;;  %v3281_v9 = vsel %vm230_vm0, %v3231_v13, 0.0  ;;  %v3308_v31 = vsel %vm230_vm0, %v3240_v40, 0.0  ;;  %v3311_v40 = vsel %vm230_vm0, %v3241_v57, 0.0 }
 0x331   : > { %v6582_v11 = vpop.xlane.xlu0 %2710 }
 0x332   : > { %3273 = vadd.xlane.f32.xlu1 %v3272_v19 }
 0x333   : > { %v6587_v7 = vpop.xlane.xlu1 %2719 }
 0x334   : > { %3270 = vadd.xlane.f32.xlu0 %v3269_v16 }
 0x335   : > { %v6592_v32 = vpop.xlane.xlu0 %2716 }
 0x336   : > { %3279 = vadd.xlane.f32.xlu1 %v3278_v53 }
 0x337   : > { %v6597_v1 = vpop.xlane.xlu1 %2725 }
 0x338   : > { %3276 = vadd.xlane.f32.xlu0 %v3275_v28  ;;  %v3239_v28 = vmul.f32 %v6083_v52, %v7141_v24 }
 0x339   : > { %v6602_v14 = vpop.xlane.xlu0 %2722 }
 0x33a   : > { %3285 = vadd.xlane.f32.xlu1 %v3284_v21  ;;  %v3242_v21 = vmul.f32 %v6092_v48, %v7141_v24 }
 0x33b   : > { %v6607_v19 = vpop.xlane.xlu1 %2731 }
 0x33c   : > { %3282 = vadd.xlane.f32.xlu0 %v3281_v9  ;;  %v3305_v9 = vsel %vm230_vm0, %v3239_v28, 0.0  ;;  %v3314_v20 = vsel %vm230_vm0, %v3242_v21, 0.0  ;;  %v3244_v21 = vmul.f32 %v7141_v24, %v6098_v26 }
 0x33d   : > { %v6612_v16 = vpop.xlane.xlu0 %2728 }
 0x33e   : > { %3297 = vadd.xlane.f32.xlu1 %v3296_v8  ;;  %v3320_v26 = vsel %vm230_vm0, %v3244_v21, 0.0 }
 0x33f   : > { %v6617_v53 = vpop.xlane.xlu1 %2737 }
 0x340   : > { %3294 = vadd.xlane.f32.xlu0 %v3293_v42  ;;  %v3234_v42 = vmul.f32 %v6263_v12, %v7141_v24 }
 0x341   : > { %v6622_v30 = vpop.xlane.xlu0 %2734 }
 0x342   : > { %3303 = vadd.xlane.f32.xlu1 %v3302_v5  ;;  %v3290_v12 = vsel %vm230_vm0, %v3234_v42, 0.0 }
 0x343   : > { %v6627_v13 = vpop.xlane.xlu1 %2799 }
 0x344   : > { %3300 = vadd.xlane.f32.xlu0 %v3299_v6  ;;  %v2900_v41 = vrot.slane %v6627_v13, 1  ;;  %v3233_v6 = vmul.f32 %v7133_v29, %v7141_v24 }
 0x345   : > { %v2797_v34 = vpop.xlane.xlu0 %2796 }
 0x346   : > { %v2899_v8 = vrot.slane %v2797_v34, 1  ;;  %3309 = vadd.xlane.f32.xlu1 %v3308_v31  ;;  %v3287_v57 = vsel %vm230_vm0, %v3233_v6, 0.0 }
 0x347   : > { %v6636_v52 = vpop.xlane.xlu1 %2805 }
 0x348   : > { %v2901_v48 = vsel %vm469_vm1, %v2899_v8, %v2900_v41  ;;  %3306 = vadd.xlane.f32.xlu0 %v3305_v9  ;;  %v7045_v43 = vrot.slane %v6636_v52, 1  ;;  %v3243_v8 = vmul.f32 %v7141_v24, %v6113_v37  ;;  %v2745_v24 = vadd.f32 %v6532_v61, %v6378_v25 }
 0x349   : > { %v6646_v5 = vadd.f32 %v2901_v48, %v6501_v18  ;;  %v2803_v33 = vpop.xlane.xlu0 %2802 }
 0x34a   : > { %v2902_v28 = vrot.slane %v2803_v33, 1  ;;  %3315 = vadd.xlane.f32.xlu1 %v3314_v20  ;;  %v3317_v6 = vsel %vm230_vm0, %v3243_v8, 0.0 }
 0x34b   : > { %v6651_v31 = vpop.xlane.xlu1 %2811 }
 0x34c   : > { %v2904_v18 = vsel %vm469_vm1, %v2902_v28, %v7045_v43  ;;  %3312 = vadd.xlane.f32.xlu0 %v3311_v40  ;;  %v7043_v34 = vrot.slane %v6651_v31, 1 }
 0x34d   : > { %v6661_v9 = vadd.f32 %v2904_v18, %v6513_v27  ;;  %v2809_v29 = vpop.xlane.xlu0 %2808 }
 0x34e   : > { %v2905_v20 = vrot.slane %v2809_v29, 1  ;;  %3291 = vadd.xlane.f32.xlu1 %v3290_v12 }
 0x34f   : > { %v6666_v42 = vpop.xlane.xlu1 %2817 }
 0x350   : > { %v2907_v48 = vsel %vm469_vm1, %v2905_v20, %v7043_v34  ;;  %3288 = vadd.xlane.f32.xlu0 %v3287_v57  ;;  %v7042_v27 = vrot.slane %v6666_v42, 1  ;;  %v2747_v57 = vadd.f32 %v6542_v58, %v6391_v54 }
 0x351   : > { %v6674_v33 = vadd.f32 %v2907_v48, %v6525_v17  ;;  %v2815_v40 = vpop.xlane.xlu0 %2814 }
 0x352   : > { %v2908_v37 = vrot.slane %v2815_v40, 1  ;;  %3321 = vadd.xlane.f32.xlu1 %v3320_v26  ;;  %v2749_v40 = vadd.f32 %v6552_v15, %v6404_v10  ;;  %v2754_v10 = vadd.f32 %v6567_v50, %v6420_v23 }
 0x353   : > { %v6679_v28 = vpop.xlane.xlu1 %2823 }
 0x354   : > { %v2910_v12 = vsel %vm469_vm1, %v2908_v37, %v7042_v27  ;;  %3318 = vadd.xlane.f32.xlu0 %v3317_v6  ;;  %v7044_v21 = vrot.slane %v6679_v28, 1  ;;  %v2752_v37 = vadd.f32 %v6557_v46, %v6407_v22 }
 0x355   : > { %v6685_v18 = vadd.f32 %v2910_v12, %v2745_v24  ;;  %v2821_v17 = vpop.xlane.xlu0 %2820 }
 0x356   : > { %v2911_v29 = vrot.slane %v2821_v17, 1 }
 0x357   : > { %v6689_v8 = vpop.xlane.xlu1 %2829 }
 0x358   : > { %v2913_v25 = vsel %vm469_vm1, %v2911_v29, %v7044_v21  ;;  %v2915_v61 = vrot.slane %v6689_v8, 1 }
 0x359   : > { %v6695_v20 = vadd.f32 %v2913_v25, %v2747_v57  ;;  %v2827_v26 = vpop.xlane.xlu0 %2826  ;;  %v2751_v57 = vadd.f32 %v6562_v2, %v6417_v55  ;;  %v2756_v55 = vadd.f32 %v6577_v3, %v6433_v62 }
 0x35a   : > { %v2914_v48 = vrot.slane %v2827_v26, 1 }
 0x35b   : > { %v2836_v6 = vpop.xlane.xlu1 %2835 }
 0x35c   : > { %v2916_v54 = vsel %vm469_vm1, %v2914_v48, %v2915_v61  ;;  %v2918_v58 = vrot.slane %v2836_v6, 1  ;;  %v2753_v6 = vadd.f32 %v6572_v56, %v6430_v0  ;;  %v2758_v0 = vadd.f32 %v6587_v7, %v6446_v39 }
 0x35d   : > { %v6704_v24 = vadd.f32 %v2916_v54, %v2749_v40  ;;  %v2833_v12 = vpop.xlane.xlu0 %2832 }
 0x35e   : > { %v6706_v17 = vadd.f32 %v2918_v58, %v2752_v37  ;;  %v2917_v29 = vrot.slane %v2833_v12, 1 }
 0x35f   : > { %v2842_v25 = vpop.xlane.xlu1 %2841 }
 0x360   : > { %v2919_v22 = vsel %vm469_vm1, %v2917_v29, %v2918_v58  ;;  %v2921_v15 = vrot.slane %v2842_v25, 1  ;;  %v2755_v29 = vadd.f32 %v6582_v11, %v6443_v4 }
 0x361   : > { %v6713_v46 = vadd.f32 %v2919_v22, %v2751_v57  ;;  %v2839_v26 = vpop.xlane.xlu0 %2838 }
 0x362   : > { %v6715_v48 = vadd.f32 %v2921_v15, %v2754_v10  ;;  %v2920_v40 = vrot.slane %v2839_v26, 1 }
 0x363   : > { %v2848_v37 = vpop.xlane.xlu1 %2847 }
 0x364   : > { %v2922_v2 = vsel %vm469_vm1, %v2920_v40, %v2921_v15  ;;  %v2924_v54 = vrot.slane %v2848_v37, 1  ;;  %v7142_v15 = vld [vmem:[#allocation4_spill] sm:$0xff] }
 0x365   : > { %v6722_v23 = vadd.f32 %v2922_v2, %v2753_v6  ;;  %v2845_v50 = vpop.xlane.xlu0 %2844  ;;  %v2757_v26 = vadd.f32 %v6592_v32, %v7142_v15  ;;  %v7143_v6 = vld [vmem:[#allocation10_spill] sm:$0xff]  ;;  %v2762_v32 = vadd.f32 %v6607_v19, %v6472_v60 }
 0x366   : > { %v6724_v58 = vadd.f32 %v2924_v54, %v2756_v55  ;;  %v2923_v12 = vrot.slane %v2845_v50, 1  ;;  %v2760_v4 = vadd.f32 %v6597_v1, %v7143_v6 }
 0x367   : > { %v2854_v57 = vpop.xlane.xlu1 %2853 }
 0x368   : > { %v2925_v56 = vsel %vm469_vm1, %v2923_v12, %v2924_v54  ;;  %v2927_v25 = vrot.slane %v2854_v57, 1  ;;  %v2759_v54 = vadd.f32 %v6602_v14, %v6469_v59  ;;  %v2764_v59 = vadd.f32 %v6617_v53, %v6485_v51 }
 0x369   : > { %v6731_v62 = vadd.f32 %v2925_v56, %v2755_v29  ;;  %v2851_v3 = vpop.xlane.xlu0 %2850 }
 0x36a   : > { %v6733_v10 = vadd.f32 %v2927_v25, %v2758_v0  ;;  %v2926_v22 = vrot.slane %v2851_v3, 1 }
 0x36b   : > { %v2860_v40 = vpop.xlane.xlu1 %2859 }
 0x36c   : > { %v2928_v11 = vsel %vm469_vm1, %v2926_v22, %v2927_v25  ;;  %v2930_v37 = vrot.slane %v2860_v40, 1  ;;  %v2761_v25 = vadd.f32 %v6612_v16, %v6482_v63  ;;  %v2763_v40 = vadd.f32 %v6622_v30, %v6498_v45  ;;  %v7145_v30 = vld [vmem:[#allocation5_spill] sm:$0xff] }
 0x36d   : > { %v6740_v39 = vadd.f32 %v2928_v11, %v2757_v26  ;;  %v2857_v7 = vpop.xlane.xlu0 %2856 }
 0x36e   : > { %v6742_v55 = vadd.f32 %v2930_v37, %v2760_v4  ;;  %v2929_v2 = vrot.slane %v2857_v7, 1 }
 0x36f   : > { %v2866_v50 = vpop.xlane.xlu1 %2865 }
 0x370   : > { %v2931_v12 = vsel %vm469_vm1, %v2929_v2, %v2930_v37  ;;  %v2933_v29 = vrot.slane %v2866_v50, 1  ;;  %v2750_v50 = vadd.f32 %v6547_v36, %v7145_v30 }
 0x371   : > { %v6749_v1 = vadd.f32 %v2931_v12, %v2759_v54  ;;  %v2863_v57 = vpop.xlane.xlu0 %2862 }
 0x372   : > { %v6751_v0 = vadd.f32 %v2933_v29, %v2762_v32  ;;  %v2932_v56 = vrot.slane %v2863_v57, 1  ;;  %v2975_v12 = vadd.f32 %v2915_v61, %v2750_v50 }
 0x373   : > { %v2872_v3 = vpop.xlane.xlu1 %2871 }
 0x374   : > { %v2934_v14 = vsel %vm469_vm1, %v2932_v56, %v2933_v29  ;;  %v2936_v22 = vrot.slane %v2872_v3, 1 }
 0x375   : > { %v6758_v60 = vadd.f32 %v2934_v14, %v2761_v25  ;;  %v2869_v19 = vpop.xlane.xlu0 %2868 }
 0x376   : > { %v6760_v15 = vadd.f32 %v2936_v22, %v2764_v59  ;;  %v2935_v26 = vrot.slane %v2869_v19, 1 }
 0x377   : > { %v3025_v6 = vpop.xlane.xlu1 %3024 }
 0x378   : > { %v2937_v4 = vsel %vm469_vm1, %v2935_v26, %v2936_v22 }
 0x379   : > { %v6765_v63 = vadd.f32 %v2937_v4, %v2763_v40  ;;  %v3022_v16 = vpop.xlane.xlu0 %3021 }
 0x37b   : > { %7144 = vst [vmem:[#allocation16_spill] sm:$0xff] %v6765_v63  ;;  %v6767_v11 = vpop.xlane.xlu1 %3030 }
 0x37d   : > { %v3028_v51 = vpop.xlane.xlu0 %3027 }
 0x37f   : > { %v6769_v53 = vpop.xlane.xlu1 %3036 }
 0x381   : > { %v6771_v37 = vpop.xlane.xlu0 %3033 }
 0x383   : > { %v6773_v7 = vpop.xlane.xlu1 %3042 }
 0x385   : > { %v6775_v2 = vpop.xlane.xlu0 %3039 }
 0x387   : > { %v6777_v54 = vpop.xlane.xlu1 %3048 }
 0x389   : > { %v6779_v45 = vpop.xlane.xlu0 %3045 }
 0x38b   : > { %v3055_v32 = vpop.xlane.xlu1 %3054 }
 0x38c   : > { %v3140_v29 = vrot.slane %v3055_v32, 2 }
 0x38d   : > { %v3052_v57 = vpop.xlane.xlu0 %3051 }
 0x38e   : > { %v6785_v56 = vadd.f32 %v3140_v29, %v2975_v12  ;;  %v3139_v25 = vrot.slane %v3052_v57, 2 }
 0x38f   : > { %v3061_v3 = vpop.xlane.xlu1 %3060 }
 0x390   : > { %v3141_v59 = vsel %vm695_vm2, %v3139_v25, %v3140_v29  ;;  %v3143_v14 = vrot.slane %v3061_v3, 2 }
 0x391   : > { %v6789_v22 = vadd.f32 %v3141_v59, %v6704_v24  ;;  %v3058_v19 = vpop.xlane.xlu0 %3057 }
 0x392   : > { %v6792_v26 = vadd.f32 %v3143_v14, %v6706_v17  ;;  %v3142_v36 = vrot.slane %v3058_v19, 2 }
 0x393   : > { %v3067_v40 = vpop.xlane.xlu1 %3066 }
 0x394   : > { %v3144_v8 = vsel %vm695_vm2, %v3142_v36, %v3143_v14  ;;  %v3146_v61 = vrot.slane %v3067_v40, 2  ;;  %v3125_v14 = vrot.slane %v3025_v6, 2  ;;  %v3124_v36 = vrot.slane %v3022_v16, 2 }
 0x395   : > { %v6796_v4 = vadd.f32 %v3144_v8, %v6713_v46  ;;  %v3064_v30 = vpop.xlane.xlu0 %3063 }
 0x396   : > { %v6799_v50 = vadd.f32 %v3146_v61, %v6715_v48  ;;  %v3145_v32 = vrot.slane %v3064_v30, 2  ;;  %v3126_v30 = vsel %vm695_vm2, %v3124_v36, %v3125_v14 }
 0x397   : > { %v6801_v12 = vpop.xlane.xlu1 %3072  ;;  %v3189_v43 = vadd.f32 %v3126_v30, %v6646_v5 }
 0x398   : > { %v3147_v24 = vsel %vm695_vm2, %v3145_v32, %v3146_v61  ;;  %v3128_v32 = vrot.slane %v6767_v11, 2  ;;  %v3130_v11 = vrot.slane %v6771_v37, 2 }
 0x399   : > { %v6805_v17 = vadd.f32 %v3147_v24, %v6722_v23  ;;  %v6807_v29 = vpop.xlane.xlu0 %3069  ;;  %v2965_v23 = vadd.f32 %v2900_v41, %v6491_v47  ;;  %v3127_v24 = vrot.slane %v3028_v51, 2 }
 0x39b   : > { %7146 = vst [vmem:[#allocation17_spill] sm:$0xff] %v6805_v17  ;;  %v6809_v57 = vpop.xlane.xlu1 %3078  ;;  %v3190_v8 = vadd.f32 %v3125_v14, %v2965_v23  ;;  %v3129_v63 = vsel %vm695_vm2, %v3127_v24, %v3128_v32  ;;  %v3131_v14 = vrot.slane %v6769_v53, 2 }
 0x39c   : > { %v3191_v5 = vadd.f32 %v3129_v63, %v6661_v9 }
 0x39d   : > { %v6811_v25 = vpop.xlane.xlu0 %3075  ;;  %v3132_v53 = vsel %vm695_vm2, %v3130_v11, %v3131_v14  ;;  %v3134_v11 = vrot.slane %v6773_v7, 2 }
 0x39e   : > { %v3193_v63 = vadd.f32 %v3132_v53, %v6674_v33  ;;  %v7151_v53 = vld [vmem:[#allocation3_spill] sm:$0xff] }
 0x39f   : > { %v6813_v46 = vpop.xlane.xlu1 %3084 }
 0x3a1   : > { %v6815_v3 = vpop.xlane.xlu0 %3081 }
 0x3a3   : > { %v6817_v48 = vpop.xlane.xlu1 %3090 }
 0x3a5   : > { %v6819_v59 = vpop.xlane.xlu0 %3087 }
 0x3a7   : > { %v6821_v19 = vpop.xlane.xlu1 %3096 }
 0x3a9   : > { %v6826_v40 = vpop.xlane.xlu0 %3093 }
 0x3ab   : > { %v3250_v61 = vpop.xlane.xlu1 %3249 }
 0x3ac   : > { %v3350_v27 = vrot.slane %v3250_v61, 3 }
 0x3ad   : > { %v3247_v34 = vpop.xlane.xlu0 %3246 }
 0x3ae   : > { %v3415_v21 = vadd.f32 %v3350_v27, %v3190_v8  ;;  %v3349_v6 = vrot.slane %v3247_v34, 3  ;;  %v7147_v34 = vrot.slane %v6636_v52, 1  ;;  %v3137_v52 = vrot.slane %v6777_v54, 2 }
 0x3af   : > { %v3256_v16 = vpop.xlane.xlu1 %3255 }
 0x3b0   : > { %v3441_v13 = vmul.f32 0.001, %v3415_v21  ;;  %v3351_v47 = vsel %vm921_vm3, %v3349_v6, %v3350_v27  ;;  %v3353_v41 = vrot.slane %v3256_v16, 3  ;;  %v2967_v36 = vadd.f32 %v7147_v34, %v6507_v35 }
 0x3b1   : > { %v3414_v23 = vadd.f32 %v3351_v47, %v3189_v43  ;;  %v3253_v17 = vpop.xlane.xlu0 %3252  ;;  %v7149_v47 = vrot.slane %v6679_v28, 1 }
 0x3b2   : > { %v3352_v51 = vrot.slane %v3253_v17, 3  ;;  %3496 = vperm.xlu1 %3808, %v3441_v13   ;;  %v3192_v30 = vadd.f32 %v3128_v32, %v2967_v36  ;;  %v7148_v13 = vld [vmem:[#allocation19_spill] sm:$0xff] }
 0x3b3   : > { %v3440_v8 = vmul.f32 0.001, %v3414_v23  ;;  %v3262_v61 = vpop.xlane.xlu1 %3261  ;;  %v2748_v35 = vadd.f32 %v6537_v44, %v7148_v13 }
 0x3b4   : > { %v3354_v21 = vsel %vm921_vm3, %v3352_v51, %v3353_v41  ;;  %v3356_v27 = vrot.slane %v3262_v61, 3  ;;  %v3417_v17 = vadd.f32 %v3353_v41, %v3192_v30  ;;  %v3133_v41 = vrot.slane %v6775_v2, 2 }
 0x3b5   : > { %v3416_v43 = vadd.f32 %v3354_v21, %v3191_v5  ;;  %3493 = vperm.xlu0 %3807, %v3440_v8   ;;  %v3259_v24 = vpop.xlane.xlu0 %3258  ;;  %v2973_v23 = vadd.f32 %v7149_v47, %v2748_v35  ;;  %v7150_v51 = vrot.slane %v6651_v31, 1 }
 0x3b6   : > { %v3355_v37 = vrot.slane %v3259_v24, 3  ;;  %v3443_v44 = vmul.f32 0.001, %v3417_v17  ;;  %v3135_v28 = vsel %vm695_vm2, %v3133_v41, %v3134_v11 }
 0x3b7   : > { %v3442_v6 = vmul.f32 0.001, %v3416_v43  ;;  %v3268_v16 = vpop.xlane.xlu1 %3267  ;;  %v2969_v34 = vadd.f32 %v7150_v51, %v6519_v38  ;;  %v3198_v5 = vadd.f32 %v3137_v52, %v2973_v23  ;;  %v3195_v17 = vadd.f32 %v3135_v28, %v6685_v18 }
 0x3b8   : > { %v3357_v9 = vsel %vm921_vm3, %v3355_v37, %v3356_v27  ;;  %v3359_v8 = vrot.slane %v3268_v16, 3  ;;  %v2746_v37 = vadd.f32 %v6527_v49, %v7151_v53  ;;  %v7152_v16 = vrot.slane %v6666_v42, 1 }
 0x3b9   : > { %3499 = vperm.xlu1 %3808, %v3442_v6   ;;  %v3265_v32 = vpop.xlane.xlu0 %3264  ;;  %v3418_v36 = vadd.f32 %v3357_v9, %v3193_v63  ;;  %v3194_v21 = vadd.f32 %v3131_v14, %v2969_v34  ;;  %v3136_v14 = vrot.slane %v6779_v45, 2  ;;  %v3149_v63 = vrot.slane %v6801_v12, 2 }
 0x3ba   : > { %v3358_v61 = vrot.slane %v3265_v32, 3  ;;  %v3148_v23 = vrot.slane %v6807_v29, 2  ;;  %v3152_v34 = vrot.slane %v6809_v57, 2 }
 0x3bb   : > { %v3274_v54 = vpop.xlane.xlu1 %3273  ;;  %v3419_v7 = vadd.f32 %v3356_v27, %v3194_v21  ;;  %v3444_v24 = vmul.f32 0.001, %v3418_v36  ;;  %v2971_v27 = vadd.f32 %v7152_v16, %v2746_v37  ;;  %v3138_v18 = vsel %vm695_vm2, %v3136_v14, %v3137_v52 }
 0x3bc   : > { %v3362_v33 = vrot.slane %v3274_v54, 3  ;;  %v3360_v31 = vsel %vm921_vm3, %v3358_v61, %v3359_v8  ;;  %v3206_v42 = vadd.f32 %v3149_v63, %v6724_v58  ;;  %v3197_v12 = vadd.f32 %v3138_v18, %v6695_v20 }
 0x3bd   : > { %3502 = vperm.xlu1 %3808, %v3443_v44   ;;  %v3271_v30 = vpop.xlane.xlu0 %3270  ;;  %v3445_v13 = vmul.f32 0.001, %v3419_v7  ;;  %v3420_v35 = vadd.f32 %v3360_v31, %v3195_v17  ;;  %v3196_v47 = vadd.f32 %v3134_v11, %v2971_v27  ;;  %v3150_v54 = vsel %vm695_vm2, %v3148_v23, %v3149_v63 }
 0x3be   : > { %v3423_v43 = vadd.f32 %v3362_v33, %v3198_v5  ;;  %v3361_v32 = vrot.slane %v3271_v30, 3  ;;  %v3151_v52 = vrot.slane %v6811_v25, 2  ;;  %v3208_v57 = vadd.f32 %v3152_v34, %v6733_v10 }
 0x3bf   : > { %v6854_v2 = vpop.xlane.xlu1 %3279  ;;  %v3421_v45 = vadd.f32 %v3359_v8, %v3196_v47  ;;  %v3446_v41 = vmul.f32 0.001, %v3420_v35  ;;  %v3205_v20 = vadd.f32 %v3150_v54, %v6731_v62  ;;  %v3155_v25 = vrot.slane %v6813_v46, 2 }
 0x3c0   : > { %v3449_v38 = vmul.f32 0.001, %v3423_v43  ;;  %v3363_v44 = vsel %vm921_vm3, %v3361_v32, %v3362_v33  ;;  %v3365_v21 = vrot.slane %v6854_v2, 3  ;;  %v3153_v7 = vsel %vm695_vm2, %v3151_v52, %v3152_v34 }
 0x3c1   : > { %3505 = vperm.xlu1 %3808, %v3444_v24   ;;  %v6860_v6 = vpop.xlane.xlu0 %3276  ;;  %v3447_v8 = vmul.f32 0.001, %v3421_v45  ;;  %v3422_v61 = vadd.f32 %v3363_v44, %v3197_v12  ;;  %v3207_v16 = vadd.f32 %v3153_v7, %v6740_v39  ;;  %v3210_v46 = vadd.f32 %v3155_v25, %v6742_v55 }
 0x3c2   : > { %3520 = vperm.xlu0 %3807, %v3449_v38   ;;  %v3425_v2 = vadd.f32 %v3365_v21, %v6785_v56  ;;  %v3364_v37 = vrot.slane %v6860_v6, 3  ;;  %v3158_v45 = vrot.slane %v6817_v48, 2 }
 0x3c3   : > { %v6865_v9 = vpop.xlane.xlu1 %3285  ;;  %v3448_v38 = vmul.f32 0.001, %v3422_v61 }
 0x3c4   : > { %v3451_v35 = vmul.f32 0.001, %v3425_v2  ;;  %v3366_v47 = vsel %vm921_vm3, %v3364_v37, %v3365_v21  ;;  %v3368_v6 = vrot.slane %v6865_v9, 3  ;;  %v3212_v48 = vadd.f32 %v3158_v45, %v6751_v0 }
 0x3c5   : > { %3508 = vperm.xlu1 %3808, %v3445_v13   ;;  %v6868_v49 = vpop.xlane.xlu0 %3282  ;;  %v3154_v13 = vrot.slane %v6815_v3, 2  ;;  %v3424_v55 = vadd.f32 %v3366_v47, %v6789_v22 }
 0x3c6   : > { %v3427_v34 = vadd.f32 %v3368_v6, %v6792_v26  ;;  %v3367_v44 = vrot.slane %v6868_v49, 3 }
 0x3c7   : > { %v3298_v51 = vpop.xlane.xlu1 %3297  ;;  %v3450_v54 = vmul.f32 0.001, %v3424_v55  ;;  %v7155_v55 = vlaneseq }
 0x3c8   : > { %v3374_v36 = vrot.slane %v3298_v51, 3  ;;  %v3369_v26 = vsel %vm921_vm3, %v3367_v44, %v3368_v6 }
 0x3c9   : > { %3511 = vperm.xlu1 %3808, %v3446_v41   ;;  %v3295_v11 = vpop.xlane.xlu0 %3294  ;;  %v3156_v41 = vsel %vm695_vm2, %v3154_v13, %v3155_v25  ;;  %v3426_v0 = vadd.f32 %v3369_v26, %v6796_v4  ;;  %v3160_v25 = vrot.slane %v6826_v40, 2 }
 0x3ca   : > { %v3431_v5 = vadd.f32 %v3374_v36, %v3206_v42  ;;  %v3373_v29 = vrot.slane %v3295_v11, 3  ;;  %v3209_v12 = vadd.f32 %v3156_v41, %v6749_v1  ;;  %v3157_v11 = vrot.slane %v6819_v59, 2 }
 0x3cb   : > { %v3304_v58 = vpop.xlane.xlu1 %3303  ;;  %v3161_v1 = vrot.slane %v6821_v19, 2  ;;  %v3452_v19 = vmul.f32 0.001, %v3426_v0 }
 0x3cc   : > { %v3457_v30 = vmul.f32 0.001, %v3431_v5  ;;  %v3375_v33 = vsel %vm921_vm3, %v3373_v29, %v3374_v36  ;;  %v3377_v28 = vrot.slane %v3304_v58, 3  ;;  %v3453_v29 = vmul.f32 0.001, %v3427_v34 }
 0x3cd   : > { %3514 = vperm.xlu1 %3808, %v3447_v8   ;;  %v3301_v43 = vpop.xlane.xlu0 %3300  ;;  %v3430_v53 = vadd.f32 %v3375_v33, %v3205_v20  ;;  %v3159_v21 = vsel %vm695_vm2, %v3157_v11, %v3158_v45  ;;  %v3214_v7 = vadd.f32 %v3161_v1, %v6760_v15 }
 0x3ce   : > { %v3433_v24 = vadd.f32 %v3377_v28, %v3208_v57  ;;  %v3376_v31 = vrot.slane %v3301_v43, 3  ;;  %3544 = vperm.xlu0 %3807, %v3457_v30   ;;  %v3211_v20 = vadd.f32 %v3159_v21, %v6758_v60  ;;  %v7153_v60 = vld [vmem:[#allocation17_spill] sm:$0xff] }
 0x3cf   : > { %v3310_v10 = vpop.xlane.xlu1 %3309  ;;  %v3456_v63 = vmul.f32 0.001, %v3430_v53 }
 0x3d0   : > { %v3459_v17 = vmul.f32 0.001, %v3433_v24  ;;  %v3378_v14 = vsel %vm921_vm3, %v3376_v31, %v3377_v28  ;;  %v3380_v62 = vrot.slane %v3310_v10, 3 }
 0x3d1   : > { %3517 = vperm.xlu1 %3808, %v3448_v38   ;;  %v3307_v27 = vpop.xlane.xlu0 %3306  ;;  %v3432_v56 = vadd.f32 %v3378_v14, %v3207_v16 }
 0x3d2   : > { %3550 = vperm.xlu0 %3807, %v3459_v17   ;;  %v3435_v18 = vadd.f32 %v3380_v62, %v3210_v46  ;;  %v3379_v23 = vrot.slane %v3307_v27, 3  ;;  %v7154_v17 = vld [vmem:[#allocation16_spill] sm:$0xff] }
 0x3d3   : > { %v3316_v32 = vpop.xlane.xlu1 %3315  ;;  %v3458_v3 = vmul.f32 0.001, %v3432_v56 }
 0x3d4   : > { %v3383_v51 = vrot.slane %v3316_v32, 3  ;;  %v3461_v36 = vmul.f32 0.001, %v3435_v18  ;;  %v3381_v9 = vsel %vm921_vm3, %v3379_v23, %v3380_v62 }
 0x3d5   : > { %3541 = vperm.xlu1 %3808, %v3456_v63   ;;  %v3313_v39 = vpop.xlane.xlu0 %3312  ;;  %v3434_v22 = vadd.f32 %v3381_v9, %v3209_v12  ;;  %v7156_v9 = vld [vmem:[#allocation2_spill] sm:$0xff] }
 0x3d6   : > { %3526 = vperm.xlu0 %3807, %v3451_v35   ;;  %v3437_v52 = vadd.f32 %v3383_v51, %v3212_v48  ;;  %v3382_v8 = vrot.slane %v3313_v39, 3 }
 0x3d7   : > { %v3292_v42 = vpop.xlane.xlu1 %3291  ;;  %v3460_v59 = vmul.f32 0.001, %v3434_v22 }
 0x3d8   : > { %v3371_v49 = vrot.slane %v3292_v42, 3  ;;  %v3463_v58 = vmul.f32 0.001, %v3437_v52  ;;  %v3384_v57 = vsel %vm921_vm3, %v3382_v8, %v3383_v51 }
 0x3d9   : > { %3547 = vperm.xlu1 %3808, %v3458_v3   ;;  %v3289_v5 = vpop.xlane.xlu0 %3288  ;;  %v3436_v24 = vadd.f32 %v3384_v57, %v3211_v20  ;;  %v3571_v3 = vand.u32 127, %v7155_v55 }
 0x3da   : > { %3556 = vperm.xlu0 %3807, %v3461_v36   ;;  %v3429_v30 = vadd.f32 %v3371_v49, %v6799_v50  ;;  %v3370_v33 = vrot.slane %v3289_v5, 3  ;;  %v3162_v50 = vsel %vm695_vm2, %v3160_v25, %v3161_v1 }
 0x3db   : > { %v3322_v61 = vpop.xlane.xlu1 %3321  ;;  %v3462_v53 = vmul.f32 0.001, %v3436_v24  ;;  %v3213_v40 = vadd.f32 %v3162_v50, %v7154_v17  ;;  %v3576_v34 = vadd.s32 4294967288, %v3571_v3  ;;  %v6924_v48 = vsub.s32 %v3571_v3, %v7156_v9 }
 0x3dc   : > { %v3386_v28 = vrot.slane %v3322_v61, 3  ;;  %v3455_v4 = vmul.f32 0.001, %v3429_v30  ;;  %v3372_v31 = vsel %vm921_vm3, %v3370_v33, %v3371_v49 }
 0x3dd   : > { %3523 = vperm.xlu1 %3808, %v3450_v54   ;;  %v3319_v43 = vpop.xlane.xlu0 %3318  ;;  %v3428_v10 = vadd.f32 %v3372_v31, %v7153_v60  ;;  %v6921_v12 = vsub.s32 %v3576_v34, %v7156_v9 }
 0x3de   : > { %3532 = vperm.xlu0 %3807, %v3453_v29   ;;  %v3439_v38 = vadd.f32 %v3386_v28, %v3214_v7  ;;  %v3385_v2 = vrot.slane %v3319_v43, 3 }
 0x3df   : > { %v3454_v14 = vmul.f32 0.001, %v3428_v10 }
 0x3e0   : > { %v3465_v37 = vmul.f32 0.001, %v3439_v38  ;;  %v3387_v15 = vsel %vm921_vm3, %v3385_v2, %v3386_v28 }
 0x3e1   : > { %3553 = vperm.xlu1 %3808, %v3460_v59   ;;  %v3438_v62 = vadd.f32 %v3387_v15, %v3213_v40 }
 0x3e2   : > { %3562 = vperm.xlu0 %3807, %v3463_v58  }
 0x3e3   : > { %v3464_v16 = vmul.f32 0.001, %v3438_v62 }
 0x3e5   : > { %3529 = vperm.xlu1 %3808, %v3452_v19  }
 0x3e6   : > { %3538 = vperm.xlu0 %3807, %v3455_v4  }
 0x3e9   : > { %3559 = vperm.xlu1 %3808, %v3462_v53  }
 0x3ea   : > { %3568 = vperm.xlu0 %3807, %v3465_v37  }
 0x3ed   : > { %3535 = vperm.xlu1 %3808, %v3454_v14  }
 0x3f1   : > { %3565 = vperm.xlu1 %3808, %v3464_v16  }
 0x42d   : > { %v3497_v27 = vpop.permute.xlu1 %3496 }
 0x42e   : > { %v3580_v5 = vrot.slane %v3497_v27, %v6921_v12 }
 0x430   : > { %v3494_v56 = vpop.permute.xlu0 %3493 }
 0x431   : > { %v3575_v29 = vrot.slane %v3494_v56, %v6924_v48 }
 0x433   : > { %v3582_v57 = vsel %vm3581_vm4, %v3580_v5, %v3575_v29 }
 0x434   : > { %v3500_v46 = vpop.permute.xlu1 %3499 }
 0x435   : > { %v3586_v26 = vrot.slane %v3500_v46, %v6924_v48 }
 0x438   : > { %v3503_v13 = vpop.permute.xlu1 %3502 }
 0x439   : > { %v3590_v54 = vrot.slane %v3503_v13, %v6921_v12 }
 0x43b   : > { %v3591_v21 = vsel %vm3581_vm4, %v3590_v54, %v3586_v26 }
 0x43c   : > { %v3506_v35 = vpop.permute.xlu1 %3505  ;;  %v3692_v7 = vsel %vm3691_vm5, %v3591_v21, %v3582_v57 }
 0x43d   : > { %v3521_v47 = vpop.permute.xlu0 %3520  ;;  %v3595_v61 = vrot.slane %v3506_v35, %v6924_v48 }
 0x43e   : > { %v3617_v30 = vrot.slane %v3521_v47, %v6921_v12 }
 0x440   : > { %v3509_v63 = vpop.permute.xlu1 %3508 }
 0x441   : > { %v3599_v52 = vrot.slane %v3509_v63, %v6921_v12 }
 0x443   : > { %v3600_v59 = vsel %vm3581_vm4, %v3599_v52, %v3595_v61 }
 0x444   : > { %v3512_v32 = vpop.permute.xlu1 %3511  ;;  %v3694_v19 = vsel %vm3693_vm6, %v3600_v59, %v3692_v7 }
 0x445   : > { %v3604_v1 = vrot.slane %v3512_v32, %v6924_v48 }
 0x448   : > { %v3515_v6 = vpop.permute.xlu1 %3514 }
 0x449   : > { %v6915_v18 = vpop.permute.xlu0 %3544  ;;  %v3608_v8 = vrot.slane %v3515_v6, %v6921_v12 }
 0x44a   : > { %v3653_v16 = vrot.slane %v6915_v18, %v6921_v12 }
 0x44b   : > { %v3609_v33 = vsel %vm3581_vm4, %v3608_v8, %v3604_v1 }
 0x44c   : > { %v3518_v23 = vpop.permute.xlu1 %3517  ;;  %v3696_v38 = vsel %vm3695_vm7, %v3609_v33, %v3694_v19 }
 0x44d   : > { %v3551_v45 = vpop.permute.xlu0 %3550  ;;  %v3613_v0 = vrot.slane %v3518_v23, %v6924_v48 }
 0x44e   : > { %v3662_v53 = vrot.slane %v3551_v45, %v6921_v12 }
 0x44f   : > { %v3618_v24 = vsel %vm3581_vm4, %v3617_v30, %v3613_v0 }
 0x450   : > { %v6917_v39 = vpop.permute.xlu1 %3541  ;;  %v3698_v17 = vsel %vm3697_vm8, %v3618_v24, %v3696_v38 }
 0x451   : > { %v3527_v41 = vpop.permute.xlu0 %3526  ;;  %v3649_v60 = vrot.slane %v6917_v39, %v6924_v48 }
 0x452   : > { %v3626_v25 = vrot.slane %v3527_v41, %v6921_v12 }
 0x453   : > { %v3654_v47 = vsel %vm3581_vm4, %v3653_v16, %v3649_v60 }
 0x454   : > { %v3548_v51 = vpop.permute.xlu1 %3547 }
 0x455   : > { %v3557_v42 = vpop.permute.xlu0 %3556  ;;  %v3658_v4 = vrot.slane %v3548_v51, %v6924_v48 }
 0x456   : > { %v3671_v40 = vrot.slane %v3557_v42, %v6921_v12 }
 0x457   : > { %v3663_v27 = vsel %vm3581_vm4, %v3662_v53, %v3658_v4 }
 0x458   : > { %v3524_v44 = vpop.permute.xlu1 %3523  ;;  %v3705_v45 = vsel %vm3691_vm5, %v3663_v27, %v3654_v47 }
 0x459   : > { %v3533_v36 = vpop.permute.xlu0 %3532  ;;  %v3622_v58 = vrot.slane %v3524_v44, %v6924_v48 }
 0x45a   : > { %v3635_v31 = vrot.slane %v3533_v36, %v6921_v12 }
 0x45b   : > { %v3627_v2 = vsel %vm3581_vm4, %v3626_v25, %v3622_v58 }
 0x45c   : > { %v3554_v11 = vpop.permute.xlu1 %3553  ;;  %v3700_v46 = vsel %vm3699_vm9, %v3627_v2, %v3698_v17 }
 0x45d   : > { %v3563_v22 = vpop.permute.xlu0 %3562  ;;  %v3667_v50 = vrot.slane %v3554_v11, %v6924_v48 }
 0x45e   : > { %v3680_v13 = vrot.slane %v3563_v22, %v6921_v12 }
 0x45f   : > { %v3672_v63 = vsel %vm3581_vm4, %v3671_v40, %v3667_v50 }
 0x460   : > { %v3530_v49 = vpop.permute.xlu1 %3529  ;;  %v3706_v55 = vsel %vm3693_vm6, %v3672_v63, %v3705_v45 }
 0x461   : > { %v3631_v28 = vrot.slane %v3530_v49, %v6924_v48  ;;  %v3539_v20 = vpop.permute.xlu0 %3538 }
 0x462   : > { %v3644_v14 = vrot.slane %v3539_v20, %v6921_v12 }
 0x463   : > { %v3636_v10 = vsel %vm3581_vm4, %v3635_v31, %v3631_v28 }
 0x464   : > { %v3560_v43 = vpop.permute.xlu1 %3559  ;;  %v3702_v56 = vsel %vm3701_vm10, %v3636_v10, %v3700_v46 }
 0x465   : > { %v3676_v37 = vrot.slane %v3560_v43, %v6924_v48  ;;  %v3569_v35 = vpop.permute.xlu0 %3568 }
 0x466   : > { %v3689_v39 = vrot.slane %v3569_v35, %v6921_v12 }
 0x467   : > { %v3681_v6 = vsel %vm3581_vm4, %v3680_v13, %v3676_v37 }
 0x468   : > { %v3536_v15 = vpop.permute.xlu1 %3535  ;;  %v3707_v3 = vsel %vm3695_vm7, %v3681_v6, %v3706_v55 }
 0x469   : > { %v3640_v62 = vrot.slane %v3536_v15, %v6924_v48 }
 0x46b   : > { %v3645_v32 = vsel %vm3581_vm4, %v3644_v14, %v3640_v62 }
 0x46c   : > { %v3704_v18 = vsel %vm3703_vm11, %v3645_v32, %v3702_v56  ;;  %v3566_v23 = vpop.permute.xlu1 %3565 }
 0x46d   : > { %3712 = vst.msk [vmem:[%s163_s21] sm:$0xff] %vm3711_vm12, %v3704_v18  ;;  %v3685_v41 = vrot.slane %v3566_v23, %v6924_v48 }
 0x46f   : > { %v3690_v51 = vsel %vm3581_vm4, %v3689_v39, %v3685_v41 }
 0x470   : > { %v3708_v42 = vsel %vm3697_vm8, %v3690_v51, %v3707_v3 }
 0x471   : > { %3714 = vst.msk [vmem:[%s163_s21 + $0x8] sm:$0x1f] %vm3713_vm13, %v3708_v42 }
 0x472 PF: > { %s12_s9 = sadd.s32 1, %s3887_s9  }
 0x473   : > { %p9_p4 = scmp.ge.s32.totalorder %s12_s9, 6  }
 0x475   :  { %11 = sbr.rel (!%p9_p4) target bundleno = 1 (0x1), region = 61 }

</bundles_post_ra>
